<compile_context>
chip_gen: v6e
topology: v6e:2x2x1
jax: 0.10.0
libtpu: 0.0.40
codegen_flags: <defaults>
</compile_context>

<pallas_src>
import jax
import jax.numpy as jnp
from jax import lax
from jax.experimental import pallas as pl
from jax.experimental.pallas import tpu as pltpu

# ---------------- model hyper-parameters (small, consistent with the module) --
B, S = 2, 8           # batch, sequence length
B_PAD = 8             # batch padded to a full sublane tile inside the kernel
EMB_DIM = 32
VOCAB = 50
CLASSES = 5
HIDDEN = 32
LAYER_NUM = 2         # attention_net's chunk(...,-1)[0]+[1] requires layer_num == 2
PAD_IDX = 0

G4 = 4 * HIDDEN       # per-direction packed gate width (i,f,o,g) = 128 lanes
G8 = 8 * HIDDEN       # both directions packed                    = 256 lanes

_VMEM = pl.BlockSpec(memory_space=pltpu.MemorySpace.VMEM)


# ---------------------------- fused Pallas kernel -----------------------------
def _bidir_layer(whh_ref, gx_ref, yf_ref, yb_ref):
    """Fused forward+backward LSTM recurrence for one layer.

    whh_ref: [2H, 8H]  block-diagonal hidden projection ([h_f | h_b] @ whh)
    gx_ref:  [S*B_PAD, 8H] precomputed input projection + bias
             (row t*B_PAD+b; cols [fwd(i,f,o,g) | bwd(i,f,o,g)])
    yf_ref:  [S*B_PAD, H]  fwd hidden at absolute time t   (written here)
    yb_ref:  [S*B_PAD, H]  bwd hidden at absolute time t   (written here)
    returns: [B_PAD, H]    h_fwd_final + h_bwd_final
    """
    H = HIDDEN
    whh = whh_ref[...]                                   # [2H, 8H], held in vregs
    h_cat = jnp.zeros((B_PAD, 2 * H), jnp.float32)       # [h_fwd | h_bwd]
    c_f = jnp.zeros((B_PAD, H), jnp.float32)
    c_b = jnp.zeros((B_PAD, H), jnp.float32)
    for t in range(S):                                   # static, fully unrolled
        r = S - 1 - t                                    # abs time of the bwd step
        gh = jnp.dot(h_cat, whh, preferred_element_type=jnp.float32)   # [B_PAD, 8H]
        gx_t = gx_ref[t * B_PAD:(t + 1) * B_PAD, :]
        gx_r = gx_ref[r * B_PAD:(r + 1) * B_PAD, :]
        gf = gh[:, :G4] + gx_t[:, :G4]                   # fwd gates (i,f,o,g)
        gb = gh[:, G4:] + gx_r[:, G4:]                   # bwd gates (i,f,o,g)

        sf = jax.nn.sigmoid(gf[:, :3 * H])               # one wide sigmoid (i,f,o)
        gg_f = jnp.tanh(gf[:, 3 * H:])
        c_f = sf[:, H:2 * H] * c_f + sf[:, :H] * gg_f
        h_f = sf[:, 2 * H:] * jnp.tanh(c_f)

        sb = jax.nn.sigmoid(gb[:, :3 * H])
        gg_b = jnp.tanh(gb[:, 3 * H:])
        c_b = sb[:, H:2 * H] * c_b + sb[:, :H] * gg_b
        h_b = sb[:, 2 * H:] * jnp.tanh(c_b)

        yf_ref[t * B_PAD:(t + 1) * B_PAD, :] = h_f       # fwd output @ abs time t
        yb_ref[r * B_PAD:(r + 1) * B_PAD, :] = h_b       # bwd output @ abs time r
        h_cat = jnp.concatenate([h_f, h_b], axis=-1)
    return h_cat[:, :H] + h_cat[:, H:]                   # sum of both final hiddens


def st_fused_kernel(tok_ref, emb_ref,
                    wx0_ref, whh0_ref, b0_ref,
                    wx1_ref, whh1_ref, b1_ref,
                    wq_ref, bq_ref, wfc_ref, bfc_ref,
                    out_ref,
                    gx_ref, yf0_ref, yb0_ref, yf1_ref, yb1_ref):
    H = HIDDEN

    # ---- embedding gather: one-hot matmul against the VMEM-resident table ----
    tok = tok_ref[...]                                               # [S*B_PAD, 1] i32
    vocab_ids = lax.broadcasted_iota(jnp.int32, (S * B_PAD, VOCAB), 1)
    onehot = (vocab_ids == tok).astype(jnp.float32)                  # [S*B_PAD, V]
    x0 = jnp.dot(onehot, emb_ref[...],
                 preferred_element_type=jnp.float32)                 # [S*B_PAD, E]

    # ---- layer 0: hoisted input projection + fused bidirectional recurrence --
    gx_ref[...] = (jnp.dot(x0, wx0_ref[...], preferred_element_type=jnp.float32)
                   + b0_ref[...])
    hsum = _bidir_layer(whh0_ref, gx_ref, yf0_ref, yb0_ref)

    # ---- layer 1 (input = [fwd | bwd] outputs of layer 0) ---------------------
    gx_ref[...] = (jnp.dot(yf0_ref[...], wx1_ref[0:H, :],
                           preferred_element_type=jnp.float32)
                   + jnp.dot(yb0_ref[...], wx1_ref[H:2 * H, :],
                             preferred_element_type=jnp.float32)
                   + b1_ref[...])
    hsum = hsum + _bidir_layer(whh1_ref, gx_ref, yf1_ref, yb1_ref)

    # ---- attention over the last layer's outputs + fc -------------------------
    # value = tanh(fwd_half + bwd_half)  (== chunk(lstm_out, 2, -1)[0] + [1])
    v = jnp.tanh(yf1_ref[...] + yb1_ref[...])                        # [S*B_PAD, H]
    q = jnp.maximum(jnp.dot(hsum, wq_ref[...],
                            preferred_element_type=jnp.float32)
                    + bq_ref[...], 0.0)                              # [B_PAD, H]
    cols = []
    for s in range(S):                                               # static loop
        v_s = v[s * B_PAD:(s + 1) * B_PAD, :]                        # [B_PAD, H]
        cols.append(jnp.sum(q * v_s, axis=1, keepdims=True))         # [B_PAD, 1]
    scores = jnp.concatenate(cols, axis=1)                           # [B_PAD, S]
    scores = scores - jnp.max(scores, axis=1, keepdims=True)
    p = jnp.exp(scores)
    w = p / jnp.sum(p, axis=1, keepdims=True)                        # softmax over S
    ctx = jnp.zeros((B_PAD, H), jnp.float32)
    for s in range(S):
        ctx = ctx + w[:, s:s + 1] * v[s * B_PAD:(s + 1) * B_PAD, :]  # [B_PAD, H]
    fc = (jnp.dot(ctx, wfc_ref[...], preferred_element_type=jnp.float32)
          + bfc_ref[...])                                            # [B_PAD, C]
    out_ref[...] = fc[:B, :]


# ---------------------------- weight packing (trace time) ---------------------
def _reorder_gates(w):
    """PyTorch LSTM gate order (i, f, g, o) -> (i, f, o, g) along the 4H axis."""
    H = HIDDEN
    return jnp.concatenate([w[0:H], w[H:2 * H], w[3 * H:4 * H], w[2 * H:3 * H]],
                           axis=0)


def _pack_layer(params, layer):
    """Pack both directions of one LSTM layer for the fused kernel.

    Returns:
      wx  [Din, 8H]  input projection, cols = [fwd(i,f,o,g) | bwd(i,f,o,g)]
      whh [2H, 8H]   block-diagonal hidden projection
      b   [1, 8H]    b_ih + b_hh for both directions
    """
    wx_d, whh_d, b_d = [], [], []
    for d in range(2):
        wx_d.append(_reorder_gates(params[f"w_ih_l{layer}_d{d}"]).T)   # [Din, 4H]
        whh_d.append(_reorder_gates(params[f"w_hh_l{layer}_d{d}"]).T)  # [H, 4H]
        b_d.append(_reorder_gates(params[f"b_ih_l{layer}_d{d}"]
                                  + params[f"b_hh_l{layer}_d{d}"]))    # [4H]
    wx = jnp.concatenate(wx_d, axis=1)                                 # [Din, 8H]
    z = jnp.zeros_like(whh_d[0])
    whh = jnp.concatenate([jnp.concatenate([whh_d[0], z], axis=1),
                           jnp.concatenate([z, whh_d[1]], axis=1)],
                          axis=0)                                      # [2H, 8H]
    b = jnp.concatenate(b_d)[None, :]                                  # [1, 8H]
    return wx, whh, b


# ---------------------------- wrapper ------------------------------------------
@jax.jit
def st_model_forward(x_tokens, params):
    wx0, whh0, b0 = _pack_layer(params, 0)
    wx1, whh1, b1 = _pack_layer(params, 1)

    # tokens: [B, S] -> time-major, batch padded to 8 sublanes, one lane.
    tok = jnp.pad(x_tokens.astype(jnp.int32), ((0, B_PAD - B), (0, 0)),
                  constant_values=PAD_IDX)                 # [B_PAD, S]
    tok_col = tok.T.reshape(S * B_PAD, 1)                  # row index = t*B_PAD + b

    return pl.pallas_call(
        st_fused_kernel,
        out_shape=jax.ShapeDtypeStruct((B, CLASSES), jnp.float32),
        in_specs=[_VMEM] * 12,
        out_specs=_VMEM,
        scratch_shapes=[
            pltpu.VMEM((S * B_PAD, G8), jnp.float32),      # gx (reused per layer)
            pltpu.VMEM((S * B_PAD, HIDDEN), jnp.float32),  # layer-0 fwd outputs
            pltpu.VMEM((S * B_PAD, HIDDEN), jnp.float32),  # layer-0 bwd outputs
            pltpu.VMEM((S * B_PAD, HIDDEN), jnp.float32),  # layer-1 fwd outputs
            pltpu.VMEM((S * B_PAD, HIDDEN), jnp.float32),  # layer-1 bwd outputs
        ],
    )(tok_col, params["embedding"],
      wx0, whh0, b0, wx1, whh1, b1,
      params["wq"].T, params["bq"][None, :],
      params["wfc"].T, params["bfc"][None, :])


# ---------------------------- pure-JAX reference (correctness check) -----------
def st_model_reference(x_tokens, params):
    emb = params["embedding"][x_tokens]                    # [B, S, E]
    layer_in = emb
    finals = []
    for l in range(LAYER_NUM):
        outs = []
        for d in range(2):
            w_ih = params[f"w_ih_l{l}_d{d}"]
            w_hh = params[f"w_hh_l{l}_d{d}"]
            bias = params[f"b_ih_l{l}_d{d}"] + params[f"b_hh_l{l}_d{d}"]
            seq = layer_in if d == 0 else layer_in[:, ::-1]
            h = jnp.zeros((x_tokens.shape[0], HIDDEN), jnp.float32)
            c = jnp.zeros_like(h)
            hs = []
            for t in range(S):
                g = seq[:, t] @ w_ih.T + h @ w_hh.T + bias
                i = jax.nn.sigmoid(g[:, 0:HIDDEN])
                f = jax.nn.sigmoid(g[:, HIDDEN:2 * HIDDEN])
                gg = jnp.tanh(g[:, 2 * HIDDEN:3 * HIDDEN])
                o = jax.nn.sigmoid(g[:, 3 * HIDDEN:4 * HIDDEN])
                c = f * c + i * gg
                h = o * jnp.tanh(c)
                hs.append(h)
            out = jnp.stack(hs, axis=1)
            if d == 1:
                out = out[:, ::-1]
            outs.append(out)
            finals.append(h)
        layer_in = jnp.concatenate(outs, axis=-1)
    hsum = sum(finals)
    q = jnp.maximum(hsum @ params["wq"].T + params["bq"], 0.0)
    v = jnp.tanh(layer_in[:, :, :HIDDEN] + layer_in[:, :, HIDDEN:])
    sc = jnp.einsum("bh,bsh->bs", q, v)
    w = jax.nn.softmax(sc, axis=-1)
    ctx = jnp.einsum("bs,bsh->bh", w, v)
    return ctx @ params["wfc"].T + params["bfc"]


# ---------------------------- deterministic parameter init ---------------------
def init_params(key):
    initrange = 0.1
    k_lstm = 1.0 / jnp.sqrt(HIDDEN)
    keys = iter(jax.random.split(key, 64))
    params = {}

    emb = jax.random.normal(next(keys), (VOCAB, EMB_DIM), jnp.float32)
    emb = emb.at[PAD_IDX].set(0.0)                            # padding_idx row is zero
    params["embedding"] = emb

    for l in range(LAYER_NUM):
        in_dim = EMB_DIM if l == 0 else 2 * HIDDEN
        for d in range(2):
            params[f"w_ih_l{l}_d{d}"] = jax.random.uniform(
                next(keys), (4 * HIDDEN, in_dim), jnp.float32, -k_lstm, k_lstm)
            params[f"w_hh_l{l}_d{d}"] = jax.random.uniform(
                next(keys), (4 * HIDDEN, HIDDEN), jnp.float32, -k_lstm, k_lstm)
            params[f"b_ih_l{l}_d{d}"] = jax.random.uniform(
                next(keys), (4 * HIDDEN,), jnp.float32, -k_lstm, k_lstm)
            params[f"b_hh_l{l}_d{d}"] = jax.random.uniform(
                next(keys), (4 * HIDDEN,), jnp.float32, -k_lstm, k_lstm)

    # attention_query_layer Linear: weight ~ U(-0.1, 0.1) (init_weights), default bias
    params["wq"] = jax.random.uniform(
        next(keys), (HIDDEN, HIDDEN), jnp.float32, -initrange, initrange)
    params["bq"] = jax.random.uniform(
        next(keys), (HIDDEN,), jnp.float32, -k_lstm, k_lstm)
    # fc: weight ~ U(-0.1, 0.1), bias zero (init_weights)
    params["wfc"] = jax.random.uniform(
        next(keys), (CLASSES, HIDDEN), jnp.float32, -initrange, initrange)
    params["bfc"] = jnp.zeros((CLASSES,), jnp.float32)
    return params


# ---------------------------- main ---------------------------------------------
if __name__ == "__main__":
    key = jax.random.PRNGKey(0)
    params = init_params(key)
    x = jax.random.randint(jax.random.fold_in(key, 123), (B, S), 0, VOCAB,
                           dtype=jnp.int32)

    out = st_model_forward(x, params)
    out = jax.block_until_ready(out)
    assert out.shape == (B, CLASSES), out.shape
    assert bool(jnp.all(jnp.isfinite(out)))

    ref = jax.block_until_ready(st_model_reference(x, params))
    assert bool(jnp.allclose(out, ref, atol=2e-4, rtol=2e-4)), \
        float(jnp.max(jnp.abs(out - ref)))
    print("KERNEL_OK")
</pallas_src>

<mosaic_0001>
module attributes {stable_mosaic.version = 11 : i64} {
  func.func @st_fused_kernel(%arg0: memref<64x1xi32, #tpu.memory_space<vmem>>, %arg1: memref<50x32xf32, #tpu.memory_space<vmem>>, %arg2: memref<32x256xf32, #tpu.memory_space<vmem>>, %arg3: memref<64x256xf32, #tpu.memory_space<vmem>>, %arg4: memref<1x256xf32, #tpu.memory_space<vmem>>, %arg5: memref<64x256xf32, #tpu.memory_space<vmem>>, %arg6: memref<64x256xf32, #tpu.memory_space<vmem>>, %arg7: memref<1x256xf32, #tpu.memory_space<vmem>>, %arg8: memref<32x32xf32, #tpu.memory_space<vmem>>, %arg9: memref<1x32xf32, #tpu.memory_space<vmem>>, %arg10: memref<32x5xf32, #tpu.memory_space<vmem>>, %arg11: memref<1x5xf32, #tpu.memory_space<vmem>>, %arg12: memref<2x5xf32, #tpu.memory_space<vmem>>, %arg13: memref<64x256xf32, #tpu.memory_space<vmem>>, %arg14: memref<64x32xf32, #tpu.memory_space<vmem>>, %arg15: memref<64x32xf32, #tpu.memory_space<vmem>>, %arg16: memref<64x32xf32, #tpu.memory_space<vmem>>, %arg17: memref<64x32xf32, #tpu.memory_space<vmem>>) attributes {dimension_semantics = [], scalar_prefetch = 0 : i64, scratch_operands = 5 : i64, tpu.core_type = #tpu.core_type<tc>} {
    %c0 = arith.constant 0 : index
    %c0_0 = arith.constant 0 : index
    %0 = vector.load %arg0[%c0, %c0_0] : memref<64x1xi32, #tpu.memory_space<vmem>>, vector<64x1xi32>
    %1 = tpu.iota {dimensions = array<i32: 1>} : vector<64x50xi32>
    %2 = vector.broadcast %0 : vector<64x1xi32> to vector<64x50xi32>
    %3 = arith.cmpi eq, %1, %2 : vector<64x50xi32>
    %4 = arith.extui %3 : vector<64x50xi1> to vector<64x50xi32>
    %5 = arith.sitofp %4 : vector<64x50xi32> to vector<64x50xf32>
    %c0_1 = arith.constant 0 : index
    %c0_2 = arith.constant 0 : index
    %6 = vector.load %arg1[%c0_1, %c0_2] : memref<50x32xf32, #tpu.memory_space<vmem>>, vector<50x32xf32>
    %cst = arith.constant dense<0.000000e+00> : vector<64x32xf32>
    %7 = tpu.matmul %5, %6, %cst {dimension_numbers = #tpu.dot_dimension_numbers<[1], [0], [0], [1], [0, 0, 1, 1], [], []>} : vector<64x50xf32>, vector<50x32xf32>, vector<64x32xf32> -> vector<64x32xf32>
    %c0_3 = arith.constant 0 : index
    %c0_4 = arith.constant 0 : index
    %8 = vector.load %arg2[%c0_3, %c0_4] : memref<32x256xf32, #tpu.memory_space<vmem>>, vector<32x256xf32>
    %cst_5 = arith.constant dense<0.000000e+00> : vector<64x256xf32>
    %9 = tpu.matmul %7, %8, %cst_5 {dimension_numbers = #tpu.dot_dimension_numbers<[1], [0], [0], [1], [0, 0, 1, 1], [], []>} : vector<64x32xf32>, vector<32x256xf32>, vector<64x256xf32> -> vector<64x256xf32>
    %c0_6 = arith.constant 0 : index
    %c0_7 = arith.constant 0 : index
    %10 = vector.load %arg4[%c0_6, %c0_7] : memref<1x256xf32, #tpu.memory_space<vmem>>, vector<1x256xf32>
    %11 = vector.broadcast %10 : vector<1x256xf32> to vector<64x256xf32>
    %12 = arith.addf %9, %11 : vector<64x256xf32>
    %c0_8 = arith.constant 0 : index
    %c0_9 = arith.constant 0 : index
    %13 = vector.load %arg13[%c0_8, %c0_9] : memref<64x256xf32, #tpu.memory_space<vmem>>, vector<64x256xf32>
    tpu.vector_store %arg13[%c0_8, %c0_9], %12 {strides = array<i32>} : memref<64x256xf32, #tpu.memory_space<vmem>>, vector<64x256xf32>,
    %c0_10 = arith.constant 0 : index
    %c0_11 = arith.constant 0 : index
    %14 = vector.load %arg3[%c0_10, %c0_11] : memref<64x256xf32, #tpu.memory_space<vmem>>, vector<64x256xf32>
    %cst_12 = arith.constant 0.000000e+00 : f32
    %15 = vector.broadcast %cst_12 : f32 to vector<8x64xf32>
    %cst_13 = arith.constant 0.000000e+00 : f32
    %16 = vector.broadcast %cst_13 : f32 to vector<8x32xf32>
    %cst_14 = arith.constant 0.000000e+00 : f32
    %17 = vector.broadcast %cst_14 : f32 to vector<8x32xf32>
    %cst_15 = arith.constant dense<0.000000e+00> : vector<8x256xf32>
    %18 = tpu.matmul %15, %14, %cst_15 {dimension_numbers = #tpu.dot_dimension_numbers<[1], [0], [0], [1], [0, 0, 1, 1], [], []>} : vector<8x64xf32>, vector<64x256xf32>, vector<8x256xf32> -> vector<8x256xf32>
    %c0_16 = arith.constant 0 : index
    %c0_17 = arith.constant 0 : index
    %19 = vector.load %arg13[%c0_16, %c0_17] : memref<64x256xf32, #tpu.memory_space<vmem>>, vector<8x256xf32>
    %c56 = arith.constant 56 : index
    %c0_18 = arith.constant 0 : index
    %20 = vector.load %arg13[%c56, %c0_18] : memref<64x256xf32, #tpu.memory_space<vmem>>, vector<8x256xf32>
    %21 = vector.extract_strided_slice %18 {offsets = [0, 0], sizes = [8, 128], strides = [1, 1]} : vector<8x256xf32> to vector<8x128xf32>
    %22 = vector.extract_strided_slice %19 {offsets = [0, 0], sizes = [8, 128], strides = [1, 1]} : vector<8x256xf32> to vector<8x128xf32>
    %23 = arith.addf %21, %22 : vector<8x128xf32>
    %24 = vector.extract_strided_slice %18 {offsets = [0, 128], sizes = [8, 128], strides = [1, 1]} : vector<8x256xf32> to vector<8x128xf32>
    %25 = vector.extract_strided_slice %20 {offsets = [0, 128], sizes = [8, 128], strides = [1, 1]} : vector<8x256xf32> to vector<8x128xf32>
    %26 = arith.addf %24, %25 : vector<8x128xf32>
    %27 = vector.extract_strided_slice %23 {offsets = [0, 0], sizes = [8, 96], strides = [1, 1]} : vector<8x128xf32> to vector<8x96xf32>
    %28 = arith.negf %27 : vector<8x96xf32>
    %29 = math.exp %28 : vector<8x96xf32>
    %cst_19 = arith.constant 1.000000e+00 : f32
    %30 = vector.broadcast %cst_19 : f32 to vector<8x96xf32>
    %31 = arith.addf %30, %29 : vector<8x96xf32>
    %32 = arith.divf %30, %31 : vector<8x96xf32>
    %33 = vector.extract_strided_slice %23 {offsets = [0, 96], sizes = [8, 32], strides = [1, 1]} : vector<8x128xf32> to vector<8x32xf32>
    %34 = math.tanh %33 : vector<8x32xf32>
    %35 = vector.extract_strided_slice %32 {offsets = [0, 32], sizes = [8, 32], strides = [1, 1]} : vector<8x96xf32> to vector<8x32xf32>
    %36 = arith.mulf %35, %16 : vector<8x32xf32>
    %37 = vector.extract_strided_slice %32 {offsets = [0, 0], sizes = [8, 32], strides = [1, 1]} : vector<8x96xf32> to vector<8x32xf32>
    %38 = arith.mulf %37, %34 : vector<8x32xf32>
    %39 = arith.addf %36, %38 : vector<8x32xf32>
    %40 = vector.extract_strided_slice %32 {offsets = [0, 64], sizes = [8, 32], strides = [1, 1]} : vector<8x96xf32> to vector<8x32xf32>
    %41 = math.tanh %39 : vector<8x32xf32>
    %42 = arith.mulf %40, %41 : vector<8x32xf32>
    %43 = vector.extract_strided_slice %26 {offsets = [0, 0], sizes = [8, 96], strides = [1, 1]} : vector<8x128xf32> to vector<8x96xf32>
    %44 = arith.negf %43 : vector<8x96xf32>
    %45 = math.exp %44 : vector<8x96xf32>
    %cst_20 = arith.constant 1.000000e+00 : f32
    %46 = vector.broadcast %cst_20 : f32 to vector<8x96xf32>
    %47 = arith.addf %46, %45 : vector<8x96xf32>
    %48 = arith.divf %46, %47 : vector<8x96xf32>
    %49 = vector.extract_strided_slice %26 {offsets = [0, 96], sizes = [8, 32], strides = [1, 1]} : vector<8x128xf32> to vector<8x32xf32>
    %50 = math.tanh %49 : vector<8x32xf32>
    %51 = vector.extract_strided_slice %48 {offsets = [0, 32], sizes = [8, 32], strides = [1, 1]} : vector<8x96xf32> to vector<8x32xf32>
    %52 = arith.mulf %51, %17 : vector<8x32xf32>
    %53 = vector.extract_strided_slice %48 {offsets = [0, 0], sizes = [8, 32], strides = [1, 1]} : vector<8x96xf32> to vector<8x32xf32>
    %54 = arith.mulf %53, %50 : vector<8x32xf32>
    %55 = arith.addf %52, %54 : vector<8x32xf32>
    %56 = vector.extract_strided_slice %48 {offsets = [0, 64], sizes = [8, 32], strides = [1, 1]} : vector<8x96xf32> to vector<8x32xf32>
    %57 = math.tanh %55 : vector<8x32xf32>
    %58 = arith.mulf %56, %57 : vector<8x32xf32>
    %c0_21 = arith.constant 0 : index
    %c0_22 = arith.constant 0 : index
    %59 = vector.load %arg14[%c0_21, %c0_22] : memref<64x32xf32, #tpu.memory_space<vmem>>, vector<8x32xf32>
    tpu.vector_store %arg14[%c0_21, %c0_22], %42 {strides = array<i32>} : memref<64x32xf32, #tpu.memory_space<vmem>>, vector<8x32xf32>,
    %c56_23 = arith.constant 56 : index
    %c0_24 = arith.constant 0 : index
    %60 = vector.load %arg15[%c56_23, %c0_24] : memref<64x32xf32, #tpu.memory_space<vmem>>, vector<8x32xf32>
    tpu.vector_store %arg15[%c56_23, %c0_24], %58 {strides = array<i32>} : memref<64x32xf32, #tpu.memory_space<vmem>>, vector<8x32xf32>,
    %61 = tpu.concatenate %42, %58 in 1 : vector<8x32xf32>, vector<8x32xf32> -> vector<8x64xf32>
    %cst_25 = arith.constant dense<0.000000e+00> : vector<8x256xf32>
    %62 = tpu.matmul %61, %14, %cst_25 {dimension_numbers = #tpu.dot_dimension_numbers<[1], [0], [0], [1], [0, 0, 1, 1], [], []>} : vector<8x64xf32>, vector<64x256xf32>, vector<8x256xf32> -> vector<8x256xf32>
    %c8 = arith.constant 8 : index
    %c0_26 = arith.constant 0 : index
    %63 = vector.load %arg13[%c8, %c0_26] : memref<64x256xf32, #tpu.memory_space<vmem>>, vector<8x256xf32>
    %c48 = arith.constant 48 : index
    %c0_27 = arith.constant 0 : index
    %64 = vector.load %arg13[%c48, %c0_27] : memref<64x256xf32, #tpu.memory_space<vmem>>, vector<8x256xf32>
    %65 = vector.extract_strided_slice %62 {offsets = [0, 0], sizes = [8, 128], strides = [1, 1]} : vector<8x256xf32> to vector<8x128xf32>
    %66 = vector.extract_strided_slice %63 {offsets = [0, 0], sizes = [8, 128], strides = [1, 1]} : vector<8x256xf32> to vector<8x128xf32>
    %67 = arith.addf %65, %66 : vector<8x128xf32>
    %68 = vector.extract_strided_slice %62 {offsets = [0, 128], sizes = [8, 128], strides = [1, 1]} : vector<8x256xf32> to vector<8x128xf32>
    %69 = vector.extract_strided_slice %64 {offsets = [0, 128], sizes = [8, 128], strides = [1, 1]} : vector<8x256xf32> to vector<8x128xf32>
    %70 = arith.addf %68, %69 : vector<8x128xf32>
    %71 = vector.extract_strided_slice %67 {offsets = [0, 0], sizes = [8, 96], strides = [1, 1]} : vector<8x128xf32> to vector<8x96xf32>
    %72 = arith.negf %71 : vector<8x96xf32>
    %73 = math.exp %72 : vector<8x96xf32>
    %cst_28 = arith.constant 1.000000e+00 : f32
    %74 = vector.broadcast %cst_28 : f32 to vector<8x96xf32>
    %75 = arith.addf %74, %73 : vector<8x96xf32>
    %76 = arith.divf %74, %75 : vector<8x96xf32>
    %77 = vector.extract_strided_slice %67 {offsets = [0, 96], sizes = [8, 32], strides = [1, 1]} : vector<8x128xf32> to vector<8x32xf32>
    %78 = math.tanh %77 : vector<8x32xf32>
    %79 = vector.extract_strided_slice %76 {offsets = [0, 32], sizes = [8, 32], strides = [1, 1]} : vector<8x96xf32> to vector<8x32xf32>
    %80 = arith.mulf %79, %39 : vector<8x32xf32>
    %81 = vector.extract_strided_slice %76 {offsets = [0, 0], sizes = [8, 32], strides = [1, 1]} : vector<8x96xf32> to vector<8x32xf32>
    %82 = arith.mulf %81, %78 : vector<8x32xf32>
    %83 = arith.addf %80, %82 : vector<8x32xf32>
    %84 = vector.extract_strided_slice %76 {offsets = [0, 64], sizes = [8, 32], strides = [1, 1]} : vector<8x96xf32> to vector<8x32xf32>
    %85 = math.tanh %83 : vector<8x32xf32>
    %86 = arith.mulf %84, %85 : vector<8x32xf32>
    %87 = vector.extract_strided_slice %70 {offsets = [0, 0], sizes = [8, 96], strides = [1, 1]} : vector<8x128xf32> to vector<8x96xf32>
    %88 = arith.negf %87 : vector<8x96xf32>
    %89 = math.exp %88 : vector<8x96xf32>
    %cst_29 = arith.constant 1.000000e+00 : f32
    %90 = vector.broadcast %cst_29 : f32 to vector<8x96xf32>
    %91 = arith.addf %90, %89 : vector<8x96xf32>
    %92 = arith.divf %90, %91 : vector<8x96xf32>
    %93 = vector.extract_strided_slice %70 {offsets = [0, 96], sizes = [8, 32], strides = [1, 1]} : vector<8x128xf32> to vector<8x32xf32>
    %94 = math.tanh %93 : vector<8x32xf32>
    %95 = vector.extract_strided_slice %92 {offsets = [0, 32], sizes = [8, 32], strides = [1, 1]} : vector<8x96xf32> to vector<8x32xf32>
    %96 = arith.mulf %95, %55 : vector<8x32xf32>
    %97 = vector.extract_strided_slice %92 {offsets = [0, 0], sizes = [8, 32], strides = [1, 1]} : vector<8x96xf32> to vector<8x32xf32>
    %98 = arith.mulf %97, %94 : vector<8x32xf32>
    %99 = arith.addf %96, %98 : vector<8x32xf32>
    %100 = vector.extract_strided_slice %92 {offsets = [0, 64], sizes = [8, 32], strides = [1, 1]} : vector<8x96xf32> to vector<8x32xf32>
    %101 = math.tanh %99 : vector<8x32xf32>
    %102 = arith.mulf %100, %101 : vector<8x32xf32>
    %c8_30 = arith.constant 8 : index
    %c0_31 = arith.constant 0 : index
    %103 = vector.load %arg14[%c8_30, %c0_31] : memref<64x32xf32, #tpu.memory_space<vmem>>, vector<8x32xf32>
    tpu.vector_store %arg14[%c8_30, %c0_31], %86 {strides = array<i32>} : memref<64x32xf32, #tpu.memory_space<vmem>>, vector<8x32xf32>,
    %c48_32 = arith.constant 48 : index
    %c0_33 = arith.constant 0 : index
    %104 = vector.load %arg15[%c48_32, %c0_33] : memref<64x32xf32, #tpu.memory_space<vmem>>, vector<8x32xf32>
    tpu.vector_store %arg15[%c48_32, %c0_33], %102 {strides = array<i32>} : memref<64x32xf32, #tpu.memory_space<vmem>>, vector<8x32xf32>,
    %105 = tpu.concatenate %86, %102 in 1 : vector<8x32xf32>, vector<8x32xf32> -> vector<8x64xf32>
    %cst_34 = arith.constant dense<0.000000e+00> : vector<8x256xf32>
    %106 = tpu.matmul %105, %14, %cst_34 {dimension_numbers = #tpu.dot_dimension_numbers<[1], [0], [0], [1], [0, 0, 1, 1], [], []>} : vector<8x64xf32>, vector<64x256xf32>, vector<8x256xf32> -> vector<8x256xf32>
    %c16 = arith.constant 16 : index
    %c0_35 = arith.constant 0 : index
    %107 = vector.load %arg13[%c16, %c0_35] : memref<64x256xf32, #tpu.memory_space<vmem>>, vector<8x256xf32>
    %c40 = arith.constant 40 : index
    %c0_36 = arith.constant 0 : index
    %108 = vector.load %arg13[%c40, %c0_36] : memref<64x256xf32, #tpu.memory_space<vmem>>, vector<8x256xf32>
    %109 = vector.extract_strided_slice %106 {offsets = [0, 0], sizes = [8, 128], strides = [1, 1]} : vector<8x256xf32> to vector<8x128xf32>
    %110 = vector.extract_strided_slice %107 {offsets = [0, 0], sizes = [8, 128], strides = [1, 1]} : vector<8x256xf32> to vector<8x128xf32>
    %111 = arith.addf %109, %110 : vector<8x128xf32>
    %112 = vector.extract_strided_slice %106 {offsets = [0, 128], sizes = [8, 128], strides = [1, 1]} : vector<8x256xf32> to vector<8x128xf32>
    %113 = vector.extract_strided_slice %108 {offsets = [0, 128], sizes = [8, 128], strides = [1, 1]} : vector<8x256xf32> to vector<8x128xf32>
    %114 = arith.addf %112, %113 : vector<8x128xf32>
    %115 = vector.extract_strided_slice %111 {offsets = [0, 0], sizes = [8, 96], strides = [1, 1]} : vector<8x128xf32> to vector<8x96xf32>
    %116 = arith.negf %115 : vector<8x96xf32>
    %117 = math.exp %116 : vector<8x96xf32>
    %cst_37 = arith.constant 1.000000e+00 : f32
    %118 = vector.broadcast %cst_37 : f32 to vector<8x96xf32>
    %119 = arith.addf %118, %117 : vector<8x96xf32>
    %120 = arith.divf %118, %119 : vector<8x96xf32>
    %121 = vector.extract_strided_slice %111 {offsets = [0, 96], sizes = [8, 32], strides = [1, 1]} : vector<8x128xf32> to vector<8x32xf32>
    %122 = math.tanh %121 : vector<8x32xf32>
    %123 = vector.extract_strided_slice %120 {offsets = [0, 32], sizes = [8, 32], strides = [1, 1]} : vector<8x96xf32> to vector<8x32xf32>
    %124 = arith.mulf %123, %83 : vector<8x32xf32>
    %125 = vector.extract_strided_slice %120 {offsets = [0, 0], sizes = [8, 32], strides = [1, 1]} : vector<8x96xf32> to vector<8x32xf32>
    %126 = arith.mulf %125, %122 : vector<8x32xf32>
    %127 = arith.addf %124, %126 : vector<8x32xf32>
    %128 = vector.extract_strided_slice %120 {offsets = [0, 64], sizes = [8, 32], strides = [1, 1]} : vector<8x96xf32> to vector<8x32xf32>
    %129 = math.tanh %127 : vector<8x32xf32>
    %130 = arith.mulf %128, %129 : vector<8x32xf32>
    %131 = vector.extract_strided_slice %114 {offsets = [0, 0], sizes = [8, 96], strides = [1, 1]} : vector<8x128xf32> to vector<8x96xf32>
    %132 = arith.negf %131 : vector<8x96xf32>
    %133 = math.exp %132 : vector<8x96xf32>
    %cst_38 = arith.constant 1.000000e+00 : f32
    %134 = vector.broadcast %cst_38 : f32 to vector<8x96xf32>
    %135 = arith.addf %134, %133 : vector<8x96xf32>
    %136 = arith.divf %134, %135 : vector<8x96xf32>
    %137 = vector.extract_strided_slice %114 {offsets = [0, 96], sizes = [8, 32], strides = [1, 1]} : vector<8x128xf32> to vector<8x32xf32>
    %138 = math.tanh %137 : vector<8x32xf32>
    %139 = vector.extract_strided_slice %136 {offsets = [0, 32], sizes = [8, 32], strides = [1, 1]} : vector<8x96xf32> to vector<8x32xf32>
    %140 = arith.mulf %139, %99 : vector<8x32xf32>
    %141 = vector.extract_strided_slice %136 {offsets = [0, 0], sizes = [8, 32], strides = [1, 1]} : vector<8x96xf32> to vector<8x32xf32>
    %142 = arith.mulf %141, %138 : vector<8x32xf32>
    %143 = arith.addf %140, %142 : vector<8x32xf32>
    %144 = vector.extract_strided_slice %136 {offsets = [0, 64], sizes = [8, 32], strides = [1, 1]} : vector<8x96xf32> to vector<8x32xf32>
    %145 = math.tanh %143 : vector<8x32xf32>
    %146 = arith.mulf %144, %145 : vector<8x32xf32>
    %c16_39 = arith.constant 16 : index
    %c0_40 = arith.constant 0 : index
    %147 = vector.load %arg14[%c16_39, %c0_40] : memref<64x32xf32, #tpu.memory_space<vmem>>, vector<8x32xf32>
    tpu.vector_store %arg14[%c16_39, %c0_40], %130 {strides = array<i32>} : memref<64x32xf32, #tpu.memory_space<vmem>>, vector<8x32xf32>,
    %c40_41 = arith.constant 40 : index
    %c0_42 = arith.constant 0 : index
    %148 = vector.load %arg15[%c40_41, %c0_42] : memref<64x32xf32, #tpu.memory_space<vmem>>, vector<8x32xf32>
    tpu.vector_store %arg15[%c40_41, %c0_42], %146 {strides = array<i32>} : memref<64x32xf32, #tpu.memory_space<vmem>>, vector<8x32xf32>,
    %149 = tpu.concatenate %130, %146 in 1 : vector<8x32xf32>, vector<8x32xf32> -> vector<8x64xf32>
    %cst_43 = arith.constant dense<0.000000e+00> : vector<8x256xf32>
    %150 = tpu.matmul %149, %14, %cst_43 {dimension_numbers = #tpu.dot_dimension_numbers<[1], [0], [0], [1], [0, 0, 1, 1], [], []>} : vector<8x64xf32>, vector<64x256xf32>, vector<8x256xf32> -> vector<8x256xf32>
    %c24 = arith.constant 24 : index
    %c0_44 = arith.constant 0 : index
    %151 = vector.load %arg13[%c24, %c0_44] : memref<64x256xf32, #tpu.memory_space<vmem>>, vector<8x256xf32>
    %c32 = arith.constant 32 : index
    %c0_45 = arith.constant 0 : index
    %152 = vector.load %arg13[%c32, %c0_45] : memref<64x256xf32, #tpu.memory_space<vmem>>, vector<8x256xf32>
    %153 = vector.extract_strided_slice %150 {offsets = [0, 0], sizes = [8, 128], strides = [1, 1]} : vector<8x256xf32> to vector<8x128xf32>
    %154 = vector.extract_strided_slice %151 {offsets = [0, 0], sizes = [8, 128], strides = [1, 1]} : vector<8x256xf32> to vector<8x128xf32>
    %155 = arith.addf %153, %154 : vector<8x128xf32>
    %156 = vector.extract_strided_slice %150 {offsets = [0, 128], sizes = [8, 128], strides = [1, 1]} : vector<8x256xf32> to vector<8x128xf32>
    %157 = vector.extract_strided_slice %152 {offsets = [0, 128], sizes = [8, 128], strides = [1, 1]} : vector<8x256xf32> to vector<8x128xf32>
    %158 = arith.addf %156, %157 : vector<8x128xf32>
    %159 = vector.extract_strided_slice %155 {offsets = [0, 0], sizes = [8, 96], strides = [1, 1]} : vector<8x128xf32> to vector<8x96xf32>
    %160 = arith.negf %159 : vector<8x96xf32>
    %161 = math.exp %160 : vector<8x96xf32>
    %cst_46 = arith.constant 1.000000e+00 : f32
    %162 = vector.broadcast %cst_46 : f32 to vector<8x96xf32>
    %163 = arith.addf %162, %161 : vector<8x96xf32>
    %164 = arith.divf %162, %163 : vector<8x96xf32>
    %165 = vector.extract_strided_slice %155 {offsets = [0, 96], sizes = [8, 32], strides = [1, 1]} : vector<8x128xf32> to vector<8x32xf32>
    %166 = math.tanh %165 : vector<8x32xf32>
    %167 = vector.extract_strided_slice %164 {offsets = [0, 32], sizes = [8, 32], strides = [1, 1]} : vector<8x96xf32> to vector<8x32xf32>
    %168 = arith.mulf %167, %127 : vector<8x32xf32>
    %169 = vector.extract_strided_slice %164 {offsets = [0, 0], sizes = [8, 32], strides = [1, 1]} : vector<8x96xf32> to vector<8x32xf32>
    %170 = arith.mulf %169, %166 : vector<8x32xf32>
    %171 = arith.addf %168, %170 : vector<8x32xf32>
    %172 = vector.extract_strided_slice %164 {offsets = [0, 64], sizes = [8, 32], strides = [1, 1]} : vector<8x96xf32> to vector<8x32xf32>
    %173 = math.tanh %171 : vector<8x32xf32>
    %174 = arith.mulf %172, %173 : vector<8x32xf32>
    %175 = vector.extract_strided_slice %158 {offsets = [0, 0], sizes = [8, 96], strides = [1, 1]} : vector<8x128xf32> to vector<8x96xf32>
    %176 = arith.negf %175 : vector<8x96xf32>
    %177 = math.exp %176 : vector<8x96xf32>
    %cst_47 = arith.constant 1.000000e+00 : f32
    %178 = vector.broadcast %cst_47 : f32 to vector<8x96xf32>
    %179 = arith.addf %178, %177 : vector<8x96xf32>
    %180 = arith.divf %178, %179 : vector<8x96xf32>
    %181 = vector.extract_strided_slice %158 {offsets = [0, 96], sizes = [8, 32], strides = [1, 1]} : vector<8x128xf32> to vector<8x32xf32>
    %182 = math.tanh %181 : vector<8x32xf32>
    %183 = vector.extract_strided_slice %180 {offsets = [0, 32], sizes = [8, 32], strides = [1, 1]} : vector<8x96xf32> to vector<8x32xf32>
    %184 = arith.mulf %183, %143 : vector<8x32xf32>
    %185 = vector.extract_strided_slice %180 {offsets = [0, 0], sizes = [8, 32], strides = [1, 1]} : vector<8x96xf32> to vector<8x32xf32>
    %186 = arith.mulf %185, %182 : vector<8x32xf32>
    %187 = arith.addf %184, %186 : vector<8x32xf32>
    %188 = vector.extract_strided_slice %180 {offsets = [0, 64], sizes = [8, 32], strides = [1, 1]} : vector<8x96xf32> to vector<8x32xf32>
    %189 = math.tanh %187 : vector<8x32xf32>
    %190 = arith.mulf %188, %189 : vector<8x32xf32>
    %c24_48 = arith.constant 24 : index
    %c0_49 = arith.constant 0 : index
    %191 = vector.load %arg14[%c24_48, %c0_49] : memref<64x32xf32, #tpu.memory_space<vmem>>, vector<8x32xf32>
    tpu.vector_store %arg14[%c24_48, %c0_49], %174 {strides = array<i32>} : memref<64x32xf32, #tpu.memory_space<vmem>>, vector<8x32xf32>,
    %c32_50 = arith.constant 32 : index
    %c0_51 = arith.constant 0 : index
    %192 = vector.load %arg15[%c32_50, %c0_51] : memref<64x32xf32, #tpu.memory_space<vmem>>, vector<8x32xf32>
    tpu.vector_store %arg15[%c32_50, %c0_51], %190 {strides = array<i32>} : memref<64x32xf32, #tpu.memory_space<vmem>>, vector<8x32xf32>,
    %193 = tpu.concatenate %174, %190 in 1 : vector<8x32xf32>, vector<8x32xf32> -> vector<8x64xf32>
    %cst_52 = arith.constant dense<0.000000e+00> : vector<8x256xf32>
    %194 = tpu.matmul %193, %14, %cst_52 {dimension_numbers = #tpu.dot_dimension_numbers<[1], [0], [0], [1], [0, 0, 1, 1], [], []>} : vector<8x64xf32>, vector<64x256xf32>, vector<8x256xf32> -> vector<8x256xf32>
    %c32_53 = arith.constant 32 : index
    %c0_54 = arith.constant 0 : index
    %195 = vector.load %arg13[%c32_53, %c0_54] : memref<64x256xf32, #tpu.memory_space<vmem>>, vector<8x256xf32>
    %c24_55 = arith.constant 24 : index
    %c0_56 = arith.constant 0 : index
    %196 = vector.load %arg13[%c24_55, %c0_56] : memref<64x256xf32, #tpu.memory_space<vmem>>, vector<8x256xf32>
    %197 = vector.extract_strided_slice %194 {offsets = [0, 0], sizes = [8, 128], strides = [1, 1]} : vector<8x256xf32> to vector<8x128xf32>
    %198 = vector.extract_strided_slice %195 {offsets = [0, 0], sizes = [8, 128], strides = [1, 1]} : vector<8x256xf32> to vector<8x128xf32>
    %199 = arith.addf %197, %198 : vector<8x128xf32>
    %200 = vector.extract_strided_slice %194 {offsets = [0, 128], sizes = [8, 128], strides = [1, 1]} : vector<8x256xf32> to vector<8x128xf32>
    %201 = vector.extract_strided_slice %196 {offsets = [0, 128], sizes = [8, 128], strides = [1, 1]} : vector<8x256xf32> to vector<8x128xf32>
    %202 = arith.addf %200, %201 : vector<8x128xf32>
    %203 = vector.extract_strided_slice %199 {offsets = [0, 0], sizes = [8, 96], strides = [1, 1]} : vector<8x128xf32> to vector<8x96xf32>
    %204 = arith.negf %203 : vector<8x96xf32>
    %205 = math.exp %204 : vector<8x96xf32>
    %cst_57 = arith.constant 1.000000e+00 : f32
    %206 = vector.broadcast %cst_57 : f32 to vector<8x96xf32>
    %207 = arith.addf %206, %205 : vector<8x96xf32>
    %208 = arith.divf %206, %207 : vector<8x96xf32>
    %209 = vector.extract_strided_slice %199 {offsets = [0, 96], sizes = [8, 32], strides = [1, 1]} : vector<8x128xf32> to vector<8x32xf32>
    %210 = math.tanh %209 : vector<8x32xf32>
    %211 = vector.extract_strided_slice %208 {offsets = [0, 32], sizes = [8, 32], strides = [1, 1]} : vector<8x96xf32> to vector<8x32xf32>
    %212 = arith.mulf %211, %171 : vector<8x32xf32>
    %213 = vector.extract_strided_slice %208 {offsets = [0, 0], sizes = [8, 32], strides = [1, 1]} : vector<8x96xf32> to vector<8x32xf32>
    %214 = arith.mulf %213, %210 : vector<8x32xf32>
    %215 = arith.addf %212, %214 : vector<8x32xf32>
    %216 = vector.extract_strided_slice %208 {offsets = [0, 64], sizes = [8, 32], strides = [1, 1]} : vector<8x96xf32> to vector<8x32xf32>
    %217 = math.tanh %215 : vector<8x32xf32>
    %218 = arith.mulf %216, %217 : vector<8x32xf32>
    %219 = vector.extract_strided_slice %202 {offsets = [0, 0], sizes = [8, 96], strides = [1, 1]} : vector<8x128xf32> to vector<8x96xf32>
    %220 = arith.negf %219 : vector<8x96xf32>
    %221 = math.exp %220 : vector<8x96xf32>
    %cst_58 = arith.constant 1.000000e+00 : f32
    %222 = vector.broadcast %cst_58 : f32 to vector<8x96xf32>
    %223 = arith.addf %222, %221 : vector<8x96xf32>
    %224 = arith.divf %222, %223 : vector<8x96xf32>
    %225 = vector.extract_strided_slice %202 {offsets = [0, 96], sizes = [8, 32], strides = [1, 1]} : vector<8x128xf32> to vector<8x32xf32>
    %226 = math.tanh %225 : vector<8x32xf32>
    %227 = vector.extract_strided_slice %224 {offsets = [0, 32], sizes = [8, 32], strides = [1, 1]} : vector<8x96xf32> to vector<8x32xf32>
    %228 = arith.mulf %227, %187 : vector<8x32xf32>
    %229 = vector.extract_strided_slice %224 {offsets = [0, 0], sizes = [8, 32], strides = [1, 1]} : vector<8x96xf32> to vector<8x32xf32>
    %230 = arith.mulf %229, %226 : vector<8x32xf32>
    %231 = arith.addf %228, %230 : vector<8x32xf32>
    %232 = vector.extract_strided_slice %224 {offsets = [0, 64], sizes = [8, 32], strides = [1, 1]} : vector<8x96xf32> to vector<8x32xf32>
    %233 = math.tanh %231 : vector<8x32xf32>
    %234 = arith.mulf %232, %233 : vector<8x32xf32>
    %c32_59 = arith.constant 32 : index
    %c0_60 = arith.constant 0 : index
    %235 = vector.load %arg14[%c32_59, %c0_60] : memref<64x32xf32, #tpu.memory_space<vmem>>, vector<8x32xf32>
    tpu.vector_store %arg14[%c32_59, %c0_60], %218 {strides = array<i32>} : memref<64x32xf32, #tpu.memory_space<vmem>>, vector<8x32xf32>,
    %c24_61 = arith.constant 24 : index
    %c0_62 = arith.constant 0 : index
    %236 = vector.load %arg15[%c24_61, %c0_62] : memref<64x32xf32, #tpu.memory_space<vmem>>, vector<8x32xf32>
    tpu.vector_store %arg15[%c24_61, %c0_62], %234 {strides = array<i32>} : memref<64x32xf32, #tpu.memory_space<vmem>>, vector<8x32xf32>,
    %237 = tpu.concatenate %218, %234 in 1 : vector<8x32xf32>, vector<8x32xf32> -> vector<8x64xf32>
    %cst_63 = arith.constant dense<0.000000e+00> : vector<8x256xf32>
    %238 = tpu.matmul %237, %14, %cst_63 {dimension_numbers = #tpu.dot_dimension_numbers<[1], [0], [0], [1], [0, 0, 1, 1], [], []>} : vector<8x64xf32>, vector<64x256xf32>, vector<8x256xf32> -> vector<8x256xf32>
    %c40_64 = arith.constant 40 : index
    %c0_65 = arith.constant 0 : index
    %239 = vector.load %arg13[%c40_64, %c0_65] : memref<64x256xf32, #tpu.memory_space<vmem>>, vector<8x256xf32>
    %c16_66 = arith.constant 16 : index
    %c0_67 = arith.constant 0 : index
    %240 = vector.load %arg13[%c16_66, %c0_67] : memref<64x256xf32, #tpu.memory_space<vmem>>, vector<8x256xf32>
    %241 = vector.extract_strided_slice %238 {offsets = [0, 0], sizes = [8, 128], strides = [1, 1]} : vector<8x256xf32> to vector<8x128xf32>
    %242 = vector.extract_strided_slice %239 {offsets = [0, 0], sizes = [8, 128], strides = [1, 1]} : vector<8x256xf32> to vector<8x128xf32>
    %243 = arith.addf %241, %242 : vector<8x128xf32>
    %244 = vector.extract_strided_slice %238 {offsets = [0, 128], sizes = [8, 128], strides = [1, 1]} : vector<8x256xf32> to vector<8x128xf32>
    %245 = vector.extract_strided_slice %240 {offsets = [0, 128], sizes = [8, 128], strides = [1, 1]} : vector<8x256xf32> to vector<8x128xf32>
    %246 = arith.addf %244, %245 : vector<8x128xf32>
    %247 = vector.extract_strided_slice %243 {offsets = [0, 0], sizes = [8, 96], strides = [1, 1]} : vector<8x128xf32> to vector<8x96xf32>
    %248 = arith.negf %247 : vector<8x96xf32>
    %249 = math.exp %248 : vector<8x96xf32>
    %cst_68 = arith.constant 1.000000e+00 : f32
    %250 = vector.broadcast %cst_68 : f32 to vector<8x96xf32>
    %251 = arith.addf %250, %249 : vector<8x96xf32>
    %252 = arith.divf %250, %251 : vector<8x96xf32>
    %253 = vector.extract_strided_slice %243 {offsets = [0, 96], sizes = [8, 32], strides = [1, 1]} : vector<8x128xf32> to vector<8x32xf32>
    %254 = math.tanh %253 : vector<8x32xf32>
    %255 = vector.extract_strided_slice %252 {offsets = [0, 32], sizes = [8, 32], strides = [1, 1]} : vector<8x96xf32> to vector<8x32xf32>
    %256 = arith.mulf %255, %215 : vector<8x32xf32>
    %257 = vector.extract_strided_slice %252 {offsets = [0, 0], sizes = [8, 32], strides = [1, 1]} : vector<8x96xf32> to vector<8x32xf32>
    %258 = arith.mulf %257, %254 : vector<8x32xf32>
    %259 = arith.addf %256, %258 : vector<8x32xf32>
    %260 = vector.extract_strided_slice %252 {offsets = [0, 64], sizes = [8, 32], strides = [1, 1]} : vector<8x96xf32> to vector<8x32xf32>
    %261 = math.tanh %259 : vector<8x32xf32>
    %262 = arith.mulf %260, %261 : vector<8x32xf32>
    %263 = vector.extract_strided_slice %246 {offsets = [0, 0], sizes = [8, 96], strides = [1, 1]} : vector<8x128xf32> to vector<8x96xf32>
    %264 = arith.negf %263 : vector<8x96xf32>
    %265 = math.exp %264 : vector<8x96xf32>
    %cst_69 = arith.constant 1.000000e+00 : f32
    %266 = vector.broadcast %cst_69 : f32 to vector<8x96xf32>
    %267 = arith.addf %266, %265 : vector<8x96xf32>
    %268 = arith.divf %266, %267 : vector<8x96xf32>
    %269 = vector.extract_strided_slice %246 {offsets = [0, 96], sizes = [8, 32], strides = [1, 1]} : vector<8x128xf32> to vector<8x32xf32>
    %270 = math.tanh %269 : vector<8x32xf32>
    %271 = vector.extract_strided_slice %268 {offsets = [0, 32], sizes = [8, 32], strides = [1, 1]} : vector<8x96xf32> to vector<8x32xf32>
    %272 = arith.mulf %271, %231 : vector<8x32xf32>
    %273 = vector.extract_strided_slice %268 {offsets = [0, 0], sizes = [8, 32], strides = [1, 1]} : vector<8x96xf32> to vector<8x32xf32>
    %274 = arith.mulf %273, %270 : vector<8x32xf32>
    %275 = arith.addf %272, %274 : vector<8x32xf32>
    %276 = vector.extract_strided_slice %268 {offsets = [0, 64], sizes = [8, 32], strides = [1, 1]} : vector<8x96xf32> to vector<8x32xf32>
    %277 = math.tanh %275 : vector<8x32xf32>
    %278 = arith.mulf %276, %277 : vector<8x32xf32>
    %c40_70 = arith.constant 40 : index
    %c0_71 = arith.constant 0 : index
    %279 = vector.load %arg14[%c40_70, %c0_71] : memref<64x32xf32, #tpu.memory_space<vmem>>, vector<8x32xf32>
    tpu.vector_store %arg14[%c40_70, %c0_71], %262 {strides = array<i32>} : memref<64x32xf32, #tpu.memory_space<vmem>>, vector<8x32xf32>,
    %c16_72 = arith.constant 16 : index
    %c0_73 = arith.constant 0 : index
    %280 = vector.load %arg15[%c16_72, %c0_73] : memref<64x32xf32, #tpu.memory_space<vmem>>, vector<8x32xf32>
    tpu.vector_store %arg15[%c16_72, %c0_73], %278 {strides = array<i32>} : memref<64x32xf32, #tpu.memory_space<vmem>>, vector<8x32xf32>,
    %281 = tpu.concatenate %262, %278 in 1 : vector<8x32xf32>, vector<8x32xf32> -> vector<8x64xf32>
    %cst_74 = arith.constant dense<0.000000e+00> : vector<8x256xf32>
    %282 = tpu.matmul %281, %14, %cst_74 {dimension_numbers = #tpu.dot_dimension_numbers<[1], [0], [0], [1], [0, 0, 1, 1], [], []>} : vector<8x64xf32>, vector<64x256xf32>, vector<8x256xf32> -> vector<8x256xf32>
    %c48_75 = arith.constant 48 : index
    %c0_76 = arith.constant 0 : index
    %283 = vector.load %arg13[%c48_75, %c0_76] : memref<64x256xf32, #tpu.memory_space<vmem>>, vector<8x256xf32>
    %c8_77 = arith.constant 8 : index
    %c0_78 = arith.constant 0 : index
    %284 = vector.load %arg13[%c8_77, %c0_78] : memref<64x256xf32, #tpu.memory_space<vmem>>, vector<8x256xf32>
    %285 = vector.extract_strided_slice %282 {offsets = [0, 0], sizes = [8, 128], strides = [1, 1]} : vector<8x256xf32> to vector<8x128xf32>
    %286 = vector.extract_strided_slice %283 {offsets = [0, 0], sizes = [8, 128], strides = [1, 1]} : vector<8x256xf32> to vector<8x128xf32>
    %287 = arith.addf %285, %286 : vector<8x128xf32>
    %288 = vector.extract_strided_slice %282 {offsets = [0, 128], sizes = [8, 128], strides = [1, 1]} : vector<8x256xf32> to vector<8x128xf32>
    %289 = vector.extract_strided_slice %284 {offsets = [0, 128], sizes = [8, 128], strides = [1, 1]} : vector<8x256xf32> to vector<8x128xf32>
    %290 = arith.addf %288, %289 : vector<8x128xf32>
    %291 = vector.extract_strided_slice %287 {offsets = [0, 0], sizes = [8, 96], strides = [1, 1]} : vector<8x128xf32> to vector<8x96xf32>
    %292 = arith.negf %291 : vector<8x96xf32>
    %293 = math.exp %292 : vector<8x96xf32>
    %cst_79 = arith.constant 1.000000e+00 : f32
    %294 = vector.broadcast %cst_79 : f32 to vector<8x96xf32>
    %295 = arith.addf %294, %293 : vector<8x96xf32>
    %296 = arith.divf %294, %295 : vector<8x96xf32>
    %297 = vector.extract_strided_slice %287 {offsets = [0, 96], sizes = [8, 32], strides = [1, 1]} : vector<8x128xf32> to vector<8x32xf32>
    %298 = math.tanh %297 : vector<8x32xf32>
    %299 = vector.extract_strided_slice %296 {offsets = [0, 32], sizes = [8, 32], strides = [1, 1]} : vector<8x96xf32> to vector<8x32xf32>
    %300 = arith.mulf %299, %259 : vector<8x32xf32>
    %301 = vector.extract_strided_slice %296 {offsets = [0, 0], sizes = [8, 32], strides = [1, 1]} : vector<8x96xf32> to vector<8x32xf32>
    %302 = arith.mulf %301, %298 : vector<8x32xf32>
    %303 = arith.addf %300, %302 : vector<8x32xf32>
    %304 = vector.extract_strided_slice %296 {offsets = [0, 64], sizes = [8, 32], strides = [1, 1]} : vector<8x96xf32> to vector<8x32xf32>
    %305 = math.tanh %303 : vector<8x32xf32>
    %306 = arith.mulf %304, %305 : vector<8x32xf32>
    %307 = vector.extract_strided_slice %290 {offsets = [0, 0], sizes = [8, 96], strides = [1, 1]} : vector<8x128xf32> to vector<8x96xf32>
    %308 = arith.negf %307 : vector<8x96xf32>
    %309 = math.exp %308 : vector<8x96xf32>
    %cst_80 = arith.constant 1.000000e+00 : f32
    %310 = vector.broadcast %cst_80 : f32 to vector<8x96xf32>
    %311 = arith.addf %310, %309 : vector<8x96xf32>
    %312 = arith.divf %310, %311 : vector<8x96xf32>
    %313 = vector.extract_strided_slice %290 {offsets = [0, 96], sizes = [8, 32], strides = [1, 1]} : vector<8x128xf32> to vector<8x32xf32>
    %314 = math.tanh %313 : vector<8x32xf32>
    %315 = vector.extract_strided_slice %312 {offsets = [0, 32], sizes = [8, 32], strides = [1, 1]} : vector<8x96xf32> to vector<8x32xf32>
    %316 = arith.mulf %315, %275 : vector<8x32xf32>
    %317 = vector.extract_strided_slice %312 {offsets = [0, 0], sizes = [8, 32], strides = [1, 1]} : vector<8x96xf32> to vector<8x32xf32>
    %318 = arith.mulf %317, %314 : vector<8x32xf32>
    %319 = arith.addf %316, %318 : vector<8x32xf32>
    %320 = vector.extract_strided_slice %312 {offsets = [0, 64], sizes = [8, 32], strides = [1, 1]} : vector<8x96xf32> to vector<8x32xf32>
    %321 = math.tanh %319 : vector<8x32xf32>
    %322 = arith.mulf %320, %321 : vector<8x32xf32>
    %c48_81 = arith.constant 48 : index
    %c0_82 = arith.constant 0 : index
    %323 = vector.load %arg14[%c48_81, %c0_82] : memref<64x32xf32, #tpu.memory_space<vmem>>, vector<8x32xf32>
    tpu.vector_store %arg14[%c48_81, %c0_82], %306 {strides = array<i32>} : memref<64x32xf32, #tpu.memory_space<vmem>>, vector<8x32xf32>,
    %c8_83 = arith.constant 8 : index
    %c0_84 = arith.constant 0 : index
    %324 = vector.load %arg15[%c8_83, %c0_84] : memref<64x32xf32, #tpu.memory_space<vmem>>, vector<8x32xf32>
    tpu.vector_store %arg15[%c8_83, %c0_84], %322 {strides = array<i32>} : memref<64x32xf32, #tpu.memory_space<vmem>>, vector<8x32xf32>,
    %325 = tpu.concatenate %306, %322 in 1 : vector<8x32xf32>, vector<8x32xf32> -> vector<8x64xf32>
    %cst_85 = arith.constant dense<0.000000e+00> : vector<8x256xf32>
    %326 = tpu.matmul %325, %14, %cst_85 {dimension_numbers = #tpu.dot_dimension_numbers<[1], [0], [0], [1], [0, 0, 1, 1], [], []>} : vector<8x64xf32>, vector<64x256xf32>, vector<8x256xf32> -> vector<8x256xf32>
    %c56_86 = arith.constant 56 : index
    %c0_87 = arith.constant 0 : index
    %327 = vector.load %arg13[%c56_86, %c0_87] : memref<64x256xf32, #tpu.memory_space<vmem>>, vector<8x256xf32>
    %c0_88 = arith.constant 0 : index
    %c0_89 = arith.constant 0 : index
    %328 = vector.load %arg13[%c0_88, %c0_89] : memref<64x256xf32, #tpu.memory_space<vmem>>, vector<8x256xf32>
    %329 = vector.extract_strided_slice %326 {offsets = [0, 0], sizes = [8, 128], strides = [1, 1]} : vector<8x256xf32> to vector<8x128xf32>
    %330 = vector.extract_strided_slice %327 {offsets = [0, 0], sizes = [8, 128], strides = [1, 1]} : vector<8x256xf32> to vector<8x128xf32>
    %331 = arith.addf %329, %330 : vector<8x128xf32>
    %332 = vector.extract_strided_slice %326 {offsets = [0, 128], sizes = [8, 128], strides = [1, 1]} : vector<8x256xf32> to vector<8x128xf32>
    %333 = vector.extract_strided_slice %328 {offsets = [0, 128], sizes = [8, 128], strides = [1, 1]} : vector<8x256xf32> to vector<8x128xf32>
    %334 = arith.addf %332, %333 : vector<8x128xf32>
    %335 = vector.extract_strided_slice %331 {offsets = [0, 0], sizes = [8, 96], strides = [1, 1]} : vector<8x128xf32> to vector<8x96xf32>
    %336 = arith.negf %335 : vector<8x96xf32>
    %337 = math.exp %336 : vector<8x96xf32>
    %cst_90 = arith.constant 1.000000e+00 : f32
    %338 = vector.broadcast %cst_90 : f32 to vector<8x96xf32>
    %339 = arith.addf %338, %337 : vector<8x96xf32>
    %340 = arith.divf %338, %339 : vector<8x96xf32>
    %341 = vector.extract_strided_slice %331 {offsets = [0, 96], sizes = [8, 32], strides = [1, 1]} : vector<8x128xf32> to vector<8x32xf32>
    %342 = math.tanh %341 : vector<8x32xf32>
    %343 = vector.extract_strided_slice %340 {offsets = [0, 32], sizes = [8, 32], strides = [1, 1]} : vector<8x96xf32> to vector<8x32xf32>
    %344 = arith.mulf %343, %303 : vector<8x32xf32>
    %345 = vector.extract_strided_slice %340 {offsets = [0, 0], sizes = [8, 32], strides = [1, 1]} : vector<8x96xf32> to vector<8x32xf32>
    %346 = arith.mulf %345, %342 : vector<8x32xf32>
    %347 = arith.addf %344, %346 : vector<8x32xf32>
    %348 = vector.extract_strided_slice %340 {offsets = [0, 64], sizes = [8, 32], strides = [1, 1]} : vector<8x96xf32> to vector<8x32xf32>
    %349 = math.tanh %347 : vector<8x32xf32>
    %350 = arith.mulf %348, %349 : vector<8x32xf32>
    %351 = vector.extract_strided_slice %334 {offsets = [0, 0], sizes = [8, 96], strides = [1, 1]} : vector<8x128xf32> to vector<8x96xf32>
    %352 = arith.negf %351 : vector<8x96xf32>
    %353 = math.exp %352 : vector<8x96xf32>
    %cst_91 = arith.constant 1.000000e+00 : f32
    %354 = vector.broadcast %cst_91 : f32 to vector<8x96xf32>
    %355 = arith.addf %354, %353 : vector<8x96xf32>
    %356 = arith.divf %354, %355 : vector<8x96xf32>
    %357 = vector.extract_strided_slice %334 {offsets = [0, 96], sizes = [8, 32], strides = [1, 1]} : vector<8x128xf32> to vector<8x32xf32>
    %358 = math.tanh %357 : vector<8x32xf32>
    %359 = vector.extract_strided_slice %356 {offsets = [0, 32], sizes = [8, 32], strides = [1, 1]} : vector<8x96xf32> to vector<8x32xf32>
    %360 = arith.mulf %359, %319 : vector<8x32xf32>
    %361 = vector.extract_strided_slice %356 {offsets = [0, 0], sizes = [8, 32], strides = [1, 1]} : vector<8x96xf32> to vector<8x32xf32>
    %362 = arith.mulf %361, %358 : vector<8x32xf32>
    %363 = arith.addf %360, %362 : vector<8x32xf32>
    %364 = vector.extract_strided_slice %356 {offsets = [0, 64], sizes = [8, 32], strides = [1, 1]} : vector<8x96xf32> to vector<8x32xf32>
    %365 = math.tanh %363 : vector<8x32xf32>
    %366 = arith.mulf %364, %365 : vector<8x32xf32>
    %c56_92 = arith.constant 56 : index
    %c0_93 = arith.constant 0 : index
    %367 = vector.load %arg14[%c56_92, %c0_93] : memref<64x32xf32, #tpu.memory_space<vmem>>, vector<8x32xf32>
    tpu.vector_store %arg14[%c56_92, %c0_93], %350 {strides = array<i32>} : memref<64x32xf32, #tpu.memory_space<vmem>>, vector<8x32xf32>,
    %c0_94 = arith.constant 0 : index
    %c0_95 = arith.constant 0 : index
    %368 = vector.load %arg15[%c0_94, %c0_95] : memref<64x32xf32, #tpu.memory_space<vmem>>, vector<8x32xf32>
    tpu.vector_store %arg15[%c0_94, %c0_95], %366 {strides = array<i32>} : memref<64x32xf32, #tpu.memory_space<vmem>>, vector<8x32xf32>,
    %369 = tpu.concatenate %350, %366 in 1 : vector<8x32xf32>, vector<8x32xf32> -> vector<8x64xf32>
    %370 = vector.extract_strided_slice %369 {offsets = [0, 0], sizes = [8, 32], strides = [1, 1]} : vector<8x64xf32> to vector<8x32xf32>
    %371 = vector.extract_strided_slice %369 {offsets = [0, 32], sizes = [8, 32], strides = [1, 1]} : vector<8x64xf32> to vector<8x32xf32>
    %372 = arith.addf %370, %371 : vector<8x32xf32>
    %c0_96 = arith.constant 0 : index
    %c0_97 = arith.constant 0 : index
    %373 = vector.load %arg14[%c0_96, %c0_97] : memref<64x32xf32, #tpu.memory_space<vmem>>, vector<64x32xf32>
    %c0_98 = arith.constant 0 : index
    %c0_99 = arith.constant 0 : index
    %374 = vector.load %arg5[%c0_98, %c0_99] : memref<64x256xf32, #tpu.memory_space<vmem>>, vector<32x256xf32>
    %cst_100 = arith.constant dense<0.000000e+00> : vector<64x256xf32>
    %375 = tpu.matmul %373, %374, %cst_100 {dimension_numbers = #tpu.dot_dimension_numbers<[1], [0], [0], [1], [0, 0, 1, 1], [], []>} : vector<64x32xf32>, vector<32x256xf32>, vector<64x256xf32> -> vector<64x256xf32>
    %c0_101 = arith.constant 0 : index
    %c0_102 = arith.constant 0 : index
    %376 = vector.load %arg15[%c0_101, %c0_102] : memref<64x32xf32, #tpu.memory_space<vmem>>, vector<64x32xf32>
    %c32_103 = arith.constant 32 : index
    %c0_104 = arith.constant 0 : index
    %377 = vector.load %arg5[%c32_103, %c0_104] : memref<64x256xf32, #tpu.memory_space<vmem>>, vector<32x256xf32>
    %cst_105 = arith.constant dense<0.000000e+00> : vector<64x256xf32>
    %378 = tpu.matmul %376, %377, %cst_105 {dimension_numbers = #tpu.dot_dimension_numbers<[1], [0], [0], [1], [0, 0, 1, 1], [], []>} : vector<64x32xf32>, vector<32x256xf32>, vector<64x256xf32> -> vector<64x256xf32>
    %379 = arith.addf %375, %378 : vector<64x256xf32>
    %c0_106 = arith.constant 0 : index
    %c0_107 = arith.constant 0 : index
    %380 = vector.load %arg7[%c0_106, %c0_107] : memref<1x256xf32, #tpu.memory_space<vmem>>, vector<1x256xf32>
    %381 = vector.broadcast %380 : vector<1x256xf32> to vector<64x256xf32>
    %382 = arith.addf %379, %381 : vector<64x256xf32>
    %c0_108 = arith.constant 0 : index
    %c0_109 = arith.constant 0 : index
    %383 = vector.load %arg13[%c0_108, %c0_109] : memref<64x256xf32, #tpu.memory_space<vmem>>, vector<64x256xf32>
    tpu.vector_store %arg13[%c0_108, %c0_109], %382 {strides = array<i32>} : memref<64x256xf32, #tpu.memory_space<vmem>>, vector<64x256xf32>,
    %c0_110 = arith.constant 0 : index
    %c0_111 = arith.constant 0 : index
    %384 = vector.load %arg6[%c0_110, %c0_111] : memref<64x256xf32, #tpu.memory_space<vmem>>, vector<64x256xf32>
    %cst_112 = arith.constant 0.000000e+00 : f32
    %385 = vector.broadcast %cst_112 : f32 to vector<8x64xf32>
    %cst_113 = arith.constant 0.000000e+00 : f32
    %386 = vector.broadcast %cst_113 : f32 to vector<8x32xf32>
    %cst_114 = arith.constant 0.000000e+00 : f32
    %387 = vector.broadcast %cst_114 : f32 to vector<8x32xf32>
    %cst_115 = arith.constant dense<0.000000e+00> : vector<8x256xf32>
    %388 = tpu.matmul %385, %384, %cst_115 {dimension_numbers = #tpu.dot_dimension_numbers<[1], [0], [0], [1], [0, 0, 1, 1], [], []>} : vector<8x64xf32>, vector<64x256xf32>, vector<8x256xf32> -> vector<8x256xf32>
    %c0_116 = arith.constant 0 : index
    %c0_117 = arith.constant 0 : index
    %389 = vector.load %arg13[%c0_116, %c0_117] : memref<64x256xf32, #tpu.memory_space<vmem>>, vector<8x256xf32>
    %c56_118 = arith.constant 56 : index
    %c0_119 = arith.constant 0 : index
    %390 = vector.load %arg13[%c56_118, %c0_119] : memref<64x256xf32, #tpu.memory_space<vmem>>, vector<8x256xf32>
    %391 = vector.extract_strided_slice %388 {offsets = [0, 0], sizes = [8, 128], strides = [1, 1]} : vector<8x256xf32> to vector<8x128xf32>
    %392 = vector.extract_strided_slice %389 {offsets = [0, 0], sizes = [8, 128], strides = [1, 1]} : vector<8x256xf32> to vector<8x128xf32>
    %393 = arith.addf %391, %392 : vector<8x128xf32>
    %394 = vector.extract_strided_slice %388 {offsets = [0, 128], sizes = [8, 128], strides = [1, 1]} : vector<8x256xf32> to vector<8x128xf32>
    %395 = vector.extract_strided_slice %390 {offsets = [0, 128], sizes = [8, 128], strides = [1, 1]} : vector<8x256xf32> to vector<8x128xf32>
    %396 = arith.addf %394, %395 : vector<8x128xf32>
    %397 = vector.extract_strided_slice %393 {offsets = [0, 0], sizes = [8, 96], strides = [1, 1]} : vector<8x128xf32> to vector<8x96xf32>
    %398 = arith.negf %397 : vector<8x96xf32>
    %399 = math.exp %398 : vector<8x96xf32>
    %cst_120 = arith.constant 1.000000e+00 : f32
    %400 = vector.broadcast %cst_120 : f32 to vector<8x96xf32>
    %401 = arith.addf %400, %399 : vector<8x96xf32>
    %402 = arith.divf %400, %401 : vector<8x96xf32>
    %403 = vector.extract_strided_slice %393 {offsets = [0, 96], sizes = [8, 32], strides = [1, 1]} : vector<8x128xf32> to vector<8x32xf32>
    %404 = math.tanh %403 : vector<8x32xf32>
    %405 = vector.extract_strided_slice %402 {offsets = [0, 32], sizes = [8, 32], strides = [1, 1]} : vector<8x96xf32> to vector<8x32xf32>
    %406 = arith.mulf %405, %386 : vector<8x32xf32>
    %407 = vector.extract_strided_slice %402 {offsets = [0, 0], sizes = [8, 32], strides = [1, 1]} : vector<8x96xf32> to vector<8x32xf32>
    %408 = arith.mulf %407, %404 : vector<8x32xf32>
    %409 = arith.addf %406, %408 : vector<8x32xf32>
    %410 = vector.extract_strided_slice %402 {offsets = [0, 64], sizes = [8, 32], strides = [1, 1]} : vector<8x96xf32> to vector<8x32xf32>
    %411 = math.tanh %409 : vector<8x32xf32>
    %412 = arith.mulf %410, %411 : vector<8x32xf32>
    %413 = vector.extract_strided_slice %396 {offsets = [0, 0], sizes = [8, 96], strides = [1, 1]} : vector<8x128xf32> to vector<8x96xf32>
    %414 = arith.negf %413 : vector<8x96xf32>
    %415 = math.exp %414 : vector<8x96xf32>
    %cst_121 = arith.constant 1.000000e+00 : f32
    %416 = vector.broadcast %cst_121 : f32 to vector<8x96xf32>
    %417 = arith.addf %416, %415 : vector<8x96xf32>
    %418 = arith.divf %416, %417 : vector<8x96xf32>
    %419 = vector.extract_strided_slice %396 {offsets = [0, 96], sizes = [8, 32], strides = [1, 1]} : vector<8x128xf32> to vector<8x32xf32>
    %420 = math.tanh %419 : vector<8x32xf32>
    %421 = vector.extract_strided_slice %418 {offsets = [0, 32], sizes = [8, 32], strides = [1, 1]} : vector<8x96xf32> to vector<8x32xf32>
    %422 = arith.mulf %421, %387 : vector<8x32xf32>
    %423 = vector.extract_strided_slice %418 {offsets = [0, 0], sizes = [8, 32], strides = [1, 1]} : vector<8x96xf32> to vector<8x32xf32>
    %424 = arith.mulf %423, %420 : vector<8x32xf32>
    %425 = arith.addf %422, %424 : vector<8x32xf32>
    %426 = vector.extract_strided_slice %418 {offsets = [0, 64], sizes = [8, 32], strides = [1, 1]} : vector<8x96xf32> to vector<8x32xf32>
    %427 = math.tanh %425 : vector<8x32xf32>
    %428 = arith.mulf %426, %427 : vector<8x32xf32>
    %c0_122 = arith.constant 0 : index
    %c0_123 = arith.constant 0 : index
    %429 = vector.load %arg16[%c0_122, %c0_123] : memref<64x32xf32, #tpu.memory_space<vmem>>, vector<8x32xf32>
    tpu.vector_store %arg16[%c0_122, %c0_123], %412 {strides = array<i32>} : memref<64x32xf32, #tpu.memory_space<vmem>>, vector<8x32xf32>,
    %c56_124 = arith.constant 56 : index
    %c0_125 = arith.constant 0 : index
    %430 = vector.load %arg17[%c56_124, %c0_125] : memref<64x32xf32, #tpu.memory_space<vmem>>, vector<8x32xf32>
    tpu.vector_store %arg17[%c56_124, %c0_125], %428 {strides = array<i32>} : memref<64x32xf32, #tpu.memory_space<vmem>>, vector<8x32xf32>,
    %431 = tpu.concatenate %412, %428 in 1 : vector<8x32xf32>, vector<8x32xf32> -> vector<8x64xf32>
    %cst_126 = arith.constant dense<0.000000e+00> : vector<8x256xf32>
    %432 = tpu.matmul %431, %384, %cst_126 {dimension_numbers = #tpu.dot_dimension_numbers<[1], [0], [0], [1], [0, 0, 1, 1], [], []>} : vector<8x64xf32>, vector<64x256xf32>, vector<8x256xf32> -> vector<8x256xf32>
    %c8_127 = arith.constant 8 : index
    %c0_128 = arith.constant 0 : index
    %433 = vector.load %arg13[%c8_127, %c0_128] : memref<64x256xf32, #tpu.memory_space<vmem>>, vector<8x256xf32>
    %c48_129 = arith.constant 48 : index
    %c0_130 = arith.constant 0 : index
    %434 = vector.load %arg13[%c48_129, %c0_130] : memref<64x256xf32, #tpu.memory_space<vmem>>, vector<8x256xf32>
    %435 = vector.extract_strided_slice %432 {offsets = [0, 0], sizes = [8, 128], strides = [1, 1]} : vector<8x256xf32> to vector<8x128xf32>
    %436 = vector.extract_strided_slice %433 {offsets = [0, 0], sizes = [8, 128], strides = [1, 1]} : vector<8x256xf32> to vector<8x128xf32>
    %437 = arith.addf %435, %436 : vector<8x128xf32>
    %438 = vector.extract_strided_slice %432 {offsets = [0, 128], sizes = [8, 128], strides = [1, 1]} : vector<8x256xf32> to vector<8x128xf32>
    %439 = vector.extract_strided_slice %434 {offsets = [0, 128], sizes = [8, 128], strides = [1, 1]} : vector<8x256xf32> to vector<8x128xf32>
    %440 = arith.addf %438, %439 : vector<8x128xf32>
    %441 = vector.extract_strided_slice %437 {offsets = [0, 0], sizes = [8, 96], strides = [1, 1]} : vector<8x128xf32> to vector<8x96xf32>
    %442 = arith.negf %441 : vector<8x96xf32>
    %443 = math.exp %442 : vector<8x96xf32>
    %cst_131 = arith.constant 1.000000e+00 : f32
    %444 = vector.broadcast %cst_131 : f32 to vector<8x96xf32>
    %445 = arith.addf %444, %443 : vector<8x96xf32>
    %446 = arith.divf %444, %445 : vector<8x96xf32>
    %447 = vector.extract_strided_slice %437 {offsets = [0, 96], sizes = [8, 32], strides = [1, 1]} : vector<8x128xf32> to vector<8x32xf32>
    %448 = math.tanh %447 : vector<8x32xf32>
    %449 = vector.extract_strided_slice %446 {offsets = [0, 32], sizes = [8, 32], strides = [1, 1]} : vector<8x96xf32> to vector<8x32xf32>
    %450 = arith.mulf %449, %409 : vector<8x32xf32>
    %451 = vector.extract_strided_slice %446 {offsets = [0, 0], sizes = [8, 32], strides = [1, 1]} : vector<8x96xf32> to vector<8x32xf32>
    %452 = arith.mulf %451, %448 : vector<8x32xf32>
    %453 = arith.addf %450, %452 : vector<8x32xf32>
    %454 = vector.extract_strided_slice %446 {offsets = [0, 64], sizes = [8, 32], strides = [1, 1]} : vector<8x96xf32> to vector<8x32xf32>
    %455 = math.tanh %453 : vector<8x32xf32>
    %456 = arith.mulf %454, %455 : vector<8x32xf32>
    %457 = vector.extract_strided_slice %440 {offsets = [0, 0], sizes = [8, 96], strides = [1, 1]} : vector<8x128xf32> to vector<8x96xf32>
    %458 = arith.negf %457 : vector<8x96xf32>
    %459 = math.exp %458 : vector<8x96xf32>
    %cst_132 = arith.constant 1.000000e+00 : f32
    %460 = vector.broadcast %cst_132 : f32 to vector<8x96xf32>
    %461 = arith.addf %460, %459 : vector<8x96xf32>
    %462 = arith.divf %460, %461 : vector<8x96xf32>
    %463 = vector.extract_strided_slice %440 {offsets = [0, 96], sizes = [8, 32], strides = [1, 1]} : vector<8x128xf32> to vector<8x32xf32>
    %464 = math.tanh %463 : vector<8x32xf32>
    %465 = vector.extract_strided_slice %462 {offsets = [0, 32], sizes = [8, 32], strides = [1, 1]} : vector<8x96xf32> to vector<8x32xf32>
    %466 = arith.mulf %465, %425 : vector<8x32xf32>
    %467 = vector.extract_strided_slice %462 {offsets = [0, 0], sizes = [8, 32], strides = [1, 1]} : vector<8x96xf32> to vector<8x32xf32>
    %468 = arith.mulf %467, %464 : vector<8x32xf32>
    %469 = arith.addf %466, %468 : vector<8x32xf32>
    %470 = vector.extract_strided_slice %462 {offsets = [0, 64], sizes = [8, 32], strides = [1, 1]} : vector<8x96xf32> to vector<8x32xf32>
    %471 = math.tanh %469 : vector<8x32xf32>
    %472 = arith.mulf %470, %471 : vector<8x32xf32>
    %c8_133 = arith.constant 8 : index
    %c0_134 = arith.constant 0 : index
    %473 = vector.load %arg16[%c8_133, %c0_134] : memref<64x32xf32, #tpu.memory_space<vmem>>, vector<8x32xf32>
    tpu.vector_store %arg16[%c8_133, %c0_134], %456 {strides = array<i32>} : memref<64x32xf32, #tpu.memory_space<vmem>>, vector<8x32xf32>,
    %c48_135 = arith.constant 48 : index
    %c0_136 = arith.constant 0 : index
    %474 = vector.load %arg17[%c48_135, %c0_136] : memref<64x32xf32, #tpu.memory_space<vmem>>, vector<8x32xf32>
    tpu.vector_store %arg17[%c48_135, %c0_136], %472 {strides = array<i32>} : memref<64x32xf32, #tpu.memory_space<vmem>>, vector<8x32xf32>,
    %475 = tpu.concatenate %456, %472 in 1 : vector<8x32xf32>, vector<8x32xf32> -> vector<8x64xf32>
    %cst_137 = arith.constant dense<0.000000e+00> : vector<8x256xf32>
    %476 = tpu.matmul %475, %384, %cst_137 {dimension_numbers = #tpu.dot_dimension_numbers<[1], [0], [0], [1], [0, 0, 1, 1], [], []>} : vector<8x64xf32>, vector<64x256xf32>, vector<8x256xf32> -> vector<8x256xf32>
    %c16_138 = arith.constant 16 : index
    %c0_139 = arith.constant 0 : index
    %477 = vector.load %arg13[%c16_138, %c0_139] : memref<64x256xf32, #tpu.memory_space<vmem>>, vector<8x256xf32>
    %c40_140 = arith.constant 40 : index
    %c0_141 = arith.constant 0 : index
    %478 = vector.load %arg13[%c40_140, %c0_141] : memref<64x256xf32, #tpu.memory_space<vmem>>, vector<8x256xf32>
    %479 = vector.extract_strided_slice %476 {offsets = [0, 0], sizes = [8, 128], strides = [1, 1]} : vector<8x256xf32> to vector<8x128xf32>
    %480 = vector.extract_strided_slice %477 {offsets = [0, 0], sizes = [8, 128], strides = [1, 1]} : vector<8x256xf32> to vector<8x128xf32>
    %481 = arith.addf %479, %480 : vector<8x128xf32>
    %482 = vector.extract_strided_slice %476 {offsets = [0, 128], sizes = [8, 128], strides = [1, 1]} : vector<8x256xf32> to vector<8x128xf32>
    %483 = vector.extract_strided_slice %478 {offsets = [0, 128], sizes = [8, 128], strides = [1, 1]} : vector<8x256xf32> to vector<8x128xf32>
    %484 = arith.addf %482, %483 : vector<8x128xf32>
    %485 = vector.extract_strided_slice %481 {offsets = [0, 0], sizes = [8, 96], strides = [1, 1]} : vector<8x128xf32> to vector<8x96xf32>
    %486 = arith.negf %485 : vector<8x96xf32>
    %487 = math.exp %486 : vector<8x96xf32>
    %cst_142 = arith.constant 1.000000e+00 : f32
    %488 = vector.broadcast %cst_142 : f32 to vector<8x96xf32>
    %489 = arith.addf %488, %487 : vector<8x96xf32>
    %490 = arith.divf %488, %489 : vector<8x96xf32>
    %491 = vector.extract_strided_slice %481 {offsets = [0, 96], sizes = [8, 32], strides = [1, 1]} : vector<8x128xf32> to vector<8x32xf32>
    %492 = math.tanh %491 : vector<8x32xf32>
    %493 = vector.extract_strided_slice %490 {offsets = [0, 32], sizes = [8, 32], strides = [1, 1]} : vector<8x96xf32> to vector<8x32xf32>
    %494 = arith.mulf %493, %453 : vector<8x32xf32>
    %495 = vector.extract_strided_slice %490 {offsets = [0, 0], sizes = [8, 32], strides = [1, 1]} : vector<8x96xf32> to vector<8x32xf32>
    %496 = arith.mulf %495, %492 : vector<8x32xf32>
    %497 = arith.addf %494, %496 : vector<8x32xf32>
    %498 = vector.extract_strided_slice %490 {offsets = [0, 64], sizes = [8, 32], strides = [1, 1]} : vector<8x96xf32> to vector<8x32xf32>
    %499 = math.tanh %497 : vector<8x32xf32>
    %500 = arith.mulf %498, %499 : vector<8x32xf32>
    %501 = vector.extract_strided_slice %484 {offsets = [0, 0], sizes = [8, 96], strides = [1, 1]} : vector<8x128xf32> to vector<8x96xf32>
    %502 = arith.negf %501 : vector<8x96xf32>
    %503 = math.exp %502 : vector<8x96xf32>
    %cst_143 = arith.constant 1.000000e+00 : f32
    %504 = vector.broadcast %cst_143 : f32 to vector<8x96xf32>
    %505 = arith.addf %504, %503 : vector<8x96xf32>
    %506 = arith.divf %504, %505 : vector<8x96xf32>
    %507 = vector.extract_strided_slice %484 {offsets = [0, 96], sizes = [8, 32], strides = [1, 1]} : vector<8x128xf32> to vector<8x32xf32>
    %508 = math.tanh %507 : vector<8x32xf32>
    %509 = vector.extract_strided_slice %506 {offsets = [0, 32], sizes = [8, 32], strides = [1, 1]} : vector<8x96xf32> to vector<8x32xf32>
    %510 = arith.mulf %509, %469 : vector<8x32xf32>
    %511 = vector.extract_strided_slice %506 {offsets = [0, 0], sizes = [8, 32], strides = [1, 1]} : vector<8x96xf32> to vector<8x32xf32>
    %512 = arith.mulf %511, %508 : vector<8x32xf32>
    %513 = arith.addf %510, %512 : vector<8x32xf32>
    %514 = vector.extract_strided_slice %506 {offsets = [0, 64], sizes = [8, 32], strides = [1, 1]} : vector<8x96xf32> to vector<8x32xf32>
    %515 = math.tanh %513 : vector<8x32xf32>
    %516 = arith.mulf %514, %515 : vector<8x32xf32>
    %c16_144 = arith.constant 16 : index
    %c0_145 = arith.constant 0 : index
    %517 = vector.load %arg16[%c16_144, %c0_145] : memref<64x32xf32, #tpu.memory_space<vmem>>, vector<8x32xf32>
    tpu.vector_store %arg16[%c16_144, %c0_145], %500 {strides = array<i32>} : memref<64x32xf32, #tpu.memory_space<vmem>>, vector<8x32xf32>,
    %c40_146 = arith.constant 40 : index
    %c0_147 = arith.constant 0 : index
    %518 = vector.load %arg17[%c40_146, %c0_147] : memref<64x32xf32, #tpu.memory_space<vmem>>, vector<8x32xf32>
    tpu.vector_store %arg17[%c40_146, %c0_147], %516 {strides = array<i32>} : memref<64x32xf32, #tpu.memory_space<vmem>>, vector<8x32xf32>,
    %519 = tpu.concatenate %500, %516 in 1 : vector<8x32xf32>, vector<8x32xf32> -> vector<8x64xf32>
    %cst_148 = arith.constant dense<0.000000e+00> : vector<8x256xf32>
    %520 = tpu.matmul %519, %384, %cst_148 {dimension_numbers = #tpu.dot_dimension_numbers<[1], [0], [0], [1], [0, 0, 1, 1], [], []>} : vector<8x64xf32>, vector<64x256xf32>, vector<8x256xf32> -> vector<8x256xf32>
    %c24_149 = arith.constant 24 : index
    %c0_150 = arith.constant 0 : index
    %521 = vector.load %arg13[%c24_149, %c0_150] : memref<64x256xf32, #tpu.memory_space<vmem>>, vector<8x256xf32>
    %c32_151 = arith.constant 32 : index
    %c0_152 = arith.constant 0 : index
    %522 = vector.load %arg13[%c32_151, %c0_152] : memref<64x256xf32, #tpu.memory_space<vmem>>, vector<8x256xf32>
    %523 = vector.extract_strided_slice %520 {offsets = [0, 0], sizes = [8, 128], strides = [1, 1]} : vector<8x256xf32> to vector<8x128xf32>
    %524 = vector.extract_strided_slice %521 {offsets = [0, 0], sizes = [8, 128], strides = [1, 1]} : vector<8x256xf32> to vector<8x128xf32>
    %525 = arith.addf %523, %524 : vector<8x128xf32>
    %526 = vector.extract_strided_slice %520 {offsets = [0, 128], sizes = [8, 128], strides = [1, 1]} : vector<8x256xf32> to vector<8x128xf32>
    %527 = vector.extract_strided_slice %522 {offsets = [0, 128], sizes = [8, 128], strides = [1, 1]} : vector<8x256xf32> to vector<8x128xf32>
    %528 = arith.addf %526, %527 : vector<8x128xf32>
    %529 = vector.extract_strided_slice %525 {offsets = [0, 0], sizes = [8, 96], strides = [1, 1]} : vector<8x128xf32> to vector<8x96xf32>
    %530 = arith.negf %529 : vector<8x96xf32>
    %531 = math.exp %530 : vector<8x96xf32>
    %cst_153 = arith.constant 1.000000e+00 : f32
    %532 = vector.broadcast %cst_153 : f32 to vector<8x96xf32>
    %533 = arith.addf %532, %531 : vector<8x96xf32>
    %534 = arith.divf %532, %533 : vector<8x96xf32>
    %535 = vector.extract_strided_slice %525 {offsets = [0, 96], sizes = [8, 32], strides = [1, 1]} : vector<8x128xf32> to vector<8x32xf32>
    %536 = math.tanh %535 : vector<8x32xf32>
    %537 = vector.extract_strided_slice %534 {offsets = [0, 32], sizes = [8, 32], strides = [1, 1]} : vector<8x96xf32> to vector<8x32xf32>
    %538 = arith.mulf %537, %497 : vector<8x32xf32>
    %539 = vector.extract_strided_slice %534 {offsets = [0, 0], sizes = [8, 32], strides = [1, 1]} : vector<8x96xf32> to vector<8x32xf32>
    %540 = arith.mulf %539, %536 : vector<8x32xf32>
    %541 = arith.addf %538, %540 : vector<8x32xf32>
    %542 = vector.extract_strided_slice %534 {offsets = [0, 64], sizes = [8, 32], strides = [1, 1]} : vector<8x96xf32> to vector<8x32xf32>
    %543 = math.tanh %541 : vector<8x32xf32>
    %544 = arith.mulf %542, %543 : vector<8x32xf32>
    %545 = vector.extract_strided_slice %528 {offsets = [0, 0], sizes = [8, 96], strides = [1, 1]} : vector<8x128xf32> to vector<8x96xf32>
    %546 = arith.negf %545 : vector<8x96xf32>
    %547 = math.exp %546 : vector<8x96xf32>
    %cst_154 = arith.constant 1.000000e+00 : f32
    %548 = vector.broadcast %cst_154 : f32 to vector<8x96xf32>
    %549 = arith.addf %548, %547 : vector<8x96xf32>
    %550 = arith.divf %548, %549 : vector<8x96xf32>
    %551 = vector.extract_strided_slice %528 {offsets = [0, 96], sizes = [8, 32], strides = [1, 1]} : vector<8x128xf32> to vector<8x32xf32>
    %552 = math.tanh %551 : vector<8x32xf32>
    %553 = vector.extract_strided_slice %550 {offsets = [0, 32], sizes = [8, 32], strides = [1, 1]} : vector<8x96xf32> to vector<8x32xf32>
    %554 = arith.mulf %553, %513 : vector<8x32xf32>
    %555 = vector.extract_strided_slice %550 {offsets = [0, 0], sizes = [8, 32], strides = [1, 1]} : vector<8x96xf32> to vector<8x32xf32>
    %556 = arith.mulf %555, %552 : vector<8x32xf32>
    %557 = arith.addf %554, %556 : vector<8x32xf32>
    %558 = vector.extract_strided_slice %550 {offsets = [0, 64], sizes = [8, 32], strides = [1, 1]} : vector<8x96xf32> to vector<8x32xf32>
    %559 = math.tanh %557 : vector<8x32xf32>
    %560 = arith.mulf %558, %559 : vector<8x32xf32>
    %c24_155 = arith.constant 24 : index
    %c0_156 = arith.constant 0 : index
    %561 = vector.load %arg16[%c24_155, %c0_156] : memref<64x32xf32, #tpu.memory_space<vmem>>, vector<8x32xf32>
    tpu.vector_store %arg16[%c24_155, %c0_156], %544 {strides = array<i32>} : memref<64x32xf32, #tpu.memory_space<vmem>>, vector<8x32xf32>,
    %c32_157 = arith.constant 32 : index
    %c0_158 = arith.constant 0 : index
    %562 = vector.load %arg17[%c32_157, %c0_158] : memref<64x32xf32, #tpu.memory_space<vmem>>, vector<8x32xf32>
    tpu.vector_store %arg17[%c32_157, %c0_158], %560 {strides = array<i32>} : memref<64x32xf32, #tpu.memory_space<vmem>>, vector<8x32xf32>,
    %563 = tpu.concatenate %544, %560 in 1 : vector<8x32xf32>, vector<8x32xf32> -> vector<8x64xf32>
    %cst_159 = arith.constant dense<0.000000e+00> : vector<8x256xf32>
    %564 = tpu.matmul %563, %384, %cst_159 {dimension_numbers = #tpu.dot_dimension_numbers<[1], [0], [0], [1], [0, 0, 1, 1], [], []>} : vector<8x64xf32>, vector<64x256xf32>, vector<8x256xf32> -> vector<8x256xf32>
    %c32_160 = arith.constant 32 : index
    %c0_161 = arith.constant 0 : index
    %565 = vector.load %arg13[%c32_160, %c0_161] : memref<64x256xf32, #tpu.memory_space<vmem>>, vector<8x256xf32>
    %c24_162 = arith.constant 24 : index
    %c0_163 = arith.constant 0 : index
    %566 = vector.load %arg13[%c24_162, %c0_163] : memref<64x256xf32, #tpu.memory_space<vmem>>, vector<8x256xf32>
    %567 = vector.extract_strided_slice %564 {offsets = [0, 0], sizes = [8, 128], strides = [1, 1]} : vector<8x256xf32> to vector<8x128xf32>
    %568 = vector.extract_strided_slice %565 {offsets = [0, 0], sizes = [8, 128], strides = [1, 1]} : vector<8x256xf32> to vector<8x128xf32>
    %569 = arith.addf %567, %568 : vector<8x128xf32>
    %570 = vector.extract_strided_slice %564 {offsets = [0, 128], sizes = [8, 128], strides = [1, 1]} : vector<8x256xf32> to vector<8x128xf32>
    %571 = vector.extract_strided_slice %566 {offsets = [0, 128], sizes = [8, 128], strides = [1, 1]} : vector<8x256xf32> to vector<8x128xf32>
    %572 = arith.addf %570, %571 : vector<8x128xf32>
    %573 = vector.extract_strided_slice %569 {offsets = [0, 0], sizes = [8, 96], strides = [1, 1]} : vector<8x128xf32> to vector<8x96xf32>
    %574 = arith.negf %573 : vector<8x96xf32>
    %575 = math.exp %574 : vector<8x96xf32>
    %cst_164 = arith.constant 1.000000e+00 : f32
    %576 = vector.broadcast %cst_164 : f32 to vector<8x96xf32>
    %577 = arith.addf %576, %575 : vector<8x96xf32>
    %578 = arith.divf %576, %577 : vector<8x96xf32>
    %579 = vector.extract_strided_slice %569 {offsets = [0, 96], sizes = [8, 32], strides = [1, 1]} : vector<8x128xf32> to vector<8x32xf32>
    %580 = math.tanh %579 : vector<8x32xf32>
    %581 = vector.extract_strided_slice %578 {offsets = [0, 32], sizes = [8, 32], strides = [1, 1]} : vector<8x96xf32> to vector<8x32xf32>
    %582 = arith.mulf %581, %541 : vector<8x32xf32>
    %583 = vector.extract_strided_slice %578 {offsets = [0, 0], sizes = [8, 32], strides = [1, 1]} : vector<8x96xf32> to vector<8x32xf32>
    %584 = arith.mulf %583, %580 : vector<8x32xf32>
    %585 = arith.addf %582, %584 : vector<8x32xf32>
    %586 = vector.extract_strided_slice %578 {offsets = [0, 64], sizes = [8, 32], strides = [1, 1]} : vector<8x96xf32> to vector<8x32xf32>
    %587 = math.tanh %585 : vector<8x32xf32>
    %588 = arith.mulf %586, %587 : vector<8x32xf32>
    %589 = vector.extract_strided_slice %572 {offsets = [0, 0], sizes = [8, 96], strides = [1, 1]} : vector<8x128xf32> to vector<8x96xf32>
    %590 = arith.negf %589 : vector<8x96xf32>
    %591 = math.exp %590 : vector<8x96xf32>
    %cst_165 = arith.constant 1.000000e+00 : f32
    %592 = vector.broadcast %cst_165 : f32 to vector<8x96xf32>
    %593 = arith.addf %592, %591 : vector<8x96xf32>
    %594 = arith.divf %592, %593 : vector<8x96xf32>
    %595 = vector.extract_strided_slice %572 {offsets = [0, 96], sizes = [8, 32], strides = [1, 1]} : vector<8x128xf32> to vector<8x32xf32>
    %596 = math.tanh %595 : vector<8x32xf32>
    %597 = vector.extract_strided_slice %594 {offsets = [0, 32], sizes = [8, 32], strides = [1, 1]} : vector<8x96xf32> to vector<8x32xf32>
    %598 = arith.mulf %597, %557 : vector<8x32xf32>
    %599 = vector.extract_strided_slice %594 {offsets = [0, 0], sizes = [8, 32], strides = [1, 1]} : vector<8x96xf32> to vector<8x32xf32>
    %600 = arith.mulf %599, %596 : vector<8x32xf32>
    %601 = arith.addf %598, %600 : vector<8x32xf32>
    %602 = vector.extract_strided_slice %594 {offsets = [0, 64], sizes = [8, 32], strides = [1, 1]} : vector<8x96xf32> to vector<8x32xf32>
    %603 = math.tanh %601 : vector<8x32xf32>
    %604 = arith.mulf %602, %603 : vector<8x32xf32>
    %c32_166 = arith.constant 32 : index
    %c0_167 = arith.constant 0 : index
    %605 = vector.load %arg16[%c32_166, %c0_167] : memref<64x32xf32, #tpu.memory_space<vmem>>, vector<8x32xf32>
    tpu.vector_store %arg16[%c32_166, %c0_167], %588 {strides = array<i32>} : memref<64x32xf32, #tpu.memory_space<vmem>>, vector<8x32xf32>,
    %c24_168 = arith.constant 24 : index
    %c0_169 = arith.constant 0 : index
    %606 = vector.load %arg17[%c24_168, %c0_169] : memref<64x32xf32, #tpu.memory_space<vmem>>, vector<8x32xf32>
    tpu.vector_store %arg17[%c24_168, %c0_169], %604 {strides = array<i32>} : memref<64x32xf32, #tpu.memory_space<vmem>>, vector<8x32xf32>,
    %607 = tpu.concatenate %588, %604 in 1 : vector<8x32xf32>, vector<8x32xf32> -> vector<8x64xf32>
    %cst_170 = arith.constant dense<0.000000e+00> : vector<8x256xf32>
    %608 = tpu.matmul %607, %384, %cst_170 {dimension_numbers = #tpu.dot_dimension_numbers<[1], [0], [0], [1], [0, 0, 1, 1], [], []>} : vector<8x64xf32>, vector<64x256xf32>, vector<8x256xf32> -> vector<8x256xf32>
    %c40_171 = arith.constant 40 : index
    %c0_172 = arith.constant 0 : index
    %609 = vector.load %arg13[%c40_171, %c0_172] : memref<64x256xf32, #tpu.memory_space<vmem>>, vector<8x256xf32>
    %c16_173 = arith.constant 16 : index
    %c0_174 = arith.constant 0 : index
    %610 = vector.load %arg13[%c16_173, %c0_174] : memref<64x256xf32, #tpu.memory_space<vmem>>, vector<8x256xf32>
    %611 = vector.extract_strided_slice %608 {offsets = [0, 0], sizes = [8, 128], strides = [1, 1]} : vector<8x256xf32> to vector<8x128xf32>
    %612 = vector.extract_strided_slice %609 {offsets = [0, 0], sizes = [8, 128], strides = [1, 1]} : vector<8x256xf32> to vector<8x128xf32>
    %613 = arith.addf %611, %612 : vector<8x128xf32>
    %614 = vector.extract_strided_slice %608 {offsets = [0, 128], sizes = [8, 128], strides = [1, 1]} : vector<8x256xf32> to vector<8x128xf32>
    %615 = vector.extract_strided_slice %610 {offsets = [0, 128], sizes = [8, 128], strides = [1, 1]} : vector<8x256xf32> to vector<8x128xf32>
    %616 = arith.addf %614, %615 : vector<8x128xf32>
    %617 = vector.extract_strided_slice %613 {offsets = [0, 0], sizes = [8, 96], strides = [1, 1]} : vector<8x128xf32> to vector<8x96xf32>
    %618 = arith.negf %617 : vector<8x96xf32>
    %619 = math.exp %618 : vector<8x96xf32>
    %cst_175 = arith.constant 1.000000e+00 : f32
    %620 = vector.broadcast %cst_175 : f32 to vector<8x96xf32>
    %621 = arith.addf %620, %619 : vector<8x96xf32>
    %622 = arith.divf %620, %621 : vector<8x96xf32>
    %623 = vector.extract_strided_slice %613 {offsets = [0, 96], sizes = [8, 32], strides = [1, 1]} : vector<8x128xf32> to vector<8x32xf32>
    %624 = math.tanh %623 : vector<8x32xf32>
    %625 = vector.extract_strided_slice %622 {offsets = [0, 32], sizes = [8, 32], strides = [1, 1]} : vector<8x96xf32> to vector<8x32xf32>
    %626 = arith.mulf %625, %585 : vector<8x32xf32>
    %627 = vector.extract_strided_slice %622 {offsets = [0, 0], sizes = [8, 32], strides = [1, 1]} : vector<8x96xf32> to vector<8x32xf32>
    %628 = arith.mulf %627, %624 : vector<8x32xf32>
    %629 = arith.addf %626, %628 : vector<8x32xf32>
    %630 = vector.extract_strided_slice %622 {offsets = [0, 64], sizes = [8, 32], strides = [1, 1]} : vector<8x96xf32> to vector<8x32xf32>
    %631 = math.tanh %629 : vector<8x32xf32>
    %632 = arith.mulf %630, %631 : vector<8x32xf32>
    %633 = vector.extract_strided_slice %616 {offsets = [0, 0], sizes = [8, 96], strides = [1, 1]} : vector<8x128xf32> to vector<8x96xf32>
    %634 = arith.negf %633 : vector<8x96xf32>
    %635 = math.exp %634 : vector<8x96xf32>
    %cst_176 = arith.constant 1.000000e+00 : f32
    %636 = vector.broadcast %cst_176 : f32 to vector<8x96xf32>
    %637 = arith.addf %636, %635 : vector<8x96xf32>
    %638 = arith.divf %636, %637 : vector<8x96xf32>
    %639 = vector.extract_strided_slice %616 {offsets = [0, 96], sizes = [8, 32], strides = [1, 1]} : vector<8x128xf32> to vector<8x32xf32>
    %640 = math.tanh %639 : vector<8x32xf32>
    %641 = vector.extract_strided_slice %638 {offsets = [0, 32], sizes = [8, 32], strides = [1, 1]} : vector<8x96xf32> to vector<8x32xf32>
    %642 = arith.mulf %641, %601 : vector<8x32xf32>
    %643 = vector.extract_strided_slice %638 {offsets = [0, 0], sizes = [8, 32], strides = [1, 1]} : vector<8x96xf32> to vector<8x32xf32>
    %644 = arith.mulf %643, %640 : vector<8x32xf32>
    %645 = arith.addf %642, %644 : vector<8x32xf32>
    %646 = vector.extract_strided_slice %638 {offsets = [0, 64], sizes = [8, 32], strides = [1, 1]} : vector<8x96xf32> to vector<8x32xf32>
    %647 = math.tanh %645 : vector<8x32xf32>
    %648 = arith.mulf %646, %647 : vector<8x32xf32>
    %c40_177 = arith.constant 40 : index
    %c0_178 = arith.constant 0 : index
    %649 = vector.load %arg16[%c40_177, %c0_178] : memref<64x32xf32, #tpu.memory_space<vmem>>, vector<8x32xf32>
    tpu.vector_store %arg16[%c40_177, %c0_178], %632 {strides = array<i32>} : memref<64x32xf32, #tpu.memory_space<vmem>>, vector<8x32xf32>,
    %c16_179 = arith.constant 16 : index
    %c0_180 = arith.constant 0 : index
    %650 = vector.load %arg17[%c16_179, %c0_180] : memref<64x32xf32, #tpu.memory_space<vmem>>, vector<8x32xf32>
    tpu.vector_store %arg17[%c16_179, %c0_180], %648 {strides = array<i32>} : memref<64x32xf32, #tpu.memory_space<vmem>>, vector<8x32xf32>,
    %651 = tpu.concatenate %632, %648 in 1 : vector<8x32xf32>, vector<8x32xf32> -> vector<8x64xf32>
    %cst_181 = arith.constant dense<0.000000e+00> : vector<8x256xf32>
    %652 = tpu.matmul %651, %384, %cst_181 {dimension_numbers = #tpu.dot_dimension_numbers<[1], [0], [0], [1], [0, 0, 1, 1], [], []>} : vector<8x64xf32>, vector<64x256xf32>, vector<8x256xf32> -> vector<8x256xf32>
    %c48_182 = arith.constant 48 : index
    %c0_183 = arith.constant 0 : index
    %653 = vector.load %arg13[%c48_182, %c0_183] : memref<64x256xf32, #tpu.memory_space<vmem>>, vector<8x256xf32>
    %c8_184 = arith.constant 8 : index
    %c0_185 = arith.constant 0 : index
    %654 = vector.load %arg13[%c8_184, %c0_185] : memref<64x256xf32, #tpu.memory_space<vmem>>, vector<8x256xf32>
    %655 = vector.extract_strided_slice %652 {offsets = [0, 0], sizes = [8, 128], strides = [1, 1]} : vector<8x256xf32> to vector<8x128xf32>
    %656 = vector.extract_strided_slice %653 {offsets = [0, 0], sizes = [8, 128], strides = [1, 1]} : vector<8x256xf32> to vector<8x128xf32>
    %657 = arith.addf %655, %656 : vector<8x128xf32>
    %658 = vector.extract_strided_slice %652 {offsets = [0, 128], sizes = [8, 128], strides = [1, 1]} : vector<8x256xf32> to vector<8x128xf32>
    %659 = vector.extract_strided_slice %654 {offsets = [0, 128], sizes = [8, 128], strides = [1, 1]} : vector<8x256xf32> to vector<8x128xf32>
    %660 = arith.addf %658, %659 : vector<8x128xf32>
    %661 = vector.extract_strided_slice %657 {offsets = [0, 0], sizes = [8, 96], strides = [1, 1]} : vector<8x128xf32> to vector<8x96xf32>
    %662 = arith.negf %661 : vector<8x96xf32>
    %663 = math.exp %662 : vector<8x96xf32>
    %cst_186 = arith.constant 1.000000e+00 : f32
    %664 = vector.broadcast %cst_186 : f32 to vector<8x96xf32>
    %665 = arith.addf %664, %663 : vector<8x96xf32>
    %666 = arith.divf %664, %665 : vector<8x96xf32>
    %667 = vector.extract_strided_slice %657 {offsets = [0, 96], sizes = [8, 32], strides = [1, 1]} : vector<8x128xf32> to vector<8x32xf32>
    %668 = math.tanh %667 : vector<8x32xf32>
    %669 = vector.extract_strided_slice %666 {offsets = [0, 32], sizes = [8, 32], strides = [1, 1]} : vector<8x96xf32> to vector<8x32xf32>
    %670 = arith.mulf %669, %629 : vector<8x32xf32>
    %671 = vector.extract_strided_slice %666 {offsets = [0, 0], sizes = [8, 32], strides = [1, 1]} : vector<8x96xf32> to vector<8x32xf32>
    %672 = arith.mulf %671, %668 : vector<8x32xf32>
    %673 = arith.addf %670, %672 : vector<8x32xf32>
    %674 = vector.extract_strided_slice %666 {offsets = [0, 64], sizes = [8, 32], strides = [1, 1]} : vector<8x96xf32> to vector<8x32xf32>
    %675 = math.tanh %673 : vector<8x32xf32>
    %676 = arith.mulf %674, %675 : vector<8x32xf32>
    %677 = vector.extract_strided_slice %660 {offsets = [0, 0], sizes = [8, 96], strides = [1, 1]} : vector<8x128xf32> to vector<8x96xf32>
    %678 = arith.negf %677 : vector<8x96xf32>
    %679 = math.exp %678 : vector<8x96xf32>
    %cst_187 = arith.constant 1.000000e+00 : f32
    %680 = vector.broadcast %cst_187 : f32 to vector<8x96xf32>
    %681 = arith.addf %680, %679 : vector<8x96xf32>
    %682 = arith.divf %680, %681 : vector<8x96xf32>
    %683 = vector.extract_strided_slice %660 {offsets = [0, 96], sizes = [8, 32], strides = [1, 1]} : vector<8x128xf32> to vector<8x32xf32>
    %684 = math.tanh %683 : vector<8x32xf32>
    %685 = vector.extract_strided_slice %682 {offsets = [0, 32], sizes = [8, 32], strides = [1, 1]} : vector<8x96xf32> to vector<8x32xf32>
    %686 = arith.mulf %685, %645 : vector<8x32xf32>
    %687 = vector.extract_strided_slice %682 {offsets = [0, 0], sizes = [8, 32], strides = [1, 1]} : vector<8x96xf32> to vector<8x32xf32>
    %688 = arith.mulf %687, %684 : vector<8x32xf32>
    %689 = arith.addf %686, %688 : vector<8x32xf32>
    %690 = vector.extract_strided_slice %682 {offsets = [0, 64], sizes = [8, 32], strides = [1, 1]} : vector<8x96xf32> to vector<8x32xf32>
    %691 = math.tanh %689 : vector<8x32xf32>
    %692 = arith.mulf %690, %691 : vector<8x32xf32>
    %c48_188 = arith.constant 48 : index
    %c0_189 = arith.constant 0 : index
    %693 = vector.load %arg16[%c48_188, %c0_189] : memref<64x32xf32, #tpu.memory_space<vmem>>, vector<8x32xf32>
    tpu.vector_store %arg16[%c48_188, %c0_189], %676 {strides = array<i32>} : memref<64x32xf32, #tpu.memory_space<vmem>>, vector<8x32xf32>,
    %c8_190 = arith.constant 8 : index
    %c0_191 = arith.constant 0 : index
    %694 = vector.load %arg17[%c8_190, %c0_191] : memref<64x32xf32, #tpu.memory_space<vmem>>, vector<8x32xf32>
    tpu.vector_store %arg17[%c8_190, %c0_191], %692 {strides = array<i32>} : memref<64x32xf32, #tpu.memory_space<vmem>>, vector<8x32xf32>,
    %695 = tpu.concatenate %676, %692 in 1 : vector<8x32xf32>, vector<8x32xf32> -> vector<8x64xf32>
    %cst_192 = arith.constant dense<0.000000e+00> : vector<8x256xf32>
    %696 = tpu.matmul %695, %384, %cst_192 {dimension_numbers = #tpu.dot_dimension_numbers<[1], [0], [0], [1], [0, 0, 1, 1], [], []>} : vector<8x64xf32>, vector<64x256xf32>, vector<8x256xf32> -> vector<8x256xf32>
    %c56_193 = arith.constant 56 : index
    %c0_194 = arith.constant 0 : index
    %697 = vector.load %arg13[%c56_193, %c0_194] : memref<64x256xf32, #tpu.memory_space<vmem>>, vector<8x256xf32>
    %c0_195 = arith.constant 0 : index
    %c0_196 = arith.constant 0 : index
    %698 = vector.load %arg13[%c0_195, %c0_196] : memref<64x256xf32, #tpu.memory_space<vmem>>, vector<8x256xf32>
    %699 = vector.extract_strided_slice %696 {offsets = [0, 0], sizes = [8, 128], strides = [1, 1]} : vector<8x256xf32> to vector<8x128xf32>
    %700 = vector.extract_strided_slice %697 {offsets = [0, 0], sizes = [8, 128], strides = [1, 1]} : vector<8x256xf32> to vector<8x128xf32>
    %701 = arith.addf %699, %700 : vector<8x128xf32>
    %702 = vector.extract_strided_slice %696 {offsets = [0, 128], sizes = [8, 128], strides = [1, 1]} : vector<8x256xf32> to vector<8x128xf32>
    %703 = vector.extract_strided_slice %698 {offsets = [0, 128], sizes = [8, 128], strides = [1, 1]} : vector<8x256xf32> to vector<8x128xf32>
    %704 = arith.addf %702, %703 : vector<8x128xf32>
    %705 = vector.extract_strided_slice %701 {offsets = [0, 0], sizes = [8, 96], strides = [1, 1]} : vector<8x128xf32> to vector<8x96xf32>
    %706 = arith.negf %705 : vector<8x96xf32>
    %707 = math.exp %706 : vector<8x96xf32>
    %cst_197 = arith.constant 1.000000e+00 : f32
    %708 = vector.broadcast %cst_197 : f32 to vector<8x96xf32>
    %709 = arith.addf %708, %707 : vector<8x96xf32>
    %710 = arith.divf %708, %709 : vector<8x96xf32>
    %711 = vector.extract_strided_slice %701 {offsets = [0, 96], sizes = [8, 32], strides = [1, 1]} : vector<8x128xf32> to vector<8x32xf32>
    %712 = math.tanh %711 : vector<8x32xf32>
    %713 = vector.extract_strided_slice %710 {offsets = [0, 32], sizes = [8, 32], strides = [1, 1]} : vector<8x96xf32> to vector<8x32xf32>
    %714 = arith.mulf %713, %673 : vector<8x32xf32>
    %715 = vector.extract_strided_slice %710 {offsets = [0, 0], sizes = [8, 32], strides = [1, 1]} : vector<8x96xf32> to vector<8x32xf32>
    %716 = arith.mulf %715, %712 : vector<8x32xf32>
    %717 = arith.addf %714, %716 : vector<8x32xf32>
    %718 = vector.extract_strided_slice %710 {offsets = [0, 64], sizes = [8, 32], strides = [1, 1]} : vector<8x96xf32> to vector<8x32xf32>
    %719 = math.tanh %717 : vector<8x32xf32>
    %720 = arith.mulf %718, %719 : vector<8x32xf32>
    %721 = vector.extract_strided_slice %704 {offsets = [0, 0], sizes = [8, 96], strides = [1, 1]} : vector<8x128xf32> to vector<8x96xf32>
    %722 = arith.negf %721 : vector<8x96xf32>
    %723 = math.exp %722 : vector<8x96xf32>
    %cst_198 = arith.constant 1.000000e+00 : f32
    %724 = vector.broadcast %cst_198 : f32 to vector<8x96xf32>
    %725 = arith.addf %724, %723 : vector<8x96xf32>
    %726 = arith.divf %724, %725 : vector<8x96xf32>
    %727 = vector.extract_strided_slice %704 {offsets = [0, 96], sizes = [8, 32], strides = [1, 1]} : vector<8x128xf32> to vector<8x32xf32>
    %728 = math.tanh %727 : vector<8x32xf32>
    %729 = vector.extract_strided_slice %726 {offsets = [0, 32], sizes = [8, 32], strides = [1, 1]} : vector<8x96xf32> to vector<8x32xf32>
    %730 = arith.mulf %729, %689 : vector<8x32xf32>
    %731 = vector.extract_strided_slice %726 {offsets = [0, 0], sizes = [8, 32], strides = [1, 1]} : vector<8x96xf32> to vector<8x32xf32>
    %732 = arith.mulf %731, %728 : vector<8x32xf32>
    %733 = arith.addf %730, %732 : vector<8x32xf32>
    %734 = vector.extract_strided_slice %726 {offsets = [0, 64], sizes = [8, 32], strides = [1, 1]} : vector<8x96xf32> to vector<8x32xf32>
    %735 = math.tanh %733 : vector<8x32xf32>
    %736 = arith.mulf %734, %735 : vector<8x32xf32>
    %c56_199 = arith.constant 56 : index
    %c0_200 = arith.constant 0 : index
    %737 = vector.load %arg16[%c56_199, %c0_200] : memref<64x32xf32, #tpu.memory_space<vmem>>, vector<8x32xf32>
    tpu.vector_store %arg16[%c56_199, %c0_200], %720 {strides = array<i32>} : memref<64x32xf32, #tpu.memory_space<vmem>>, vector<8x32xf32>,
    %c0_201 = arith.constant 0 : index
    %c0_202 = arith.constant 0 : index
    %738 = vector.load %arg17[%c0_201, %c0_202] : memref<64x32xf32, #tpu.memory_space<vmem>>, vector<8x32xf32>
    tpu.vector_store %arg17[%c0_201, %c0_202], %736 {strides = array<i32>} : memref<64x32xf32, #tpu.memory_space<vmem>>, vector<8x32xf32>,
    %739 = tpu.concatenate %720, %736 in 1 : vector<8x32xf32>, vector<8x32xf32> -> vector<8x64xf32>
    %740 = vector.extract_strided_slice %739 {offsets = [0, 0], sizes = [8, 32], strides = [1, 1]} : vector<8x64xf32> to vector<8x32xf32>
    %741 = vector.extract_strided_slice %739 {offsets = [0, 32], sizes = [8, 32], strides = [1, 1]} : vector<8x64xf32> to vector<8x32xf32>
    %742 = arith.addf %740, %741 : vector<8x32xf32>
    %743 = arith.addf %372, %742 : vector<8x32xf32>
    %c0_203 = arith.constant 0 : index
    %c0_204 = arith.constant 0 : index
    %744 = vector.load %arg16[%c0_203, %c0_204] : memref<64x32xf32, #tpu.memory_space<vmem>>, vector<64x32xf32>
    %c0_205 = arith.constant 0 : index
    %c0_206 = arith.constant 0 : index
    %745 = vector.load %arg17[%c0_205, %c0_206] : memref<64x32xf32, #tpu.memory_space<vmem>>, vector<64x32xf32>
    %746 = arith.addf %744, %745 : vector<64x32xf32>
    %747 = math.tanh %746 : vector<64x32xf32>
    %c0_207 = arith.constant 0 : index
    %c0_208 = arith.constant 0 : index
    %748 = vector.load %arg8[%c0_207, %c0_208] : memref<32x32xf32, #tpu.memory_space<vmem>>, vector<32x32xf32>
    %cst_209 = arith.constant dense<0.000000e+00> : vector<8x32xf32>
    %749 = tpu.matmul %743, %748, %cst_209 {dimension_numbers = #tpu.dot_dimension_numbers<[1], [0], [0], [1], [0, 0, 1, 1], [], []>} : vector<8x32xf32>, vector<32x32xf32>, vector<8x32xf32> -> vector<8x32xf32>
    %c0_210 = arith.constant 0 : index
    %c0_211 = arith.constant 0 : index
    %750 = vector.load %arg9[%c0_210, %c0_211] : memref<1x32xf32, #tpu.memory_space<vmem>>, vector<1x32xf32>
    %751 = vector.broadcast %750 : vector<1x32xf32> to vector<8x32xf32>
    %752 = arith.addf %749, %751 : vector<8x32xf32>
    %cst_212 = arith.constant 0.000000e+00 : f32
    %753 = vector.broadcast %cst_212 : f32 to vector<8x32xf32>
    %754 = arith.maximumf %752, %753 : vector<8x32xf32>
    %755 = vector.extract_strided_slice %747 {offsets = [0, 0], sizes = [8, 32], strides = [1, 1]} : vector<64x32xf32> to vector<8x32xf32>
    %756 = arith.mulf %754, %755 : vector<8x32xf32>
    %cst_213 = arith.constant dense<0.000000e+00> : vector<8xf32>
    %757 = vector.multi_reduction <add>, %756, %cst_213 [1] : vector<8x32xf32> to vector<8xf32>
    %758 = vector.shape_cast %757 : vector<8xf32> to vector<8x1xf32>
    %759 = vector.extract_strided_slice %747 {offsets = [8, 0], sizes = [8, 32], strides = [1, 1]} : vector<64x32xf32> to vector<8x32xf32>
    %760 = arith.mulf %754, %759 : vector<8x32xf32>
    %cst_214 = arith.constant dense<0.000000e+00> : vector<8xf32>
    %761 = vector.multi_reduction <add>, %760, %cst_214 [1] : vector<8x32xf32> to vector<8xf32>
    %762 = vector.shape_cast %761 : vector<8xf32> to vector<8x1xf32>
    %763 = vector.extract_strided_slice %747 {offsets = [16, 0], sizes = [8, 32], strides = [1, 1]} : vector<64x32xf32> to vector<8x32xf32>
    %764 = arith.mulf %754, %763 : vector<8x32xf32>
    %cst_215 = arith.constant dense<0.000000e+00> : vector<8xf32>
    %765 = vector.multi_reduction <add>, %764, %cst_215 [1] : vector<8x32xf32> to vector<8xf32>
    %766 = vector.shape_cast %765 : vector<8xf32> to vector<8x1xf32>
    %767 = vector.extract_strided_slice %747 {offsets = [24, 0], sizes = [8, 32], strides = [1, 1]} : vector<64x32xf32> to vector<8x32xf32>
    %768 = arith.mulf %754, %767 : vector<8x32xf32>
    %cst_216 = arith.constant dense<0.000000e+00> : vector<8xf32>
    %769 = vector.multi_reduction <add>, %768, %cst_216 [1] : vector<8x32xf32> to vector<8xf32>
    %770 = vector.shape_cast %769 : vector<8xf32> to vector<8x1xf32>
    %771 = vector.extract_strided_slice %747 {offsets = [32, 0], sizes = [8, 32], strides = [1, 1]} : vector<64x32xf32> to vector<8x32xf32>
    %772 = arith.mulf %754, %771 : vector<8x32xf32>
    %cst_217 = arith.constant dense<0.000000e+00> : vector<8xf32>
    %773 = vector.multi_reduction <add>, %772, %cst_217 [1] : vector<8x32xf32> to vector<8xf32>
    %774 = vector.shape_cast %773 : vector<8xf32> to vector<8x1xf32>
    %775 = vector.extract_strided_slice %747 {offsets = [40, 0], sizes = [8, 32], strides = [1, 1]} : vector<64x32xf32> to vector<8x32xf32>
    %776 = arith.mulf %754, %775 : vector<8x32xf32>
    %cst_218 = arith.constant dense<0.000000e+00> : vector<8xf32>
    %777 = vector.multi_reduction <add>, %776, %cst_218 [1] : vector<8x32xf32> to vector<8xf32>
    %778 = vector.shape_cast %777 : vector<8xf32> to vector<8x1xf32>
    %779 = vector.extract_strided_slice %747 {offsets = [48, 0], sizes = [8, 32], strides = [1, 1]} : vector<64x32xf32> to vector<8x32xf32>
    %780 = arith.mulf %754, %779 : vector<8x32xf32>
    %cst_219 = arith.constant dense<0.000000e+00> : vector<8xf32>
    %781 = vector.multi_reduction <add>, %780, %cst_219 [1] : vector<8x32xf32> to vector<8xf32>
    %782 = vector.shape_cast %781 : vector<8xf32> to vector<8x1xf32>
    %783 = vector.extract_strided_slice %747 {offsets = [56, 0], sizes = [8, 32], strides = [1, 1]} : vector<64x32xf32> to vector<8x32xf32>
    %784 = arith.mulf %754, %783 : vector<8x32xf32>
    %cst_220 = arith.constant dense<0.000000e+00> : vector<8xf32>
    %785 = vector.multi_reduction <add>, %784, %cst_220 [1] : vector<8x32xf32> to vector<8xf32>
    %786 = vector.shape_cast %785 : vector<8xf32> to vector<8x1xf32>
    %787 = tpu.concatenate %758, %762, %766, %770, %774, %778, %782, %786 in 1 : vector<8x1xf32>, vector<8x1xf32>, vector<8x1xf32>, vector<8x1xf32>, vector<8x1xf32>, vector<8x1xf32>, vector<8x1xf32>, vector<8x1xf32> -> vector<8x8xf32>
    %cst_221 = arith.constant dense<0xFF800000> : vector<8xf32>
    %788 = vector.multi_reduction <maximumf>, %787, %cst_221 [1] : vector<8x8xf32> to vector<8xf32>
    %789 = vector.shape_cast %788 : vector<8xf32> to vector<8x1xf32>
    %790 = vector.broadcast %789 : vector<8x1xf32> to vector<8x8xf32>
    %791 = arith.subf %787, %790 : vector<8x8xf32>
    %792 = math.exp %791 : vector<8x8xf32>
    %cst_222 = arith.constant dense<0.000000e+00> : vector<8xf32>
    %793 = vector.multi_reduction <add>, %792, %cst_222 [1] : vector<8x8xf32> to vector<8xf32>
    %794 = vector.shape_cast %793 : vector<8xf32> to vector<8x1xf32>
    %795 = vector.broadcast %794 : vector<8x1xf32> to vector<8x8xf32>
    %796 = arith.divf %792, %795 : vector<8x8xf32>
    %cst_223 = arith.constant 0.000000e+00 : f32
    %797 = vector.broadcast %cst_223 : f32 to vector<8x32xf32>
    %798 = vector.extract_strided_slice %796 {offsets = [0, 0], sizes = [8, 1], strides = [1, 1]} : vector<8x8xf32> to vector<8x1xf32>
    %799 = vector.extract_strided_slice %747 {offsets = [0, 0], sizes = [8, 32], strides = [1, 1]} : vector<64x32xf32> to vector<8x32xf32>
    %800 = vector.broadcast %798 : vector<8x1xf32> to vector<8x32xf32>
    %801 = arith.mulf %800, %799 : vector<8x32xf32>
    %802 = arith.addf %797, %801 : vector<8x32xf32>
    %803 = vector.extract_strided_slice %796 {offsets = [0, 1], sizes = [8, 1], strides = [1, 1]} : vector<8x8xf32> to vector<8x1xf32>
    %804 = vector.extract_strided_slice %747 {offsets = [8, 0], sizes = [8, 32], strides = [1, 1]} : vector<64x32xf32> to vector<8x32xf32>
    %805 = vector.broadcast %803 : vector<8x1xf32> to vector<8x32xf32>
    %806 = arith.mulf %805, %804 : vector<8x32xf32>
    %807 = arith.addf %802, %806 : vector<8x32xf32>
    %808 = vector.extract_strided_slice %796 {offsets = [0, 2], sizes = [8, 1], strides = [1, 1]} : vector<8x8xf32> to vector<8x1xf32>
    %809 = vector.extract_strided_slice %747 {offsets = [16, 0], sizes = [8, 32], strides = [1, 1]} : vector<64x32xf32> to vector<8x32xf32>
    %810 = vector.broadcast %808 : vector<8x1xf32> to vector<8x32xf32>
    %811 = arith.mulf %810, %809 : vector<8x32xf32>
    %812 = arith.addf %807, %811 : vector<8x32xf32>
    %813 = vector.extract_strided_slice %796 {offsets = [0, 3], sizes = [8, 1], strides = [1, 1]} : vector<8x8xf32> to vector<8x1xf32>
    %814 = vector.extract_strided_slice %747 {offsets = [24, 0], sizes = [8, 32], strides = [1, 1]} : vector<64x32xf32> to vector<8x32xf32>
    %815 = vector.broadcast %813 : vector<8x1xf32> to vector<8x32xf32>
    %816 = arith.mulf %815, %814 : vector<8x32xf32>
    %817 = arith.addf %812, %816 : vector<8x32xf32>
    %818 = vector.extract_strided_slice %796 {offsets = [0, 4], sizes = [8, 1], strides = [1, 1]} : vector<8x8xf32> to vector<8x1xf32>
    %819 = vector.extract_strided_slice %747 {offsets = [32, 0], sizes = [8, 32], strides = [1, 1]} : vector<64x32xf32> to vector<8x32xf32>
    %820 = vector.broadcast %818 : vector<8x1xf32> to vector<8x32xf32>
    %821 = arith.mulf %820, %819 : vector<8x32xf32>
    %822 = arith.addf %817, %821 : vector<8x32xf32>
    %823 = vector.extract_strided_slice %796 {offsets = [0, 5], sizes = [8, 1], strides = [1, 1]} : vector<8x8xf32> to vector<8x1xf32>
    %824 = vector.extract_strided_slice %747 {offsets = [40, 0], sizes = [8, 32], strides = [1, 1]} : vector<64x32xf32> to vector<8x32xf32>
    %825 = vector.broadcast %823 : vector<8x1xf32> to vector<8x32xf32>
    %826 = arith.mulf %825, %824 : vector<8x32xf32>
    %827 = arith.addf %822, %826 : vector<8x32xf32>
    %828 = vector.extract_strided_slice %796 {offsets = [0, 6], sizes = [8, 1], strides = [1, 1]} : vector<8x8xf32> to vector<8x1xf32>
    %829 = vector.extract_strided_slice %747 {offsets = [48, 0], sizes = [8, 32], strides = [1, 1]} : vector<64x32xf32> to vector<8x32xf32>
    %830 = vector.broadcast %828 : vector<8x1xf32> to vector<8x32xf32>
    %831 = arith.mulf %830, %829 : vector<8x32xf32>
    %832 = arith.addf %827, %831 : vector<8x32xf32>
    %833 = vector.extract_strided_slice %796 {offsets = [0, 7], sizes = [8, 1], strides = [1, 1]} : vector<8x8xf32> to vector<8x1xf32>
    %834 = vector.extract_strided_slice %747 {offsets = [56, 0], sizes = [8, 32], strides = [1, 1]} : vector<64x32xf32> to vector<8x32xf32>
    %835 = vector.broadcast %833 : vector<8x1xf32> to vector<8x32xf32>
    %836 = arith.mulf %835, %834 : vector<8x32xf32>
    %837 = arith.addf %832, %836 : vector<8x32xf32>
    %c0_224 = arith.constant 0 : index
    %c0_225 = arith.constant 0 : index
    %838 = vector.load %arg10[%c0_224, %c0_225] : memref<32x5xf32, #tpu.memory_space<vmem>>, vector<32x5xf32>
    %cst_226 = arith.constant dense<0.000000e+00> : vector<8x5xf32>
    %839 = tpu.matmul %837, %838, %cst_226 {dimension_numbers = #tpu.dot_dimension_numbers<[1], [0], [0], [1], [0, 0, 1, 1], [], []>} : vector<8x32xf32>, vector<32x5xf32>, vector<8x5xf32> -> vector<8x5xf32>
    %c0_227 = arith.constant 0 : index
    %c0_228 = arith.constant 0 : index
    %840 = vector.load %arg11[%c0_227, %c0_228] : memref<1x5xf32, #tpu.memory_space<vmem>>, vector<1x5xf32>
    %841 = vector.broadcast %840 : vector<1x5xf32> to vector<8x5xf32>
    %842 = arith.addf %839, %841 : vector<8x5xf32>
    %843 = vector.extract_strided_slice %842 {offsets = [0, 0], sizes = [2, 5], strides = [1, 1]} : vector<8x5xf32> to vector<2x5xf32>
    %c0_229 = arith.constant 0 : index
    %c0_230 = arith.constant 0 : index
    %844 = vector.load %arg12[%c0_229, %c0_230] : memref<2x5xf32, #tpu.memory_space<vmem>>, vector<2x5xf32>
    tpu.vector_store %arg12[%c0_229, %c0_230], %843 {strides = array<i32>} : memref<2x5xf32, #tpu.memory_space<vmem>>, vector<2x5xf32>,
    return
  }
}

</mosaic_0001>

<bundles_post_ra>
// kernel: st_model_forward.1
= control target key start
LH: loop header
LB: loop body
LE: loop exit
PB: predicated region body
PF: predicated region fallthrough
CT: control target
= control target key end

     0   :  { %vm132_vm0 = vcmask 1041408   ;;  %v3856_v2 = vmov 0   ;;  %v3857_v7 = vmov 0.0   ;;  %s5102_s0 = inlined_call_operand.vmem [shape: s32[64,1], index: 0, kind: input, shape index: {}]   ;;  %s5103_s1 = inlined_call_operand.vmem [shape: f32[50,32], index: 1, kind: input, shape index: {}]   ;;  %s5104_s2 = inlined_call_operand.vmem [shape: f32[32,256], index: 2, kind: input, shape index: {}]   ;;  %s5105_s3 = inlined_call_operand.vmem [shape: f32[64,256], index: 3, kind: input, shape index: {}]   ;;  %s5106_s4 = inlined_call_operand.vmem [shape: f32[1,256], index: 4, kind: input, shape index: {}]   ;;  %s5107_s5 = inlined_call_operand.vmem [shape: f32[64,256], index: 5, kind: input, shape index: {}]   ;;  %s5108_s6 = inlined_call_operand.vmem [shape: f32[64,256], index: 6, kind: input, shape index: {}]   ;;  %s5109_s7 = inlined_call_operand.vmem [shape: f32[1,256], index: 7, kind: input, shape index: {}]   ;;  %s5110_s8 = inlined_call_operand.vmem [shape: f32[32,32], index: 8, kind: input, shape index: {}]   ;;  %s5111_s9 = inlined_call_operand.vmem [shape: f32[1,32], index: 9, kind: input, shape index: {}]   ;;  %s5112_s10 = inlined_call_operand.vmem [shape: f32[32,5], index: 10, kind: input, shape index: {}]   ;;  %s5113_s11 = inlined_call_operand.vmem [shape: f32[1,5], index: 11, kind: input, shape index: {}]   ;;  %s5114_s12 = inlined_call_operand.hbm [shape: f32[2,5], index: 12, kind: output, shape index: {}]  }
   0x1   :  { %v44_v0 = vld [vmem:[%s5102_s0 + $0x10] sm:$0xff]  ;;  %v42_v1 = vld [vmem:[%s5102_s0] sm:$0xff]  ;;  %3549 = vset.pattern.permute.xlu1 %v3856_v2  ;;  %3548 = vset.pattern.permute.xlu0 %v3856_v2  ;;  %v45_v4 = vld [vmem:[%s5102_s0 + $0x18] sm:$0xff] }
   0x2   :  { %59 = vperm.xlu1 %3549, %v44_v0   ;;  %53 = vperm.xlu0 %3548, %v42_v1   ;;  %v106_v3 = vld [vmem:[%s5103_s1 + $0x30] sm:$0x3]  ;;  %v43_v5 = vld [vmem:[%s5102_s0 + $0x8] sm:$0xff]  ;;  %v104_v8 = vld [vmem:[%s5103_s1 + $0x20] sm:$0xff] }
   0x3   :  { %3486 = vmatprep.subr.msk.mxu0 %vm132_vm0, %v106_v3  ;;  %v105_v6 = vld [vmem:[%s5103_s1 + $0x28] sm:$0xff]  ;;  %350 = vmatprep.mubr.f32.mxu1 %v3857_v7 }
   0x4   :  { %3487 = vmatpush3.msk.msra.mxu0 %vm132_vm0, %v106_v3 }
   0x5   :  { %3488 = vmatprep.subr.mxu0 %v105_v6 }
   0x6   :  { %17 = vsyncpa [#allocation8], 0  ;;  %62 = vperm.xlu1 %3549, %v45_v4   ;;  %56 = vperm.xlu0 %3548, %v43_v5   ;;  %v47_v9 = vld [vmem:[%s5102_s0 + $0x28] sm:$0xff]  ;;  %v46_v10 = vld [vmem:[%s5102_s0 + $0x20] sm:$0xff]  ;;  %v50_v23 = vlaneseq  ;;  %vm107_vm1 = vcmask 408576   ;;  %vm261_vm10 = vcmask 261120  }
   0x7   :  { %3489 = vmatpush3.msra.mxu0 %v105_v6  ;;  %v103_v11 = vld [vmem:[%s5103_s1 + $0x18] sm:$0xff]  ;;  %v102_v12 = vld [vmem:[%s5103_s1 + $0x10] sm:$0xff]  ;;  %v101_v15 = vld [vmem:[%s5103_s1 + $0x8] sm:$0xff]  ;;  %s3859_s21 = smov 64   ;;  %s3860_s22 = smov 96   ;;  %vm431_vm11 = vcmask 523264  }
   0x8   :  { %3490 = vmatprep.subr.mxu0 %v104_v8  ;;  %v49_v13 = vld [vmem:[%s5102_s0 + $0x38] sm:$0xff]  ;;  %v48_v14 = vld [vmem:[%s5102_s0 + $0x30] sm:$0xff]  ;;  %v100_v16 = vld [vmem:[%s5103_s1] sm:$0xff]  ;;  %v51_v24 = vand.u32 127, %v50_v23  ;;  %v4172_v3 = vshrl.u32 %v50_v23, 7  ;;  %vm3861_vm12 = vmmov 0  }
   0x9   :  { %3491 = vmatpush3.msra.mxu0 %v104_v8  ;;  %v3984_v17 = vld [vmem:[%s5105_s3 + $0x78] sm:$0xff]  ;;  %v247_v19 = vld [vmem:[%s5104_s2 + $0x30] sm:$0xff]  ;;  %v246_v20 = vld [vmem:[%s5104_s2 + $0x28] sm:$0xff]  ;;  %vm3195_vm13 = vcmask 7168   ;;  %vm3197_vm14 = vcmask 15360   ;;  %vm3199_vm15 = vcmask 23552  }
   0xa   :  { %68 = vperm.xlu1 %3549, %v47_v9   ;;  %65 = vperm.xlu0 %3548, %v46_v10   ;;  %v248_v18 = vld [vmem:[%s5104_s2 + $0x38] sm:$0xff]  ;;  %v245_v21 = vld [vmem:[%s5104_s2 + $0x20] sm:$0xff]  ;;  %v4009_v31 = vld [vmem:[%s5105_s3 + $0x70] sm:$0xff]  ;;  %v253_v4 = vsub.s32 0, %v4172_v3  ;;  %v257_v6 = vsub.s32 1, %v4172_v3  ;;  %vm3201_vm0 = vcmask 31744  }
   0xb   :  { %3492 = vmatprep.subr.mxu0 %v103_v11  ;;  %310 = vmatprep.subr.mxu1 %v248_v18  ;;  %v244_v22 = vld [vmem:[%s5104_s2 + $0x18] sm:$0xff]  ;;  %v4015_v33 = vld [vmem:[%s5105_s3 + $0x68] sm:$0xff]  ;;  %v4021_v34 = vld [vmem:[%s5105_s3 + $0x60] sm:$0xff]  ;;  %s3869_s20 = smov [#allocation7]  }
   0xc   :  { %3493 = vmatpush3.msra.mxu0 %v103_v11  ;;  %311 = vmatpush1.msra.mxu1 %v247_v19  ;;  %v4029_v38 = vld [vmem:[%s5105_s3 + $0x58] sm:$0xff]  ;;  %v4035_v39 = vld [vmem:[%s5105_s3 + $0x50] sm:$0xff]  ;;  %v4042_v41 = vld [vmem:[%s5105_s3 + $0x48] sm:$0xff] }
   0xd   :  { %3494 = vmatprep.subr.mxu0 %v102_v12  ;;  %312 = vmatprep.subr.mxu1 %v246_v20  ;;  %v4049_v42 = vld [vmem:[%s5105_s3 + $0x40] sm:$0xff]  ;;  %v4056_v45 = vld [vmem:[%s5105_s3 + $0x38] sm:$0xff]  ;;  %v4062_v46 = vld [vmem:[%s5105_s3 + $0x30] sm:$0xff] }
   0xe   :  { %74 = vperm.xlu1 %3549, %v49_v13   ;;  %71 = vperm.xlu0 %3548, %v48_v14   ;;  %v4070_v49 = vld [vmem:[%s5105_s3 + $0x28] sm:$0xff]  ;;  %v243_v51 = vld [vmem:[%s5104_s2 + $0x10] sm:$0xff]  ;;  %v4086_v52 = vld [vmem:[%s5105_s3 + $0x20] sm:$0xff] }
   0xf   :  { %3495 = vmatpush3.msra.mxu0 %v102_v12  ;;  %313 = vmatpush1.msra.mxu1 %v245_v21  ;;  %v242_v53 = vld [vmem:[%s5104_s2 + $0x8] sm:$0xff]  ;;  %v4095_v54 = vld [vmem:[%s5105_s3 + $0x18] sm:$0xff]  ;;  %v241_v55 = vld [vmem:[%s5104_s2] sm:$0xff] }
  0x10   :  { %3496 = vmatprep.subr.mxu0 %v101_v15  ;;  %314 = vmatprep.subr.mxu1 %v244_v22  ;;  %v4104_v56 = vld [vmem:[%s5105_s3 + $0x10] sm:$0xff]  ;;  %v4110_v57 = vld [vmem:[%s5105_s3 + $0x8] sm:$0xff]  ;;  %v4116_v58 = vld [vmem:[%s5105_s3] sm:$0xff] }
  0x11   :  { %3497 = vmatpush3.msra.mxu0 %v101_v15  ;;  %315 = vmatpush1.msra.mxu1 %v243_v51  ;;  %v249_v5 = vld [vmem:[%s5106_s4] sm:$0x3]  ;;  %s3858_s4 = smov 32  }
  0x12   :  { %3498 = vmatprep.subr.mxu0 %v100_v16  ;;  %316 = vmatprep.subr.mxu1 %v242_v53  ;;  %v254_v8 = vrot.slane %v249_v5, %v253_v4  ;;  %v258_v9 = vrot.slane %v249_v5, %v257_v6 }
  0x13   :  { %3499 = vmatpush3.msra.mxu0 %v100_v16  ;;  %317 = vmatpush1.msra.mxu1 %v241_v55 }
  0x14   :  { %451 = vmatprep.subr.mxu0 %v3984_v17  ;;  %591 = vmatprep.subr.mxu1 %v3984_v17 }
  0x7d   :  { %v60_v25 = vpop.permute.xlu1 %59  ;;  %v54_v26 = vpop.permute.xlu0 %53 }
  0x7e   :  { %vm76_vm2 = vcmp.eq.s32.totalorder %v51_v24, %v54_v26  ;;  %vm78_vm3 = vcmp.eq.s32.totalorder %v51_v24, %v60_v25 }
  0x7f   :  { %v3370_v27 = vsel %vm76_vm2, 1.0, %v3857_v7  ;;  %v3372_v30 = vsel %vm78_vm3, 1.0, %v3857_v7  ;;  %vm3205_vm2 = vcmask 48128   ;;  %vm3207_vm3 = vcmask 56320  }
  0x80   :  { %3500 = vmatprep.mubr.msk.f32.mxu0 %vm107_vm1, %v3370_v27 }
  0x81   :  { %v63_v28 = vpop.permute.xlu1 %62  ;;  %v57_v29 = vpop.permute.xlu0 %56 }
  0x82   :  { %vm79_vm4 = vcmp.eq.s32.totalorder %v51_v24, %v63_v28  ;;  %vm77_vm5 = vcmp.eq.s32.totalorder %v51_v24, %v57_v29 }
  0x83   :  { %v3371_v32 = vsel %vm77_vm5, 1.0, %v3857_v7  ;;  %v3373_v35 = vsel %vm79_vm4, 1.0, %v3857_v7  ;;  %vm3209_vm4 = vcmask 64512   ;;  %vm3354_vm5 = vcmask 33792  }
  0x84   :  { %3501 = vmatmul.mubr.msk.f32.vlgmr.msra.gmra.mxu0 %vm107_vm1, %v3371_v32 }
  0x85   :  { %v69_v36 = vpop.permute.xlu1 %68  ;;  %v66_v37 = vpop.permute.xlu0 %65  ;;  %3503 = vmatprep.mubr.msk.f32.mxu0 %vm107_vm1, %v3372_v30  ;;  %452 = vmatpush1.msra.mxu0 %v4009_v31 }
  0x86   :  { %vm80_vm6 = vcmp.eq.s32.totalorder %v51_v24, %v66_v37  ;;  %453 = vmatprep.subr.mxu0 %v4015_v33  ;;  %vm81_vm7 = vcmp.eq.s32.totalorder %v51_v24, %v69_v36 }
  0x87   :  { %v3374_v40 = vsel %vm80_vm6, 1.0, %v3857_v7  ;;  %454 = vmatpush1.msra.mxu0 %v4021_v34  ;;  %v3375_v47 = vsel %vm81_vm7, 1.0, %v3857_v7 }
  0x88   :  { %3504 = vmatmul.mubr.msk.f32.gmra.mxu0 %vm107_vm1, %v3373_v35  ;;  %455 = vmatprep.subr.mxu0 %v4029_v38 }
  0x89   :  { %v75_v43 = vpop.permute.xlu1 %74  ;;  %3506 = vmatprep.mubr.msk.f32.mxu0 %vm107_vm1, %v3374_v40  ;;  %v72_v44 = vpop.permute.xlu0 %71  ;;  %456 = vmatpush1.msra.mxu0 %v4035_v39 }
  0x8a   :  { %vm82_vm8 = vcmp.eq.s32.totalorder %v51_v24, %v72_v44  ;;  %457 = vmatprep.subr.mxu0 %v4042_v41  ;;  %vm83_vm9 = vcmp.eq.s32.totalorder %v51_v24, %v75_v43 }
  0x8b   :  { %v3376_v48 = vsel %vm82_vm8, 1.0, %v3857_v7  ;;  %458 = vmatpush1.msra.mxu0 %v4049_v42  ;;  %v3377_v50 = vsel %vm83_vm9, 1.0, %v3857_v7 }
  0x8c   :  { %3507 = vmatmul.mubr.msk.f32.gmra.mxu0 %vm107_vm1, %v3375_v47  ;;  %459 = vmatprep.subr.mxu0 %v4056_v45 }
  0x8d   :  { %3509 = vmatprep.mubr.msk.f32.mxu0 %vm107_vm1, %v3376_v48  ;;  %460 = vmatpush1.msra.mxu0 %v4062_v46 }
  0x8e   :  { %461 = vmatprep.subr.mxu0 %v4070_v49 }
  0x8f   :  { %462 = vmatpush1.msra.mxu0 %v4086_v52 }
  0x90   :  { %3510 = vmatmul.mubr.msk.f32.gmra.mxu0 %vm107_vm1, %v3377_v50  ;;  %463 = vmatprep.subr.mxu0 %v4095_v54  ;;  %vm3203_vm1 = vcmask 39936  }
  0x91   :  { %499 = vmatprep.mubr.f32.mxu0 %v3857_v7  ;;  %464 = vmatpush1.msra.mxu0 %v4104_v56 }
  0x92   :  { %465 = vmatprep.subr.mxu0 %v4110_v57 }
  0x93   :  { %466 = vmatpush1.msra.mxu0 %v4116_v58 }
  0x94   :  { %500 = vmatmul.mubr.f32.vlgmr.msra.gmra.mxu0 %v3857_v7  ;;  %731 = vmatprep.subr.mxu0 %v3984_v17 }
  0x95   :  { %732 = vmatpush1.msra.mxu0 %v4009_v31  ;;  %779 = vmatprep.mubr.f32.mxu0 %v3857_v7 }
  0x96   :  { %733 = vmatprep.subr.mxu0 %v4015_v33 }
  0x97   :  { %734 = vmatpush1.msra.mxu0 %v4021_v34 }
  0x98   :  { %735 = vmatprep.subr.mxu0 %v4029_v38 }
  0x99   :  { %736 = vmatpush1.msra.mxu0 %v4035_v39 }
  0x9a   :  { %737 = vmatprep.subr.mxu0 %v4042_v41 }
  0x9b   :  { %738 = vmatpush1.msra.mxu0 %v4049_v42 }
  0x9c   :  { %739 = vmatprep.subr.mxu0 %v4056_v45 }
  0x9d   :  { %740 = vmatpush1.msra.mxu0 %v4062_v46 }
  0x9e   :  { %741 = vmatprep.subr.mxu0 %v4070_v49 }
  0x9f   :  { %742 = vmatpush1.msra.mxu0 %v4086_v52 }
  0xa0   :  { %743 = vmatprep.subr.mxu0 %v4095_v54 }
  0xa1   :  { %744 = vmatpush1.msra.mxu0 %v4104_v56 }
  0xa2   :  { %745 = vmatprep.subr.mxu0 %v4110_v57 }
  0xa3   :  { %746 = vmatpush1.msra.mxu0 %v4116_v58 }
  0xa4   :  { %1011 = vmatprep.subr.mxu0 %v3984_v17 }
 0x144   :  { %v3502_v59 = vpop.f32.mrf.mxu0 }
 0x146   :  { %v202_v60 = vpop.f32.mrf.mxu0 }
 0x147   :  { %3387 = vmatmul.mubr.msk.f32.vlgmr.msra.gmra.mxu1 %vm261_vm10, %v202_v60 }
 0x148   :  { %356 = vmatprep.mubr.f32.mxu1 %v3857_v7  ;;  %592 = vmatpush1.msra.mxu1 %v4009_v31  ;;  %v3505_v61 = vpop.f32.mrf.mxu0 }
 0x149   :  { %593 = vmatprep.subr.mxu1 %v4015_v33 }
 0x14a   :  { %594 = vmatpush1.msra.mxu1 %v4021_v34  ;;  %v212_v62 = vpop.f32.mrf.mxu0 }
 0x14b   :  { %3388 = vmatmul.mubr.msk.f32.gmra.mxu1 %vm261_vm10, %v3502_v59  ;;  %595 = vmatprep.subr.mxu1 %v4029_v38 }
 0x14c   :  { %362 = vmatprep.mubr.f32.mxu1 %v3857_v7  ;;  %596 = vmatpush1.msra.mxu1 %v4035_v39  ;;  %v3508_v63 = vpop.f32.mrf.mxu0 }
 0x14d   :  { %597 = vmatprep.subr.mxu1 %v4042_v41 }
 0x14e   :  { %598 = vmatpush1.msra.mxu1 %v4049_v42  ;;  %v222_v0 = vpop.f32.mrf.mxu0 }
 0x14f   :  { %3389 = vmatmul.mubr.msk.f32.gmra.mxu1 %vm261_vm10, %v212_v62  ;;  %599 = vmatprep.subr.mxu1 %v4056_v45 }
 0x150   :  { %368 = vmatprep.mubr.f32.mxu1 %v3857_v7  ;;  %600 = vmatpush1.msra.mxu1 %v4062_v46  ;;  %v3511_v1 = vpop.f32.mrf.mxu0 }
 0x151   :  { %601 = vmatprep.subr.mxu1 %v4070_v49 }
 0x152   :  { %602 = vmatpush1.msra.mxu1 %v4086_v52  ;;  %v232_v2 = vpop.f32.mrf.mxu0 }
 0x153   :  { %3390 = vmatmul.mubr.msk.f32.gmra.mxu1 %vm261_vm10, %v3505_v61  ;;  %603 = vmatprep.subr.mxu1 %v4095_v54 }
 0x154   :  { %374 = vmatprep.mubr.f32.mxu1 %v3857_v7  ;;  %604 = vmatpush1.msra.mxu1 %v4104_v56  ;;  %v501_v11 = vpop.f32.mrf.mxu0 }
 0x155   :  { %605 = vmatprep.subr.mxu1 %v4110_v57 }
 0x156   :  { %606 = vmatpush1.msra.mxu1 %v4116_v58  ;;  %v503_v61 = vpop.f32.mrf.mxu0 }
 0x157   :  { %3391 = vmatmul.mubr.msk.f32.gmra.mxu1 %vm261_vm10, %v222_v0  ;;  %871 = vmatprep.subr.mxu1 %v3984_v17 }
 0x158   :  { %380 = vmatprep.mubr.f32.mxu1 %v3857_v7 }
 0x15b   :  { %3392 = vmatmul.mubr.msk.f32.gmra.mxu1 %vm261_vm10, %v3508_v63 }
 0x15c   :  { %386 = vmatprep.mubr.f32.mxu1 %v3857_v7 }
 0x15f   :  { %3393 = vmatmul.mubr.msk.f32.gmra.mxu1 %vm261_vm10, %v232_v2 }
 0x160   :  { %392 = vmatprep.mubr.f32.mxu1 %v3857_v7 }
 0x163   :  { %3394 = vmatmul.mubr.msk.f32.gmra.mxu1 %vm261_vm10, %v3511_v1 }
 0x164   :  { %639 = vmatprep.mubr.f32.mxu1 %v3857_v7 }
 0x207   :  { %v352_v10 = vpop.f32.mrf.mxu1 }
 0x208   :  { %v353_v12 = vadd.f32 %v352_v10, %v254_v8 }
 0x209   :  { %v354_v13 = vpop.f32.mrf.mxu1 }
 0x20a   :  { %v4183_v14 = vadd.f32 %v354_v13, %v258_v9  ;;  %v508_v15 = vadd.f32 %v501_v11, %v353_v12 }
 0x20b   :  { %v358_v16 = vpop.f32.mrf.mxu1 }
 0x20c   :  { %3558 = vtanh.f32 %v508_v15  ;;  %v4185_v18 = vadd.f32 %v358_v16, %v254_v8  ;;  %v3395_v0 = vmul.f32 -1.442695, %v508_v15 }
 0x20d   :  { %v360_v19 = vpop.f32.mrf.mxu1 }
 0x20e   :  { %v4187_v20 = vadd.f32 %v360_v19, %v258_v9 }
 0x20f   :  { %v364_v21 = vpop.f32.mrf.mxu1 }
 0x210   :  { %v4189_v22 = vadd.f32 %v364_v21, %v254_v8 }
 0x211   :  { %v366_v23 = vpop.f32.mrf.mxu1 }
 0x212   :  { %v4191_v24 = vadd.f32 %v366_v23, %v258_v9 }
 0x213   :  { %v370_v25 = vpop.f32.mrf.mxu1 }
 0x214   :  { %v4193_v26 = vadd.f32 %v370_v25, %v254_v8 }
 0x215   :  { %v372_v27 = vpop.f32.mrf.mxu1 }
 0x216   :  { %v4195_v28 = vadd.f32 %v372_v27, %v258_v9 }
 0x217   :  { %v376_v29 = vpop.f32.mrf.mxu1 }
 0x218   :  { %v4197_v30 = vadd.f32 %v376_v29, %v254_v8 }
 0x219   :  { %v3559_v32 = vpop.eup %3558  ;;  %v378_v35 = vpop.f32.mrf.mxu1 }
 0x21a   :  { %v4199_v36 = vadd.f32 %v378_v35, %v258_v9  ;;  %519 = vrot.lane.b32.xlu0 %v3559_v32, %s3858_s4 }
 0x21b   :  { %v382_v37 = vpop.f32.mrf.mxu1 }
 0x21c   :  { %v4202_v40 = vadd.f32 %v382_v37, %v254_v8 }
 0x21d   :  { %v384_v43 = vpop.f32.mrf.mxu1 }
 0x21e   :  { %v4204_v44 = vadd.f32 %v384_v43, %v258_v9 }
 0x21f   :  { %v388_v47 = vpop.f32.mrf.mxu1 }
 0x220   :  { %v4206_v48 = vadd.f32 %v388_v47, %v254_v8 }
 0x221   :  { %v390_v50 = vpop.f32.mrf.mxu1 }
 0x222   :  { %v4208_v51 = vadd.f32 %v390_v50, %v258_v9 }
 0x223   :  { %v394_v53 = vpop.f32.mrf.mxu1 }
 0x224   :  { %v4210_v55 = vadd.f32 %v394_v53, %v254_v8 }
 0x225   :  { %v396_v59 = vpop.f32.mrf.mxu1 }
 0x226   :  { %v397_v60 = vadd.f32 %v396_v59, %v258_v9 }
 0x228   :  { %v509_v62 = vadd.f32 %v503_v61, %v397_v60 }
 0x22a   :  { %3560 = vtanh.f32 %v509_v62  ;;  %v3396_v5 = vmul.f32 -1.442695, %v509_v62 }
 0x22b   :  { %3562 = vpow2.f32 %v3395_v0 }
 0x237   :  { %v3561_v63 = vpop.eup %3560 }
 0x238   :  { %543 = vrot.lane.b32.xlu1 %v3561_v63, %s3858_s4  ;;  %v3563_v1 = vpop.eup %3562 }
 0x239   :  { %v513_v2 = vadd.f32 1.0, %v3563_v1 }
 0x23b   :  { %3564 = vrcp.f32 %v513_v2 }
 0x23c   :  { %3566 = vpow2.f32 %v3396_v5 }
 0x248   :  { %v3565_v10 = vpop.eup %3564 }
 0x249   :  { %v3567_v8 = vpop.eup %3566  ;;  %v517_v15 = vmul.f32 0.0, %v3565_v10 }
 0x24a   :  { %v537_v9 = vadd.f32 1.0, %v3567_v8 }
 0x24c   :  { %3568 = vrcp.f32 %v537_v9 }
 0x259   :  { %v3569_v13 = vpop.eup %3568 }
 0x25a   :  { %v541_v27 = vmul.f32 0.0, %v3569_v13 }
 0x28c   :  { %v520_v11 = vpop.permute.xlu0 %519 }
 0x28d   :  { %v522_v12 = vmul.f32 %v3565_v10, %v520_v11 }
 0x28f   :  { %524 = vrot.lane.b32.xlu0 %v522_v12, %s3858_s4 }
 0x2aa   :  { %v544_v16 = vpop.permute.xlu1 %543 }
 0x2ab   :  { %v546_v19 = vmul.f32 %v3569_v13, %v544_v16 }
 0x2ad   :  { %548 = vrot.lane.b32.xlu1 %v546_v19, %s3858_s4 }
 0x301   :  { %v525_v21 = vpop.permute.xlu0 %524 }
 0x302   :  { %v4215_v23 = vadd.f32 %v525_v21, %v517_v15 }
 0x304   :  { %3570 = vtanh.f32 %v4215_v23 }
 0x311   :  { %v3571_v25 = vpop.eup %3570 }
 0x312   :  { %530 = vrot.lane.b32.xlu0 %v3571_v25, %s3858_s4 }
 0x31f   :  { %v549_v29 = vpop.permute.xlu1 %548 }
 0x320   :  { %v4219_v32 = vadd.f32 %v549_v29, %v541_v27 }
 0x322   :  { %3572 = vtanh.f32 %v4219_v32 }
 0x32f   :  { %v3573_v35 = vpop.eup %3572 }
 0x330   :  { %554 = vrot.lane.b32.xlu1 %v3573_v35, %s3858_s4 }
 0x384   :  { %v531_v37 = vpop.permute.xlu0 %530 }
 0x385   :  { %v533_v43 = vmul.f32 %v3565_v10, %v531_v37 }
 0x387   :  { %559 = vrot.lane.b32.xlu0 %v533_v43, %s3859_s21 }
 0x3a2   :  { %v555_v47 = vpop.permute.xlu1 %554 }
 0x3a3   :  { %v4224_v50 = vmul.f32 %v3569_v13, %v555_v47 }
 0x3a5   :  { %568 = vrot.lane.b32.xlu1 %v4224_v50, %s3860_s22 }
 0x3f9   :  { %v560_v53 = vpop.permute.xlu0 %559 }
 0x3fa   :  { %562 = vst.msk [vmem:[#allocation3] sm:$0xff] %vm261_vm10, %v560_v53 }
 0x417   :  { %v569_v59 = vpop.permute.xlu1 %568 }
 0x418   :  { %v571_v60 = vsel %vm261_vm10, %v560_v53, %v569_v59 }
 0x419   :  { %3397 = vmatmul.mubr.msk.f32.vlgmr.msra.gmra.mxu1 %vm431_vm11, %v571_v60 }
 0x41a   :  { %872 = vmatpush1.msra.mxu1 %v4009_v31  ;;  %919 = vmatprep.mubr.f32.mxu1 %v3857_v7 }
 0x41b   :  { %873 = vmatprep.subr.mxu1 %v4015_v33 }
 0x41c   :  { %874 = vmatpush1.msra.mxu1 %v4021_v34 }
 0x41d   :  { %875 = vmatprep.subr.mxu1 %v4029_v38 }
 0x41e   :  { %876 = vmatpush1.msra.mxu1 %v4035_v39 }
 0x41f   :  { %877 = vmatprep.subr.mxu1 %v4042_v41 }
 0x420   :  { %878 = vmatpush1.msra.mxu1 %v4049_v42 }
 0x421   :  { %879 = vmatprep.subr.mxu1 %v4056_v45 }
 0x422   :  { %880 = vmatpush1.msra.mxu1 %v4062_v46 }
 0x423   :  { %881 = vmatprep.subr.mxu1 %v4070_v49 }
 0x424   :  { %882 = vmatpush1.msra.mxu1 %v4086_v52 }
 0x425   :  { %883 = vmatprep.subr.mxu1 %v4095_v54 }
 0x426   :  { %884 = vmatpush1.msra.mxu1 %v4104_v56 }
 0x427   :  { %885 = vmatprep.subr.mxu1 %v4110_v57 }
 0x428   :  { %886 = vmatpush1.msra.mxu1 %v4116_v58 }
 0x429   :  { %1151 = vmatprep.subr.mxu1 %v3984_v17 }
 0x4d9   :  { %v641_v61 = vpop.f32.mrf.mxu1 }
 0x4da   :  { %v648_v62 = vadd.f32 %v641_v61, %v4185_v18 }
 0x4db   :  { %v643_v63 = vpop.f32.mrf.mxu1 }
 0x4dc   :  { %3574 = vtanh.f32 %v648_v62  ;;  %v649_v0 = vadd.f32 %v643_v63, %v4208_v51  ;;  %v3398_v5 = vmul.f32 -1.442695, %v648_v62 }
 0x4de   :  { %3576 = vtanh.f32 %v649_v0  ;;  %v3399_v10 = vmul.f32 -1.442695, %v649_v0 }
 0x4df   :  { %3578 = vpow2.f32 %v3398_v5 }
 0x4e0   :  { %3580 = vpow2.f32 %v3399_v10 }
 0x4e9   :  { %v3575_v1 = vpop.eup %3574 }
 0x4ea   :  { %659 = vrot.lane.b32.xlu0 %v3575_v1, %s3858_s4 }
 0x4eb   :  { %v3577_v2 = vpop.eup %3576 }
 0x4ec   :  { %683 = vrot.lane.b32.xlu1 %v3577_v2, %s3858_s4  ;;  %v3579_v11 = vpop.eup %3578 }
 0x4ed   :  { %v3581_v12 = vpop.eup %3580  ;;  %v653_v8 = vadd.f32 1.0, %v3579_v11 }
 0x4ee   :  { %v677_v9 = vadd.f32 1.0, %v3581_v12 }
 0x4ef   :  { %3582 = vrcp.f32 %v653_v8 }
 0x4f0   :  { %3584 = vrcp.f32 %v677_v9 }
 0x4fc   :  { %v3583_v18 = vpop.eup %3582 }
 0x4fd   :  { %v3585_v16 = vpop.eup %3584  ;;  %v657_v21 = vmul.f32 %v3583_v18, %v4215_v23 }
 0x4fe   :  { %v681_v29 = vmul.f32 %v3585_v16, %v4219_v32 }
 0x55c   :  { %v660_v13 = vpop.permute.xlu0 %659 }
 0x55d   :  { %v662_v51 = vmul.f32 %v3583_v18, %v660_v13 }
 0x55e   :  { %v684_v19 = vpop.permute.xlu1 %683 }
 0x55f   :  { %664 = vrot.lane.b32.xlu0 %v662_v51, %s3858_s4  ;;  %v686_v15 = vmul.f32 %v3585_v16, %v684_v19 }
 0x561   :  { %688 = vrot.lane.b32.xlu1 %v686_v15, %s3858_s4 }
 0x5d1   :  { %v665_v25 = vpop.permute.xlu0 %664 }
 0x5d2   :  { %v4255_v27 = vadd.f32 %v665_v25, %v657_v21 }
 0x5d3   :  { %v689_v35 = vpop.permute.xlu1 %688 }
 0x5d4   :  { %3586 = vtanh.f32 %v4255_v27  ;;  %v4259_v37 = vadd.f32 %v689_v35, %v681_v29 }
 0x5d6   :  { %3588 = vtanh.f32 %v4259_v37 }
 0x5e1   :  { %v3587_v43 = vpop.eup %3586 }
 0x5e2   :  { %670 = vrot.lane.b32.xlu0 %v3587_v43, %s3858_s4 }
 0x5e3   :  { %v3589_v47 = vpop.eup %3588 }
 0x5e4   :  { %694 = vrot.lane.b32.xlu1 %v3589_v47, %s3858_s4 }
 0x654   :  { %v671_v53 = vpop.permute.xlu0 %670 }
 0x655   :  { %v673_v23 = vmul.f32 %v3583_v18, %v671_v53 }
 0x656   :  { %v695_v59 = vpop.permute.xlu1 %694 }
 0x657   :  { %699 = vrot.lane.b32.xlu0 %v673_v23, %s3859_s21  ;;  %v4265_v60 = vmul.f32 %v3585_v16, %v695_v59 }
 0x659   :  { %708 = vrot.lane.b32.xlu1 %v4265_v60, %s3860_s22 }
 0x6c9   :  { %v700_v32 = vpop.permute.xlu0 %699 }
 0x6ca   :  { %702 = vst.msk [vmem:[#allocation3 + $0x8] sm:$0xff] %vm261_vm10, %v700_v32 }
 0x6cb   :  { %v709_v61 = vpop.permute.xlu1 %708 }
 0x6cc   :  { %v711_v62 = vsel %vm261_vm10, %v700_v32, %v709_v61 }
 0x6cd   :  { %3400 = vmatmul.mubr.msk.f32.vlgmr.msra.gmra.mxu0 %vm431_vm11, %v711_v62 }
 0x6ce   :  { %1012 = vmatpush1.msra.mxu0 %v4009_v31  ;;  %1059 = vmatprep.mubr.f32.mxu0 %v3857_v7 }
 0x6cf   :  { %1013 = vmatprep.subr.mxu0 %v4015_v33 }
 0x6d0   :  { %1014 = vmatpush1.msra.mxu0 %v4021_v34 }
 0x6d1   :  { %1015 = vmatprep.subr.mxu0 %v4029_v38 }
 0x6d2   :  { %1016 = vmatpush1.msra.mxu0 %v4035_v39 }
 0x6d3   :  { %1017 = vmatprep.subr.mxu0 %v4042_v41 }
 0x6d4   :  { %1018 = vmatpush1.msra.mxu0 %v4049_v42 }
 0x6d5   :  { %1019 = vmatprep.subr.mxu0 %v4056_v45 }
 0x6d6   :  { %1020 = vmatpush1.msra.mxu0 %v4062_v46 }
 0x6d7   :  { %1021 = vmatprep.subr.mxu0 %v4070_v49 }
 0x6d8   :  { %1022 = vmatpush1.msra.mxu0 %v4086_v52 }
 0x6d9   :  { %1023 = vmatprep.subr.mxu0 %v4095_v54 }
 0x6da   :  { %1024 = vmatpush1.msra.mxu0 %v4104_v56 }
 0x6db   :  { %1025 = vmatprep.subr.mxu0 %v4110_v57 }
 0x6dc   :  { %1026 = vmatpush1.msra.mxu0 %v4116_v58 }
 0x6dd   :  { %1291 = vmatprep.subr.mxu0 %v3984_v17 }
 0x78d   :  { %v781_v63 = vpop.f32.mrf.mxu0 }
 0x78e   :  { %v788_v0 = vadd.f32 %v781_v63, %v4189_v22 }
 0x78f   :  { %v783_v1 = vpop.f32.mrf.mxu0 }
 0x790   :  { %3590 = vtanh.f32 %v788_v0  ;;  %v789_v2 = vadd.f32 %v783_v1, %v4204_v44  ;;  %v3401_v11 = vmul.f32 -1.442695, %v788_v0 }
 0x792   :  { %3592 = vtanh.f32 %v789_v2  ;;  %v3402_v12 = vmul.f32 -1.442695, %v789_v2 }
 0x793   :  { %3594 = vpow2.f32 %v3401_v11 }
 0x794   :  { %3596 = vpow2.f32 %v3402_v12 }
 0x79d   :  { %v3591_v5 = vpop.eup %3590 }
 0x79e   :  { %799 = vrot.lane.b32.xlu0 %v3591_v5, %s3858_s4 }
 0x79f   :  { %v3593_v10 = vpop.eup %3592 }
 0x7a0   :  { %823 = vrot.lane.b32.xlu1 %v3593_v10, %s3858_s4  ;;  %v3595_v8 = vpop.eup %3594 }
 0x7a1   :  { %v3597_v9 = vpop.eup %3596  ;;  %v793_v18 = vadd.f32 1.0, %v3595_v8 }
 0x7a2   :  { %v817_v13 = vadd.f32 1.0, %v3597_v9 }
 0x7a3   :  { %3598 = vrcp.f32 %v793_v18 }
 0x7a4   :  { %3600 = vrcp.f32 %v817_v13 }
 0x7b0   :  { %v3599_v22 = vpop.eup %3598 }
 0x7b1   :  { %v3601_v16 = vpop.eup %3600  ;;  %v797_v21 = vmul.f32 %v3599_v22, %v4255_v27 }
 0x7b2   :  { %v821_v35 = vmul.f32 %v3601_v16, %v4259_v37 }
 0x810   :  { %v800_v51 = vpop.permute.xlu0 %799 }
 0x811   :  { %v802_v44 = vmul.f32 %v3599_v22, %v800_v51 }
 0x812   :  { %v824_v19 = vpop.permute.xlu1 %823 }
 0x813   :  { %804 = vrot.lane.b32.xlu0 %v802_v44, %s3858_s4  ;;  %v826_v15 = vmul.f32 %v3601_v16, %v824_v19 }
 0x815   :  { %828 = vrot.lane.b32.xlu1 %v826_v15, %s3858_s4 }
 0x885   :  { %v805_v25 = vpop.permute.xlu0 %804 }
 0x886   :  { %v4296_v29 = vadd.f32 %v805_v25, %v797_v21 }
 0x887   :  { %v829_v43 = vpop.permute.xlu1 %828 }
 0x888   :  { %3602 = vtanh.f32 %v4296_v29  ;;  %v4300_v47 = vadd.f32 %v829_v43, %v821_v35 }
 0x88a   :  { %3604 = vtanh.f32 %v4300_v47 }
 0x895   :  { %v3603_v53 = vpop.eup %3602 }
 0x896   :  { %810 = vrot.lane.b32.xlu0 %v3603_v53, %s3858_s4 }
 0x897   :  { %v3605_v23 = vpop.eup %3604 }
 0x898   :  { %834 = vrot.lane.b32.xlu1 %v3605_v23, %s3858_s4 }
 0x908   :  { %v811_v59 = vpop.permute.xlu0 %810 }
 0x909   :  { %v813_v27 = vmul.f32 %v3599_v22, %v811_v59 }
 0x90a   :  { %v835_v32 = vpop.permute.xlu1 %834 }
 0x90b   :  { %839 = vrot.lane.b32.xlu0 %v813_v27, %s3859_s21  ;;  %v4306_v61 = vmul.f32 %v3601_v16, %v835_v32 }
 0x90d   :  { %848 = vrot.lane.b32.xlu1 %v4306_v61, %s3860_s22 }
 0x97d   :  { %v840_v37 = vpop.permute.xlu0 %839 }
 0x97e   :  { %842 = vst.msk [vmem:[#allocation3 + $0x10] sm:$0xff] %vm261_vm10, %v840_v37 }
 0x97f   :  { %v849_v62 = vpop.permute.xlu1 %848 }
 0x980   :  { %v851_v63 = vsel %vm261_vm10, %v840_v37, %v849_v62 }
 0x981   :  { %3403 = vmatmul.mubr.msk.f32.vlgmr.msra.gmra.mxu1 %vm431_vm11, %v851_v63 }
 0x982   :  { %1152 = vmatpush1.msra.mxu1 %v4009_v31  ;;  %1199 = vmatprep.mubr.f32.mxu1 %v3857_v7 }
 0x983   :  { %1153 = vmatprep.subr.mxu1 %v4015_v33 }
 0x984   :  { %1154 = vmatpush1.msra.mxu1 %v4021_v34 }
 0x985   :  { %1155 = vmatprep.subr.mxu1 %v4029_v38 }
 0x986   :  { %1156 = vmatpush1.msra.mxu1 %v4035_v39 }
 0x987   :  { %1157 = vmatprep.subr.mxu1 %v4042_v41 }
 0x988   :  { %1158 = vmatpush1.msra.mxu1 %v4049_v42 }
 0x989   :  { %1159 = vmatprep.subr.mxu1 %v4056_v45 }
 0x98a   :  { %1160 = vmatpush1.msra.mxu1 %v4062_v46 }
 0x98b   :  { %1161 = vmatprep.subr.mxu1 %v4070_v49 }
 0x98c   :  { %1162 = vmatpush1.msra.mxu1 %v4086_v52 }
 0x98d   :  { %1163 = vmatprep.subr.mxu1 %v4095_v54 }
 0x98e   :  { %1164 = vmatpush1.msra.mxu1 %v4104_v56 }
 0x98f   :  { %1165 = vmatprep.subr.mxu1 %v4110_v57 }
 0x990   :  { %1166 = vmatpush1.msra.mxu1 %v4116_v58 }
 0x991   :  { %1431 = vmatprep.subr.mxu1 %v3984_v17 }
 0xa41   :  { %v921_v0 = vpop.f32.mrf.mxu1 }
 0xa42   :  { %v928_v1 = vadd.f32 %v921_v0, %v4193_v26 }
 0xa43   :  { %v923_v2 = vpop.f32.mrf.mxu1 }
 0xa44   :  { %3606 = vtanh.f32 %v928_v1  ;;  %v929_v5 = vadd.f32 %v923_v2, %v4199_v36  ;;  %v3404_v12 = vmul.f32 -1.442695, %v928_v1 }
 0xa46   :  { %3608 = vtanh.f32 %v929_v5  ;;  %v3405_v8 = vmul.f32 -1.442695, %v929_v5 }
 0xa47   :  { %3610 = vpow2.f32 %v3404_v12 }
 0xa48   :  { %3612 = vpow2.f32 %v3405_v8 }
 0xa51   :  { %v3607_v10 = vpop.eup %3606 }
 0xa52   :  { %939 = vrot.lane.b32.xlu0 %v3607_v10, %s3858_s4 }
 0xa53   :  { %v3609_v11 = vpop.eup %3608 }
 0xa54   :  { %963 = vrot.lane.b32.xlu1 %v3609_v11, %s3858_s4  ;;  %v3611_v9 = vpop.eup %3610 }
 0xa55   :  { %v3613_v17 = vpop.eup %3612  ;;  %v933_v18 = vadd.f32 1.0, %v3611_v9 }
 0xa56   :  { %v957_v13 = vadd.f32 1.0, %v3613_v17 }
 0xa57   :  { %3614 = vrcp.f32 %v933_v18 }
 0xa58   :  { %3616 = vrcp.f32 %v957_v13 }
 0xa64   :  { %v3615_v26 = vpop.eup %3614 }
 0xa65   :  { %v3617_v51 = vpop.eup %3616  ;;  %v937_v19 = vmul.f32 %v3615_v26, %v4296_v29 }
 0xa66   :  { %v961_v25 = vmul.f32 %v3617_v51, %v4300_v47 }
 0xac4   :  { %v940_v22 = vpop.permute.xlu0 %939 }
 0xac5   :  { %v942_v36 = vmul.f32 %v3615_v26, %v940_v22 }
 0xac6   :  { %v964_v44 = vpop.permute.xlu1 %963 }
 0xac7   :  { %944 = vrot.lane.b32.xlu0 %v942_v36, %s3858_s4  ;;  %v966_v16 = vmul.f32 %v3617_v51, %v964_v44 }
 0xac9   :  { %968 = vrot.lane.b32.xlu1 %v966_v16, %s3858_s4 }
 0xb39   :  { %v945_v15 = vpop.permute.xlu0 %944 }
 0xb3a   :  { %v4337_v21 = vadd.f32 %v945_v15, %v937_v19 }
 0xb3b   :  { %v969_v35 = vpop.permute.xlu1 %968 }
 0xb3c   :  { %3618 = vtanh.f32 %v4337_v21  ;;  %v4341_v43 = vadd.f32 %v969_v35, %v961_v25 }
 0xb3e   :  { %3620 = vtanh.f32 %v4341_v43 }
 0xb49   :  { %v3619_v53 = vpop.eup %3618 }
 0xb4a   :  { %950 = vrot.lane.b32.xlu0 %v3619_v53, %s3858_s4 }
 0xb4b   :  { %v3621_v23 = vpop.eup %3620 }
 0xb4c   :  { %974 = vrot.lane.b32.xlu1 %v3621_v23, %s3858_s4 }
 0xbbc   :  { %v951_v59 = vpop.permute.xlu0 %950 }
 0xbbd   :  { %v953_v29 = vmul.f32 %v3615_v26, %v951_v59 }
 0xbbe   :  { %v975_v27 = vpop.permute.xlu1 %974 }
 0xbbf   :  { %979 = vrot.lane.b32.xlu0 %v953_v29, %s3859_s21  ;;  %v4347_v32 = vmul.f32 %v3617_v51, %v975_v27 }
 0xbc1   :  { %988 = vrot.lane.b32.xlu1 %v4347_v32, %s3860_s22 }
 0xc31   :  { %v980_v47 = vpop.permute.xlu0 %979 }
 0xc32   :  { %982 = vst.msk [vmem:[#allocation3 + $0x18] sm:$0xff] %vm261_vm10, %v980_v47 }
 0xc33   :  { %v989_v37 = vpop.permute.xlu1 %988 }
 0xc34   :  { %v991_v62 = vsel %vm261_vm10, %v980_v47, %v989_v37 }
 0xc35   :  { %3406 = vmatmul.mubr.msk.f32.vlgmr.msra.gmra.mxu0 %vm431_vm11, %v991_v62 }
 0xc36   :  { %1292 = vmatpush1.msra.mxu0 %v4009_v31  ;;  %1339 = vmatprep.mubr.f32.mxu0 %v3857_v7 }
 0xc37   :  { %1293 = vmatprep.subr.mxu0 %v4015_v33 }
 0xc38   :  { %1294 = vmatpush1.msra.mxu0 %v4021_v34 }
 0xc39   :  { %1295 = vmatprep.subr.mxu0 %v4029_v38 }
 0xc3a   :  { %1296 = vmatpush1.msra.mxu0 %v4035_v39 }
 0xc3b   :  { %1297 = vmatprep.subr.mxu0 %v4042_v41 }
 0xc3c   :  { %1298 = vmatpush1.msra.mxu0 %v4049_v42 }
 0xc3d   :  { %1299 = vmatprep.subr.mxu0 %v4056_v45 }
 0xc3e   :  { %1300 = vmatpush1.msra.mxu0 %v4062_v46 }
 0xc3f   :  { %1301 = vmatprep.subr.mxu0 %v4070_v49 }
 0xc40   :  { %1302 = vmatpush1.msra.mxu0 %v4086_v52 }
 0xc41   :  { %1303 = vmatprep.subr.mxu0 %v4095_v54 }
 0xc42   :  { %1304 = vmatpush1.msra.mxu0 %v4104_v56 }
 0xc43   :  { %1305 = vmatprep.subr.mxu0 %v4110_v57 }
 0xc44   :  { %1306 = vmatpush1.msra.mxu0 %v4116_v58 }
 0xcf5   :  { %v1061_v63 = vpop.f32.mrf.mxu0 }
 0xcf6   :  { %v1068_v0 = vadd.f32 %v1061_v63, %v4197_v30 }
 0xcf7   :  { %v1063_v1 = vpop.f32.mrf.mxu0 }
 0xcf8   :  { %3622 = vtanh.f32 %v1068_v0  ;;  %v1069_v2 = vadd.f32 %v1063_v1, %v4195_v28  ;;  %v3407_v11 = vmul.f32 -1.442695, %v1068_v0 }
 0xcfa   :  { %3624 = vtanh.f32 %v1069_v2  ;;  %v3408_v12 = vmul.f32 -1.442695, %v1069_v2 }
 0xcfb   :  { %3626 = vpow2.f32 %v3407_v11 }
 0xcfc   :  { %3628 = vpow2.f32 %v3408_v12 }
 0xd05   :  { %v3623_v5 = vpop.eup %3622 }
 0xd06   :  { %1079 = vrot.lane.b32.xlu0 %v3623_v5, %s3858_s4 }
 0xd07   :  { %v3625_v10 = vpop.eup %3624 }
 0xd08   :  { %1103 = vrot.lane.b32.xlu1 %v3625_v10, %s3858_s4  ;;  %v3627_v8 = vpop.eup %3626 }
 0xd09   :  { %v3629_v9 = vpop.eup %3628  ;;  %v1073_v17 = vadd.f32 1.0, %v3627_v8 }
 0xd0a   :  { %v1097_v18 = vadd.f32 1.0, %v3629_v9 }
 0xd0b   :  { %3630 = vrcp.f32 %v1073_v17 }
 0xd0c   :  { %3632 = vrcp.f32 %v1097_v18 }
 0xd18   :  { %v3631_v30 = vpop.eup %3630 }
 0xd19   :  { %v3633_v26 = vpop.eup %3632  ;;  %v1077_v51 = vmul.f32 %v3631_v30, %v4337_v21 }
 0xd1a   :  { %v1101_v19 = vmul.f32 %v3633_v26, %v4341_v43 }
 0xd78   :  { %v1080_v13 = vpop.permute.xlu0 %1079 }
 0xd79   :  { %v1082_v28 = vmul.f32 %v3631_v30, %v1080_v13 }
 0xd7a   :  { %v1104_v22 = vpop.permute.xlu1 %1103 }
 0xd7b   :  { %1084 = vrot.lane.b32.xlu0 %v1082_v28, %s3858_s4  ;;  %v1106_v36 = vmul.f32 %v3633_v26, %v1104_v22 }
 0xd7d   :  { %1108 = vrot.lane.b32.xlu1 %v1106_v36, %s3858_s4 }
 0xded   :  { %v1085_v44 = vpop.permute.xlu0 %1084 }
 0xdee   :  { %v4377_v16 = vadd.f32 %v1085_v44, %v1077_v51 }
 0xdef   :  { %v1109_v15 = vpop.permute.xlu1 %1108 }
 0xdf0   :  { %3634 = vtanh.f32 %v4377_v16  ;;  %v4381_v25 = vadd.f32 %v1109_v15, %v1101_v19 }
 0xdf2   :  { %3636 = vtanh.f32 %v4381_v25 }
 0xdfd   :  { %v3635_v35 = vpop.eup %3634 }
 0xdfe   :  { %1090 = vrot.lane.b32.xlu0 %v3635_v35, %s3858_s4 }
 0xdff   :  { %v3637_v53 = vpop.eup %3636 }
 0xe00   :  { %1114 = vrot.lane.b32.xlu1 %v3637_v53, %s3858_s4 }
 0xe70   :  { %v1091_v23 = vpop.permute.xlu0 %1090 }
 0xe71   :  { %v1093_v21 = vmul.f32 %v3631_v30, %v1091_v23 }
 0xe72   :  { %v1115_v59 = vpop.permute.xlu1 %1114 }
 0xe73   :  { %1119 = vrot.lane.b32.xlu0 %v1093_v21, %s3859_s21  ;;  %v4387_v29 = vmul.f32 %v3633_v26, %v1115_v59 }
 0xe75   :  { %1128 = vrot.lane.b32.xlu1 %v4387_v29, %s3860_s22 }
 0xee5   :  { %v1120_v43 = vpop.permute.xlu0 %1119 }
 0xee6   :  { %1122 = vst.msk [vmem:[#allocation3 + $0x20] sm:$0xff] %vm261_vm10, %v1120_v43 }
 0xee7   :  { %v1129_v27 = vpop.permute.xlu1 %1128 }
 0xee8   :  { %v1131_v47 = vsel %vm261_vm10, %v1120_v43, %v1129_v27 }
 0xee9   :  { %3409 = vmatmul.mubr.msk.f32.vlgmr.msra.gmra.mxu1 %vm431_vm11, %v1131_v47 }
 0xeea   :  { %1432 = vmatpush1.msra.mxu1 %v4009_v31  ;;  %1479 = vmatprep.mubr.f32.mxu1 %v3857_v7 }
 0xeeb   :  { %1433 = vmatprep.subr.mxu1 %v4015_v33 }
 0xeec   :  { %1434 = vmatpush1.msra.mxu1 %v4021_v34 }
 0xeed   :  { %1435 = vmatprep.subr.mxu1 %v4029_v38 }
 0xeee   :  { %1436 = vmatpush1.msra.mxu1 %v4035_v39 }
 0xeef   :  { %1437 = vmatprep.subr.mxu1 %v4042_v41 }
 0xef0   :  { %1438 = vmatpush1.msra.mxu1 %v4049_v42 }
 0xef1   :  { %1439 = vmatprep.subr.mxu1 %v4056_v45 }
 0xef2   :  { %1440 = vmatpush1.msra.mxu1 %v4062_v46 }
 0xef3   :  { %1441 = vmatprep.subr.mxu1 %v4070_v49 }
 0xef4   :  { %1442 = vmatpush1.msra.mxu1 %v4086_v52 }
 0xef5   :  { %1443 = vmatprep.subr.mxu1 %v4095_v54 }
 0xef6   :  { %1444 = vmatpush1.msra.mxu1 %v4104_v56 }
 0xef7   :  { %1445 = vmatprep.subr.mxu1 %v4110_v57 }
 0xef8   :  { %1446 = vmatpush1.msra.mxu1 %v4116_v58 }
 0xfa9   :  { %v1201_v31 = vpop.f32.mrf.mxu1 }
 0xfaa   :  { %v1208_v33 = vadd.f32 %v1201_v31, %v4202_v40 }
 0xfab   :  { %v1203_v34 = vpop.f32.mrf.mxu1 }
 0xfac   :  { %3638 = vtanh.f32 %v1208_v33  ;;  %v1209_v38 = vadd.f32 %v1203_v34, %v4191_v24  ;;  %v3410_v42 = vmul.f32 -1.442695, %v1208_v33 }
 0xfae   :  { %3640 = vtanh.f32 %v1209_v38  ;;  %v3411_v45 = vmul.f32 -1.442695, %v1209_v38 }
 0xfaf   :  { %3642 = vpow2.f32 %v3410_v42  ;;  %v1572_v42 = vld [vmem:[%s5107_s5 + $0x38] sm:$0xff] }
 0xfb0   :  { %3644 = vpow2.f32 %v3411_v45  ;;  %1774 = vmatprep.subr.mxu1 %v1572_v42 }
 0xfb9   :  { %v3639_v39 = vpop.eup %3638 }
 0xfba   :  { %1219 = vrot.lane.b32.xlu0 %v3639_v39, %s3858_s4 }
 0xfbb   :  { %v3641_v41 = vpop.eup %3640 }
 0xfbc   :  { %1243 = vrot.lane.b32.xlu1 %v3641_v41, %s3858_s4  ;;  %v3643_v46 = vpop.eup %3642 }
 0xfbd   :  { %v3645_v49 = vpop.eup %3644  ;;  %v1213_v52 = vadd.f32 1.0, %v3643_v46 }
 0xfbe   :  { %v1237_v54 = vadd.f32 1.0, %v3645_v49 }
 0xfbf   :  { %3646 = vrcp.f32 %v1213_v52 }
 0xfc0   :  { %3648 = vrcp.f32 %v1237_v54 }
 0xfcc   :  { %v3647_v56 = vpop.eup %3646 }
 0xfcd   :  { %v3649_v24 = vpop.eup %3648  ;;  %v1217_v62 = vmul.f32 %v3647_v56, %v4377_v16 }
 0xfce   :  { %v1241_v1 = vmul.f32 %v3649_v24, %v4381_v25 }
0x102c   :  { %v1220_v57 = vpop.permute.xlu0 %1219 }
0x102d   :  { %v1222_v58 = vmul.f32 %v3647_v56, %v1220_v57  ;;  %v1571_v57 = vld [vmem:[%s5107_s5 + $0x30] sm:$0xff] }
0x102e   :  { %v1244_v40 = vpop.permute.xlu1 %1243 }
0x102f   :  { %1224 = vrot.lane.b32.xlu0 %v1222_v58, %s3858_s4  ;;  %v1246_v37 = vmul.f32 %v3649_v24, %v1244_v40  ;;  %v1569_v40 = vld [vmem:[%s5107_s5 + $0x20] sm:$0xff] }
0x1031   :  { %1248 = vrot.lane.b32.xlu1 %v1246_v37, %s3858_s4  ;;  %v1568_v37 = vld [vmem:[%s5107_s5 + $0x18] sm:$0xff] }
0x10a1   :  { %v1225_v63 = vpop.permute.xlu0 %1224 }
0x10a2   :  { %v1227_v0 = vadd.f32 %v1225_v63, %v1217_v62  ;;  %v1567_v62 = vld [vmem:[%s5107_s5 + $0x10] sm:$0xff]  ;;  %v1566_v63 = vld [vmem:[%s5107_s5 + $0x8] sm:$0xff] }
0x10a3   :  { %v1249_v2 = vpop.permute.xlu1 %1248 }
0x10a4   :  { %3650 = vtanh.f32 %v1227_v0  ;;  %v1251_v5 = vadd.f32 %v1249_v2, %v1241_v1  ;;  %v1557_v1 = vld [vmem:[#allocation3] sm:$0xff]  ;;  %v1558_v2 = vld [vmem:[#allocation3 + $0x8] sm:$0xff] }
0x10a6   :  { %3652 = vtanh.f32 %v1251_v5 }
0x10b1   :  { %v3651_v10 = vpop.eup %3650 }
0x10b2   :  { %1230 = vrot.lane.b32.xlu0 %v3651_v10, %s3858_s4  ;;  %v1560_v10 = vld [vmem:[#allocation3 + $0x18] sm:$0xff] }
0x10b3   :  { %v3653_v11 = vpop.eup %3652 }
0x10b4   :  { %1254 = vrot.lane.b32.xlu1 %v3653_v11, %s3858_s4  ;;  %v1561_v11 = vld [vmem:[#allocation3 + $0x20] sm:$0xff] }
0x1124   :  { %v1231_v12 = vpop.permute.xlu0 %1230 }
0x1125   :  { %v1233_v8 = vmul.f32 %v3647_v56, %v1231_v12 }
0x1126   :  { %v1255_v9 = vpop.permute.xlu1 %1254 }
0x1127   :  { %1259 = vrot.lane.b32.xlu0 %v1233_v8, %s3859_s21  ;;  %v4421_v17 = vmul.f32 %v3649_v24, %v1255_v9  ;;  %v1570_v24 = vld [vmem:[%s5107_s5 + $0x28] sm:$0xff] }
0x1129   :  { %1268 = vrot.lane.b32.xlu1 %v4421_v17, %s3860_s22 }
0x1199   :  { %v1260_v18 = vpop.permute.xlu0 %1259 }
0x119a   :  { %1262 = vst.msk [vmem:[#allocation3 + $0x28] sm:$0xff] %vm261_vm10, %v1260_v18 }
0x119b   :  { %v1269_v30 = vpop.permute.xlu1 %1268 }
0x119c   :  { %v1271_v13 = vsel %vm261_vm10, %v1260_v18, %v1269_v30 }
0x119d   :  { %3412 = vmatmul.mubr.msk.f32.vlgmr.msra.gmra.mxu0 %vm431_vm11, %v1271_v13 }
0x119e   :  { %1677 = vmatprep.mubr.f32.mxu0 %v3857_v7 }
0x11a1   :  { %v1562_v12 = vld [vmem:[#allocation3 + $0x28] sm:$0xff] }
0x125d   :  { %v1341_v28 = vpop.f32.mrf.mxu0 }
0x125e   :  { %v1348_v26 = vadd.f32 %v1341_v28, %v4206_v48 }
0x125f   :  { %v1343_v22 = vpop.f32.mrf.mxu0 }
0x1260   :  { %3654 = vtanh.f32 %v1348_v26  ;;  %v1349_v36 = vadd.f32 %v1343_v22, %v4187_v20  ;;  %v3413_v16 = vmul.f32 -1.442695, %v1348_v26 }
0x1262   :  { %3656 = vtanh.f32 %v1349_v36  ;;  %v3414_v19 = vmul.f32 -1.442695, %v1349_v36 }
0x1263   :  { %3658 = vpow2.f32 %v3413_v16 }
0x1264   :  { %3660 = vpow2.f32 %v3414_v19 }
0x126d   :  { %v3655_v51 = vpop.eup %3654 }
0x126e   :  { %1359 = vrot.lane.b32.xlu0 %v3655_v51, %s3858_s4 }
0x126f   :  { %v3657_v44 = vpop.eup %3656 }
0x1270   :  { %1383 = vrot.lane.b32.xlu1 %v3657_v44, %s3858_s4  ;;  %v3659_v15 = vpop.eup %3658 }
0x1271   :  { %v3661_v25 = vpop.eup %3660  ;;  %v1353_v35 = vadd.f32 1.0, %v3659_v15 }
0x1272   :  { %v1377_v53 = vadd.f32 1.0, %v3661_v25 }
0x1273   :  { %3662 = vrcp.f32 %v1353_v35 }
0x1274   :  { %3664 = vrcp.f32 %v1377_v53 }
0x1280   :  { %v3663_v48 = vpop.eup %3662 }
0x1281   :  { %v3665_v21 = vpop.eup %3664  ;;  %v1357_v27 = vmul.f32 %v3663_v48, %v1227_v0  ;;  %v1565_v0 = vld [vmem:[%s5107_s5] sm:$0xff] }
0x1282   :  { %v1381_v33 = vmul.f32 %v3665_v21, %v1251_v5  ;;  %v1559_v5 = vld [vmem:[#allocation3 + $0x10] sm:$0xff] }
0x12e0   :  { %v1360_v23 = vpop.permute.xlu0 %1359 }
0x12e1   :  { %v1362_v20 = vmul.f32 %v3663_v48, %v1360_v23 }
0x12e2   :  { %v1384_v59 = vpop.permute.xlu1 %1383 }
0x12e3   :  { %1364 = vrot.lane.b32.xlu0 %v1362_v20, %s3858_s4  ;;  %v1386_v43 = vmul.f32 %v3665_v21, %v1384_v59 }
0x12e5   :  { %1388 = vrot.lane.b32.xlu1 %v1386_v43, %s3858_s4 }
0x1355   :  { %v1365_v47 = vpop.permute.xlu0 %1364 }
0x1356   :  { %v4435_v31 = vadd.f32 %v1365_v47, %v1357_v27 }
0x1357   :  { %v1389_v34 = vpop.permute.xlu1 %1388 }
0x1358   :  { %3666 = vtanh.f32 %v4435_v31  ;;  %v4438_v38 = vadd.f32 %v1389_v34, %v1381_v33  ;;  %v1587_v33 = vld [vmem:[%s5107_s5 + $0x70] sm:$0xff]  ;;  %v1586_v34 = vld [vmem:[%s5107_s5 + $0x68] sm:$0xff] }
0x135a   :  { %3668 = vtanh.f32 %v4438_v38 }
0x1365   :  { %v3667_v39 = vpop.eup %3666 }
0x1366   :  { %1370 = vrot.lane.b32.xlu0 %v3667_v39, %s3858_s4  ;;  %v1581_v39 = vld [vmem:[%s5107_s5 + $0x40] sm:$0xff] }
0x1367   :  { %v3669_v41 = vpop.eup %3668 }
0x1368   :  { %1394 = vrot.lane.b32.xlu1 %v3669_v41, %s3858_s4  ;;  %v4539_v41 = vld [vmem:[%s5108_s6 + $0x78] sm:$0xff] }
0x13d8   :  { %v1371_v45 = vpop.permute.xlu0 %1370 }
0x13d9   :  { %v1373_v46 = vmul.f32 %v3663_v48, %v1371_v45  ;;  %v4546_v45 = vld [vmem:[%s5108_s6 + $0x70] sm:$0xff] }
0x13da   :  { %v1395_v49 = vpop.permute.xlu1 %1394 }
0x13db   :  { %1399 = vrot.lane.b32.xlu0 %v1373_v46, %s3859_s21  ;;  %v4447_v52 = vmul.f32 %v3665_v21, %v1395_v49  ;;  %v4551_v46 = vld [vmem:[%s5108_s6 + $0x68] sm:$0xff] }
0x13dd   :  { %1408 = vrot.lane.b32.xlu1 %v4447_v52, %s3860_s22 }
0x144d   :  { %v1400_v54 = vpop.permute.xlu0 %1399 }
0x144e   :  { %1402 = vst.msk [vmem:[#allocation3 + $0x30] sm:$0xff] %vm261_vm10, %v1400_v54 }
0x144f   :  { %v1409_v56 = vpop.permute.xlu1 %1408 }
0x1450   :  { %v1411_v58 = vsel %vm261_vm10, %v1400_v54, %v1409_v56  ;;  %v4561_v56 = vld [vmem:[%s5108_s6 + $0x60] sm:$0xff] }
0x1451   :  { %3415 = vmatmul.mubr.msk.f32.vlgmr.msra.gmra.mxu1 %vm431_vm11, %v1411_v58 }
0x1452   :  { %1775 = vmatpush1.msra.mxu1 %v1571_v57  ;;  %1814 = vmatprep.mubr.f32.mxu1 %v3857_v7  ;;  %v4568_v57 = vld [vmem:[%s5108_s6 + $0x58] sm:$0xff] }
0x1453   :  { %1776 = vmatprep.subr.mxu1 %v1570_v24  ;;  %v4576_v24 = vld [vmem:[%s5108_s6 + $0x50] sm:$0xff] }
0x1454   :  { %1777 = vmatpush1.msra.mxu1 %v1569_v40  ;;  %v4583_v40 = vld [vmem:[%s5108_s6 + $0x48] sm:$0xff] }
0x1455   :  { %1778 = vmatprep.subr.mxu1 %v1568_v37  ;;  %v1563_v8 = vld [vmem:[#allocation3 + $0x30] sm:$0xff] }
0x1456   :  { %1779 = vmatpush1.msra.mxu1 %v1567_v62  ;;  %v4591_v62 = vld [vmem:[%s5108_s6 + $0x40] sm:$0xff] }
0x1457   :  { %1780 = vmatprep.subr.mxu1 %v1566_v63 }
0x1458   :  { %1781 = vmatpush1.msra.mxu1 %v1565_v0  ;;  %v4606_v0 = vld [vmem:[%s5108_s6 + $0x30] sm:$0xff] }
0x1459   :  { %3426 = vmatmul.mubr.msk.f32.vlgmr.msra.gmra.mxu1 %vm261_vm10, %v1557_v1  ;;  %2079 = vmatprep.subr.mxu1 %v4539_v41 }
0x145a   :  { %1820 = vmatprep.mubr.f32.mxu1 %v3857_v7  ;;  %2080 = vmatpush1.msra.mxu1 %v4546_v45 }
0x145b   :  { %2081 = vmatprep.subr.mxu1 %v4551_v46 }
0x145c   :  { %2082 = vmatpush1.msra.mxu1 %v4561_v56 }
0x145d   :  { %3427 = vmatmul.mubr.msk.f32.gmra.mxu1 %vm261_vm10, %v1558_v2  ;;  %2083 = vmatprep.subr.mxu1 %v4568_v57  ;;  %v4621_v2 = vld [vmem:[%s5108_s6 + $0x20] sm:$0xff] }
0x145e   :  { %1826 = vmatprep.mubr.f32.mxu1 %v3857_v7  ;;  %2084 = vmatpush1.msra.mxu1 %v4576_v24 }
0x145f   :  { %2085 = vmatprep.subr.mxu1 %v4583_v40 }
0x1460   :  { %2086 = vmatpush1.msra.mxu1 %v4591_v62 }
0x1461   :  { %3428 = vmatmul.mubr.msk.f32.gmra.mxu1 %vm261_vm10, %v1559_v5  ;;  %v4634_v5 = vld [vmem:[%s5108_s6 + $0x10] sm:$0xff] }
0x1462   :  { %1832 = vmatprep.mubr.f32.mxu1 %v3857_v7 }
0x1465   :  { %3429 = vmatmul.mubr.msk.f32.gmra.mxu1 %vm261_vm10, %v1560_v10  ;;  %v4639_v10 = vld [vmem:[%s5108_s6 + $0x8] sm:$0xff] }
0x1466   :  { %1838 = vmatprep.mubr.f32.mxu1 %v3857_v7 }
0x1469   :  { %3430 = vmatmul.mubr.msk.f32.gmra.mxu1 %vm261_vm10, %v1561_v11  ;;  %v4646_v11 = vld [vmem:[%s5108_s6] sm:$0xff] }
0x146a   :  { %1844 = vmatprep.mubr.f32.mxu1 %v3857_v7 }
0x146d   :  { %3431 = vmatmul.mubr.msk.f32.gmra.mxu1 %vm261_vm10, %v1562_v12 }
0x146e   :  { %1850 = vmatprep.mubr.f32.mxu1 %v3857_v7 }
0x1471   :  { %3432 = vmatmul.mubr.msk.f32.gmra.mxu1 %vm261_vm10, %v1563_v8 }
0x1472   :  { %1856 = vmatprep.mubr.f32.mxu1 %v3857_v7 }
0x1511   :  { %v1481_v9 = vpop.f32.mrf.mxu1 }
0x1512   :  { %v1488_v18 = vadd.f32 %v1481_v9, %v4210_v55 }
0x1513   :  { %v1483_v30 = vpop.f32.mrf.mxu1 }
0x1514   :  { %3670 = vtanh.f32 %v1488_v18  ;;  %v1489_v13 = vadd.f32 %v1483_v30, %v4183_v14  ;;  %v3416_v22 = vmul.f32 -1.442695, %v1488_v18 }
0x1516   :  { %3672 = vtanh.f32 %v1489_v13  ;;  %v3417_v36 = vmul.f32 -1.442695, %v1489_v13 }
0x1517   :  { %3674 = vpow2.f32 %v3416_v22 }
0x1518   :  { %3676 = vpow2.f32 %v3417_v36 }
0x1521   :  { %v3671_v28 = vpop.eup %3670 }
0x1522   :  { %1499 = vrot.lane.b32.xlu1 %v3671_v28, %s3858_s4 }
0x1523   :  { %v3673_v26 = vpop.eup %3672 }
0x1524   :  { %1523 = vrot.lane.b32.xlu0 %v3673_v26, %s3858_s4  ;;  %v3675_v51 = vpop.eup %3674 }
0x1525   :  { %v3677_v44 = vpop.eup %3676  ;;  %v1493_v16 = vadd.f32 1.0, %v3675_v51 }
0x1526   :  { %v1517_v19 = vadd.f32 1.0, %v3677_v44 }
0x1527   :  { %3678 = vrcp.f32 %v1493_v16 }
0x1528   :  { %3680 = vrcp.f32 %v1517_v19 }
0x1534   :  { %v4494_v55 = vpop.eup %3678 }
0x1535   :  { %v3681_v25 = vpop.eup %3680  ;;  %v1497_v48 = vmul.f32 %v4494_v55, %v4435_v31  ;;  %v1588_v31 = vld [vmem:[%s5107_s5 + $0x78] sm:$0xff] }
0x1536   :  { %v1521_v21 = vmul.f32 %v3681_v25, %v4438_v38  ;;  %1637 = vmatprep.subr.mxu0 %v1588_v31  ;;  %v1582_v38 = vld [vmem:[%s5107_s5 + $0x48] sm:$0xff] }
0x1537   :  { %1638 = vmatpush1.msra.mxu0 %v1587_v33 }
0x1538   :  { %1639 = vmatprep.subr.mxu0 %v1586_v34 }
0x1594   :  { %v1500_v14 = vpop.permute.xlu1 %1499 }
0x1595   :  { %v1502_v15 = vmul.f32 %v4494_v55, %v1500_v14 }
0x1596   :  { %v1524_v35 = vpop.permute.xlu0 %1523 }
0x1597   :  { %1504 = vrot.lane.b32.xlu1 %v1502_v15, %s3858_s4  ;;  %v1526_v53 = vmul.f32 %v3681_v25, %v1524_v35 }
0x1599   :  { %1528 = vrot.lane.b32.xlu0 %v1526_v53, %s3858_s4 }
0x1609   :  { %v1505_v23 = vpop.permute.xlu1 %1504 }
0x160a   :  { %v1507_v20 = vadd.f32 %v1505_v23, %v1497_v48 }
0x160b   :  { %v1529_v59 = vpop.permute.xlu0 %1528 }
0x160c   :  { %3682 = vtanh.f32 %v1507_v20  ;;  %v1531_v43 = vadd.f32 %v1529_v59, %v1521_v21  ;;  %v1863_v21 = vld [vmem:[%s5109_s7] sm:$0x3] }
0x160d   :  { %v1872_v59 = vrot.slane %v1863_v21, %v257_v6  ;;  %v1868_v34 = vrot.slane %v1863_v21, %v253_v4 }
0x160e   :  { %3684 = vtanh.f32 %v1531_v43 }
0x1619   :  { %v3683_v27 = vpop.eup %3682 }
0x161a   :  { %1510 = vrot.lane.b32.xlu1 %v3683_v27, %s3858_s4 }
0x161b   :  { %v3685_v47 = vpop.eup %3684 }
0x161c   :  { %1534 = vrot.lane.b32.xlu0 %v3685_v47, %s3858_s4 }
0x161e   :  { %1404 = vrot.lane.b32.xlu1 %v4447_v52, %s3859_s21 }
0x1622   :  { %1124 = vrot.lane.b32.xlu1 %v4387_v29, %s3859_s21  ;;  %v1585_v29 = vld [vmem:[%s5107_s5 + $0x60] sm:$0xff] }
0x1623   :  { %1640 = vmatpush1.msra.mxu0 %v1585_v29 }
0x1626   :  { %844 = vrot.lane.b32.xlu1 %v4306_v61, %s3859_s21  ;;  %v1584_v61 = vld [vmem:[%s5107_s5 + $0x58] sm:$0xff] }
0x1627   :  { %1641 = vmatprep.subr.mxu0 %v1584_v61 }
0x162a   :  { %564 = vrot.lane.b32.xlu1 %v4224_v50, %s3859_s21  ;;  %v1583_v50 = vld [vmem:[%s5107_s5 + $0x50] sm:$0xff]  ;;  %s3362_s5 = sshll.u32 %s3869_s20, 4  ;;  %s3363_s5 = int_to_ptr.vmem [resolvable:$true] %s3362_s5 }
0x162b   :  { %1642 = vmatpush1.msra.mxu0 %v1583_v50  ;;  %s3834_s1 = scalar_lea.vmem %s3363_s5, 32  ;;  %p3839_p1 = scmp.lt.s32.totalorder %s3363_s5, %s3363_s5 }
0x162c   :  { %1643 = vmatprep.subr.mxu0 %v1582_v38  ;;  %p3835_p0 = scmp.ne.s32.totalorder %s3363_s5, %s3834_s1  ;;  %p3840_p2 = scmp.lt.s32.totalorder %s3834_s1, %s3834_s1 }
0x162d   :  { %1644 = vmatpush1.msra.mxu0 %v1581_v39 }
0x162e   :  { %1939 = vmatprep.subr.mxu0 %v4539_v41  ;;  %p3841_p3 = por %p3840_p2, %p3839_p1 }
0x1630   :  { %p3842_p4 = pnand %p3841_p3, %p3835_p0 }
0x168c   :  { %v1511_v42 = vpop.permute.xlu1 %1510 }
0x168d   :  { %v1513_v1 = vmul.f32 %v4494_v55, %v1511_v42  ;;  %v1816_v55 = vpop.f32.mrf.mxu1 }
0x168e   :  { %v1535_v49 = vpop.permute.xlu0 %1534 }
0x168f   :  { %v4555_v52 = vmul.f32 %v3681_v25, %v1535_v49  ;;  %v1818_v14 = vpop.f32.mrf.mxu1 }
0x1690   :  { %v1405_v54 = vpop.permute.xlu1 %1404 }
0x1691   :  { %1407 = vst.msk [vmem:[#allocation4 + $0x8] sm:$0xff] %vm261_vm10, %v1405_v54  ;;  %1544 = vrot.lane.b32.xlu0 %v4555_v52, %s3859_s21  ;;  %v1822_v15 = vpop.f32.mrf.mxu1 }
0x1693   :  { %v1824_v25 = vpop.f32.mrf.mxu1 }
0x1694   :  { %v1125_v58 = vpop.permute.xlu1 %1124 }
0x1695   :  { %1127 = vst.msk [vmem:[#allocation4 + $0x18] sm:$0xff] %vm261_vm10, %v1125_v58  ;;  %1264 = vrot.lane.b32.xlu0 %v4421_v17, %s3859_s21  ;;  %v4598_v17 = vld [vmem:[%s5108_s6 + $0x38] sm:$0xff]  ;;  %v1828_v35 = vpop.f32.mrf.mxu1 }
0x1696   :  { %2087 = vmatprep.subr.mxu1 %v4598_v17 }
0x1697   :  { %2088 = vmatpush1.msra.mxu1 %v4606_v0  ;;  %v1830_v53 = vpop.f32.mrf.mxu1 }
0x1698   :  { %v845_v37 = vpop.permute.xlu1 %844  ;;  %v1574_v13 = vld [vmem:[#allocation4 + $0x8] sm:$0xff] }
0x1699   :  { %847 = vst.msk [vmem:[#allocation4 + $0x28] sm:$0xff] %vm261_vm10, %v845_v37  ;;  %984 = vrot.lane.b32.xlu0 %v4347_v32, %s3859_s21  ;;  %v4613_v32 = vld [vmem:[%s5108_s6 + $0x28] sm:$0xff]  ;;  %v1834_v48 = vpop.f32.mrf.mxu1 }
0x169a   :  { %2089 = vmatprep.subr.mxu1 %v4613_v32 }
0x169b   :  { %2090 = vmatpush1.msra.mxu1 %v4621_v2  ;;  %v1836_v23 = vpop.f32.mrf.mxu1 }
0x169c   :  { %v565_v63 = vpop.permute.xlu1 %564  ;;  %v1576_v22 = vld [vmem:[#allocation4 + $0x18] sm:$0xff] }
0x169d   :  { %567 = vst.msk [vmem:[#allocation4 + $0x38] sm:$0xff] %vm261_vm10, %v565_v63  ;;  %704 = vrot.lane.b32.xlu0 %v4265_v60, %s3859_s21  ;;  %v4627_v60 = vld [vmem:[%s5108_s6 + $0x18] sm:$0xff]  ;;  %v1840_v47 = vpop.f32.mrf.mxu1 }
0x169e   :  { %2091 = vmatprep.subr.mxu1 %v4627_v60 }
0x169f   :  { %2092 = vmatpush1.msra.mxu1 %v4634_v5  ;;  %v1842_v39 = vpop.f32.mrf.mxu1 }
0x16a0   :  { %2093 = vmatprep.subr.mxu1 %v4639_v10  ;;  %v1578_v44 = vld [vmem:[#allocation4 + $0x28] sm:$0xff] }
0x16a1   :  { %1539 = vrot.lane.b32.xlu0 %v1513_v1, %s3859_s21  ;;  %2094 = vmatpush1.msra.mxu1 %v4646_v11  ;;  %v1846_v63 = vpop.f32.mrf.mxu1 }
0x16a2   :  { %2359 = vmatprep.subr.mxu1 %v4539_v41 }
0x16a4   :  { %v1580_v19 = vld [vmem:[#allocation4 + $0x38] sm:$0xff] }
0x1703   :  { %v1545_v12 = vpop.permute.xlu0 %1544 }
0x1704   :  { %1547 = vst.msk [vmem:[#allocation4] sm:$0xff] %vm261_vm10, %v1545_v12 }
0x1707   :  { %v1265_v8 = vpop.permute.xlu0 %1264 }
0x1708   :  { %1267 = vst.msk [vmem:[#allocation4 + $0x10] sm:$0xff] %vm261_vm10, %v1265_v8 }
0x170b   :  { %v985_v9 = vpop.permute.xlu0 %984  ;;  %v1573_v18 = vld [vmem:[#allocation4] sm:$0xff] }
0x170c   :  { %987 = vst.msk [vmem:[#allocation4 + $0x20] sm:$0xff] %vm261_vm10, %v985_v9  ;;  %3418 = vmatmul.mubr.msk.f32.vlgmr.msra.gmra.mxu0 %vm261_vm10, %v1573_v18  ;;  %v1848_v18 = vpop.f32.mrf.mxu1 }
0x170d   :  { %1940 = vmatpush1.msra.mxu0 %v4546_v45  ;;  %1683 = vmatprep.mubr.f32.mxu0 %v3857_v7 }
0x170e   :  { %1941 = vmatprep.subr.mxu0 %v4551_v46 }
0x170f   :  { %v705_v30 = vpop.permute.xlu0 %704  ;;  %1942 = vmatpush1.msra.mxu0 %v4561_v56  ;;  %v1575_v26 = vld [vmem:[#allocation4 + $0x10] sm:$0xff] }
0x1710   :  { %707 = vst.msk [vmem:[#allocation4 + $0x30] sm:$0xff] %vm261_vm10, %v705_v30  ;;  %3419 = vmatmul.mubr.msk.f32.gmra.mxu0 %vm261_vm10, %v1574_v13  ;;  %1943 = vmatprep.subr.mxu0 %v4568_v57 }
0x1711   :  { %1689 = vmatprep.mubr.f32.mxu0 %v3857_v7  ;;  %1944 = vmatpush1.msra.mxu0 %v4576_v24 }
0x1712   :  { %1945 = vmatprep.subr.mxu0 %v4583_v40 }
0x1713   :  { %v4664_v28 = vpop.permute.xlu0 %1539  ;;  %1946 = vmatpush1.msra.mxu0 %v4591_v62  ;;  %v1577_v36 = vld [vmem:[#allocation4 + $0x20] sm:$0xff] }
0x1714   :  { %1542 = vst.msk [vmem:[#allocation3 + $0x38] sm:$0xff] %vm261_vm10, %v4664_v28  ;;  %3420 = vmatmul.mubr.msk.f32.gmra.mxu0 %vm261_vm10, %v1575_v26  ;;  %1947 = vmatprep.subr.mxu0 %v4598_v17 }
0x1715   :  { %1695 = vmatprep.mubr.f32.mxu0 %v3857_v7  ;;  %1948 = vmatpush1.msra.mxu0 %v4606_v0 }
0x1716   :  { %1949 = vmatprep.subr.mxu0 %v4613_v32 }
0x1717   :  { %1950 = vmatpush1.msra.mxu0 %v4621_v2  ;;  %v1579_v16 = vld [vmem:[#allocation4 + $0x30] sm:$0xff] }
0x1718   :  { %3421 = vmatmul.mubr.msk.f32.gmra.mxu0 %vm261_vm10, %v1576_v22  ;;  %1951 = vmatprep.subr.mxu0 %v4627_v60 }
0x1719   :  { %1701 = vmatprep.mubr.f32.mxu0 %v3857_v7  ;;  %1952 = vmatpush1.msra.mxu0 %v4634_v5 }
0x171a   :  { %1953 = vmatprep.subr.mxu0 %v4639_v10 }
0x171b   :  { %v1564_v51 = vld [vmem:[#allocation3 + $0x38] sm:$0xff]  ;;  %1954 = vmatpush1.msra.mxu0 %v4646_v11 }
0x171c   :  { %3422 = vmatmul.mubr.msk.f32.gmra.mxu0 %vm261_vm10, %v1577_v36  ;;  %3433 = vmatmul.mubr.msk.f32.gmra.mxu1 %vm261_vm10, %v1564_v51 }
0x171d   :  { %1707 = vmatprep.mubr.f32.mxu0 %v3857_v7  ;;  %2127 = vmatprep.mubr.f32.mxu1 %v3857_v7 }
0x171e   :  { %2219 = vmatprep.subr.mxu0 %v4539_v41 }
0x1720   :  { %3423 = vmatmul.mubr.msk.f32.gmra.mxu0 %vm261_vm10, %v1578_v44  ;;  %v1852_v44 = vpop.f32.mrf.mxu1 }
0x1721   :  { %1713 = vmatprep.mubr.f32.mxu0 %v3857_v7 }
0x1724   :  { %3424 = vmatmul.mubr.msk.f32.gmra.mxu0 %vm261_vm10, %v1579_v16 }
0x1725   :  { %1719 = vmatprep.mubr.f32.mxu0 %v3857_v7 }
0x1728   :  { %3425 = vmatmul.mubr.msk.f32.gmra.mxu0 %vm261_vm10, %v1580_v19 }
0x1729   :  { %1987 = vmatprep.mubr.f32.mxu0 %v3857_v7 }
0x172c   :  { %1988 = vmatmul.mubr.f32.vlgmr.msra.gmra.mxu0 %v3857_v7 }
0x172d   :  { %2220 = vmatpush1.msra.mxu0 %v4546_v45  ;;  %2267 = vmatprep.mubr.f32.mxu0 %v3857_v7 }
0x172e   :  { %2221 = vmatprep.subr.mxu0 %v4551_v46 }
0x172f   :  { %2222 = vmatpush1.msra.mxu0 %v4561_v56 }
0x1730   :  { %2223 = vmatprep.subr.mxu0 %v4568_v57 }
0x1731   :  { %2224 = vmatpush1.msra.mxu0 %v4576_v24 }
0x1732   :  { %2225 = vmatprep.subr.mxu0 %v4583_v40 }
0x1733   :  { %2226 = vmatpush1.msra.mxu0 %v4591_v62 }
0x1734   :  { %2227 = vmatprep.subr.mxu0 %v4598_v17 }
0x1735   :  { %2228 = vmatpush1.msra.mxu0 %v4606_v0 }
0x1736   :  { %2229 = vmatprep.subr.mxu0 %v4613_v32 }
0x1737   :  { %2230 = vmatpush1.msra.mxu0 %v4621_v2 }
0x1738   :  { %2231 = vmatprep.subr.mxu0 %v4627_v60 }
0x1739   :  { %2232 = vmatpush1.msra.mxu0 %v4634_v5 }
0x173a   :  { %2233 = vmatprep.subr.mxu0 %v4639_v10 }
0x173b   :  { %2234 = vmatpush1.msra.mxu0 %v4646_v11 }
0x173c   :  { %2499 = vmatprep.subr.mxu0 %v4539_v41 }
0x17cc   :  { %v1679_v20 = vpop.f32.mrf.mxu0 }
0x17ce   :  { %v1681_v43 = vpop.f32.mrf.mxu0 }
0x17cf   :  { %v1819_v27 = vadd.f32 %v1818_v14, %v1681_v43 }
0x17d0   :  { %v1685_v31 = vpop.f32.mrf.mxu0 }
0x17d1   :  { %v1823_v33 = vadd.f32 %v1822_v15, %v1685_v31  ;;  %v4717_v29 = vadd.f32 %v1872_v59, %v1819_v27 }
0x17d2   :  { %v1687_v61 = vpop.f32.mrf.mxu0 }
0x17d3   :  { %v1825_v50 = vadd.f32 %v1824_v25, %v1687_v61  ;;  %v4719_v38 = vadd.f32 %v1868_v34, %v1823_v33 }
0x17d4   :  { %v1691_v42 = vpop.f32.mrf.mxu0 }
0x17d5   :  { %v1829_v49 = vadd.f32 %v1828_v35, %v1691_v42  ;;  %v4721_v54 = vadd.f32 %v1872_v59, %v1825_v50 }
0x17d6   :  { %v1693_v6 = vpop.f32.mrf.mxu0 }
0x17d7   :  { %v1831_v58 = vadd.f32 %v1830_v53, %v1693_v6  ;;  %v4723_v37 = vadd.f32 %v1868_v34, %v1829_v49  ;;  %v1854_v53 = vpop.f32.mrf.mxu1 }
0x17d8   :  { %v1697_v1 = vpop.f32.mrf.mxu0 }
0x17d9   :  { %v1835_v12 = vadd.f32 %v1834_v48, %v1697_v1  ;;  %v4725_v3 = vadd.f32 %v1872_v59, %v1831_v58 }
0x17da   :  { %v1699_v4 = vpop.f32.mrf.mxu0 }
0x17db   :  { %v1837_v8 = vadd.f32 %v1836_v23, %v1699_v4  ;;  %v4727_v9 = vadd.f32 %v1868_v34, %v1835_v12 }
0x17dc   :  { %v1703_v30 = vpop.f32.mrf.mxu0  ;;  %v1858_v43 = vpop.f32.mrf.mxu1 }
0x17dd   :  { %v1841_v13 = vadd.f32 %v1840_v47, %v1703_v30  ;;  %v4729_v26 = vadd.f32 %v1872_v59, %v1837_v8  ;;  %v1817_v47 = vadd.f32 %v1816_v55, %v1679_v20 }
0x17de   :  { %v1705_v22 = vpop.f32.mrf.mxu0  ;;  %v1860_v42 = vpop.f32.mrf.mxu1 }
0x17df   :  { %v1843_v36 = vadd.f32 %v1842_v39, %v1705_v22  ;;  %v4731_v51 = vadd.f32 %v1868_v34, %v1841_v13  ;;  %v1875_v58 = vadd.f32 %v1868_v34, %v1817_v47 }
0x17e0   :  { %v1709_v16 = vpop.f32.mrf.mxu0 }
0x17e1   :  { %v1847_v19 = vadd.f32 %v1846_v63, %v1709_v16  ;;  %v4733_v14 = vadd.f32 %v1872_v59, %v1843_v36 }
0x17e2   :  { %v1711_v15 = vpop.f32.mrf.mxu0 }
0x17e3   :  { %v1849_v25 = vadd.f32 %v1848_v18, %v1711_v15  ;;  %v4735_v35 = vadd.f32 %v1868_v34, %v1847_v19 }
0x17e4   :  { %v1715_v48 = vpop.f32.mrf.mxu0 }
0x17e5   :  { %v1853_v23 = vadd.f32 %v1852_v44, %v1715_v48  ;;  %v4737_v21 = vadd.f32 %v1872_v59, %v1849_v25 }
0x17e6   :  { %v1717_v27 = vpop.f32.mrf.mxu0 }
0x17e7   :  { %v1855_v31 = vadd.f32 %v1854_v53, %v1717_v27  ;;  %v4739_v33 = vadd.f32 %v1868_v34, %v1853_v23 }
0x17e8   :  { %v1721_v61 = vpop.f32.mrf.mxu0 }
0x17e9   :  { %v1859_v50 = vadd.f32 %v1858_v43, %v1721_v61  ;;  %v4741_v39 = vadd.f32 %v1872_v59, %v1855_v31 }
0x17ea   :  { %v1723_v49 = vpop.f32.mrf.mxu0 }
0x17eb   :  { %v1861_v6 = vadd.f32 %v1860_v42, %v1723_v49  ;;  %v4743_v63 = vadd.f32 %v1868_v34, %v1859_v50 }
0x17ec   :  { %v1989_v1 = vpop.f32.mrf.mxu0 }
0x17ed   :  { %v1996_v12 = vadd.f32 %v1989_v1, %v1875_v58  ;;  %v1890_v4 = vadd.f32 %v1872_v59, %v1861_v6 }
0x17ee   :  { %v1991_v8 = vpop.f32.mrf.mxu0 }
0x17ef   :  { %3686 = vtanh.f32 %v1996_v12  ;;  %v1997_v18 = vadd.f32 %v1991_v8, %v1890_v4  ;;  %v3434_v30 = vmul.f32 -1.442695, %v1996_v12 }
0x17f1   :  { %3688 = vtanh.f32 %v1997_v18  ;;  %v3435_v13 = vmul.f32 -1.442695, %v1997_v18 }
0x17f2   :  { %3690 = vpow2.f32 %v3434_v30 }
0x17f3   :  { %3692 = vpow2.f32 %v3435_v13 }
0x17fc   :  { %v3687_v55 = vpop.eup %3686 }
0x17fd   :  { %2007 = vrot.lane.b32.xlu1 %v3687_v55, %s3858_s4 }
0x17fe   :  { %v3689_v20 = vpop.eup %3688 }
0x17ff   :  { %2031 = vrot.lane.b32.xlu0 %v3689_v20, %s3858_s4  ;;  %v3691_v22 = vpop.eup %3690 }
0x1800   :  { %v3693_v34 = vpop.eup %3692  ;;  %v2001_v36 = vadd.f32 1.0, %v3691_v22 }
0x1801   :  { %v2025_v44 = vadd.f32 1.0, %v3693_v34 }
0x1802   :  { %3694 = vrcp.f32 %v2001_v36 }
0x1803   :  { %3696 = vrcp.f32 %v2025_v44 }
0x180f   :  { %v3695_v59 = vpop.eup %3694 }
0x1810   :  { %v3697_v15 = vpop.eup %3696  ;;  %v2005_v48 = vmul.f32 0.0, %v3695_v59 }
0x1811   :  { %v2029_v27 = vmul.f32 0.0, %v3697_v15 }
0x186f   :  { %v2008_v16 = vpop.permute.xlu1 %2007 }
0x1870   :  { %v2010_v19 = vmul.f32 %v3695_v59, %v2008_v16 }
0x1871   :  { %v2032_v25 = vpop.permute.xlu0 %2031 }
0x1872   :  { %2012 = vrot.lane.b32.xlu1 %v2010_v19, %s3858_s4  ;;  %v2034_v53 = vmul.f32 %v3697_v15, %v2032_v25 }
0x1874   :  { %2036 = vrot.lane.b32.xlu0 %v2034_v53, %s3858_s4 }
0x18e4   :  { %v2013_v23 = vpop.permute.xlu1 %2012 }
0x18e5   :  { %v4749_v43 = vadd.f32 %v2013_v23, %v2005_v48 }
0x18e6   :  { %v2037_v47 = vpop.permute.xlu0 %2036 }
0x18e7   :  { %3698 = vtanh.f32 %v4749_v43  ;;  %v4752_v31 = vadd.f32 %v2037_v47, %v2029_v27 }
0x18e9   :  { %3700 = vtanh.f32 %v4752_v31 }
0x18f4   :  { %v3699_v61 = vpop.eup %3698 }
0x18f5   :  { %2018 = vrot.lane.b32.xlu1 %v3699_v61, %s3858_s4 }
0x18f6   :  { %v3701_v50 = vpop.eup %3700 }
0x18f7   :  { %2042 = vrot.lane.b32.xlu0 %v3701_v50, %s3858_s4 }
0x1967   :  { %v2019_v42 = vpop.permute.xlu1 %2018 }
0x1968   :  { %v2021_v49 = vmul.f32 %v3695_v59, %v2019_v42 }
0x1969   :  { %v2043_v6 = vpop.permute.xlu0 %2042 }
0x196a   :  { %2047 = vrot.lane.b32.xlu1 %v2021_v49, %s3859_s21  ;;  %v4758_v58 = vmul.f32 %v3697_v15, %v2043_v6 }
0x196c   :  { %2056 = vrot.lane.b32.xlu0 %v4758_v58, %s3860_s22 }
0x19dc   :  { %v2048_v1 = vpop.permute.xlu1 %2047 }
0x19dd   :  { %2050 = vst.msk [vmem:[#allocation5] sm:$0xff] %vm261_vm10, %v2048_v1 }
0x19de   :  { %v2057_v12 = vpop.permute.xlu0 %2056 }
0x19df   :  { %v2059_v4 = vsel %vm261_vm10, %v2048_v1, %v2057_v12 }
0x19e0   :  { %3436 = vmatmul.mubr.msk.f32.vlgmr.msra.gmra.mxu1 %vm431_vm11, %v2059_v4 }
0x19e1   :  { %2360 = vmatpush1.msra.mxu1 %v4546_v45  ;;  %2407 = vmatprep.mubr.f32.mxu1 %v3857_v7 }
0x19e2   :  { %2361 = vmatprep.subr.mxu1 %v4551_v46 }
0x19e3   :  { %2362 = vmatpush1.msra.mxu1 %v4561_v56 }
0x19e4   :  { %2363 = vmatprep.subr.mxu1 %v4568_v57 }
0x19e5   :  { %2364 = vmatpush1.msra.mxu1 %v4576_v24 }
0x19e6   :  { %2365 = vmatprep.subr.mxu1 %v4583_v40 }
0x19e7   :  { %2366 = vmatpush1.msra.mxu1 %v4591_v62 }
0x19e8   :  { %2367 = vmatprep.subr.mxu1 %v4598_v17 }
0x19e9   :  { %2368 = vmatpush1.msra.mxu1 %v4606_v0 }
0x19ea   :  { %2369 = vmatprep.subr.mxu1 %v4613_v32 }
0x19eb   :  { %2370 = vmatpush1.msra.mxu1 %v4621_v2 }
0x19ec   :  { %2371 = vmatprep.subr.mxu1 %v4627_v60 }
0x19ed   :  { %2372 = vmatpush1.msra.mxu1 %v4634_v5 }
0x19ee   :  { %2373 = vmatprep.subr.mxu1 %v4639_v10 }
0x19ef   :  { %2374 = vmatpush1.msra.mxu1 %v4646_v11 }
0x19f0   :  { %2639 = vmatprep.subr.mxu1 %v4539_v41 }
0x1aa0   :  { %v2129_v8 = vpop.f32.mrf.mxu1 }
0x1aa1   :  { %v2136_v18 = vadd.f32 %v2129_v8, %v4719_v38 }
0x1aa2   :  { %v2131_v55 = vpop.f32.mrf.mxu1 }
0x1aa3   :  { %3702 = vtanh.f32 %v2136_v18  ;;  %v2137_v20 = vadd.f32 %v2131_v55, %v4741_v39  ;;  %v3437_v22 = vmul.f32 -1.442695, %v2136_v18 }
0x1aa5   :  { %3704 = vtanh.f32 %v2137_v20  ;;  %v3438_v34 = vmul.f32 -1.442695, %v2137_v20 }
0x1aa6   :  { %3706 = vpow2.f32 %v3437_v22 }
0x1aa7   :  { %3708 = vpow2.f32 %v3438_v34 }
0x1ab0   :  { %v3703_v30 = vpop.eup %3702 }
0x1ab1   :  { %2147 = vrot.lane.b32.xlu1 %v3703_v30, %s3858_s4 }
0x1ab2   :  { %v3705_v13 = vpop.eup %3704 }
0x1ab3   :  { %2171 = vrot.lane.b32.xlu0 %v3705_v13, %s3858_s4  ;;  %v3707_v36 = vpop.eup %3706 }
0x1ab4   :  { %v3709_v44 = vpop.eup %3708  ;;  %v2141_v59 = vadd.f32 1.0, %v3707_v36 }
0x1ab5   :  { %v2165_v16 = vadd.f32 1.0, %v3709_v44 }
0x1ab6   :  { %3710 = vrcp.f32 %v2141_v59 }
0x1ab7   :  { %3712 = vrcp.f32 %v2165_v16 }
0x1ac3   :  { %v3711_v38 = vpop.eup %3710 }
0x1ac4   :  { %v3713_v15 = vpop.eup %3712  ;;  %v2145_v48 = vmul.f32 %v3711_v38, %v4749_v43 }
0x1ac5   :  { %v2169_v47 = vmul.f32 %v3713_v15, %v4752_v31 }
0x1b23   :  { %v2148_v19 = vpop.permute.xlu1 %2147 }
0x1b24   :  { %v2150_v39 = vmul.f32 %v3711_v38, %v2148_v19 }
0x1b25   :  { %v2172_v25 = vpop.permute.xlu0 %2171 }
0x1b26   :  { %2152 = vrot.lane.b32.xlu1 %v2150_v39, %s3858_s4  ;;  %v2174_v53 = vmul.f32 %v3713_v15, %v2172_v25 }
0x1b28   :  { %2176 = vrot.lane.b32.xlu0 %v2174_v53, %s3858_s4 }
0x1b98   :  { %v2153_v23 = vpop.permute.xlu1 %2152 }
0x1b99   :  { %v4789_v27 = vadd.f32 %v2153_v23, %v2145_v48 }
0x1b9a   :  { %v2177_v61 = vpop.permute.xlu0 %2176 }
0x1b9b   :  { %3714 = vtanh.f32 %v4789_v27  ;;  %v4793_v50 = vadd.f32 %v2177_v61, %v2169_v47 }
0x1b9d   :  { %3716 = vtanh.f32 %v4793_v50 }
0x1ba8   :  { %v3715_v42 = vpop.eup %3714 }
0x1ba9   :  { %2158 = vrot.lane.b32.xlu1 %v3715_v42, %s3858_s4 }
0x1baa   :  { %v3717_v49 = vpop.eup %3716 }
0x1bab   :  { %2182 = vrot.lane.b32.xlu0 %v3717_v49, %s3858_s4 }
0x1c1b   :  { %v2159_v6 = vpop.permute.xlu1 %2158 }
0x1c1c   :  { %v2161_v43 = vmul.f32 %v3711_v38, %v2159_v6 }
0x1c1d   :  { %v2183_v1 = vpop.permute.xlu0 %2182 }
0x1c1e   :  { %2187 = vrot.lane.b32.xlu1 %v2161_v43, %s3859_s21  ;;  %v4799_v12 = vmul.f32 %v3713_v15, %v2183_v1 }
0x1c20   :  { %2196 = vrot.lane.b32.xlu0 %v4799_v12, %s3860_s22 }
0x1c90   :  { %v2188_v31 = vpop.permute.xlu1 %2187 }
0x1c91   :  { %2190 = vst.msk [vmem:[#allocation5 + $0x8] sm:$0xff] %vm261_vm10, %v2188_v31 }
0x1c92   :  { %v2197_v4 = vpop.permute.xlu0 %2196 }
0x1c93   :  { %v2199_v8 = vsel %vm261_vm10, %v2188_v31, %v2197_v4 }
0x1c94   :  { %3439 = vmatmul.mubr.msk.f32.vlgmr.msra.gmra.mxu0 %vm431_vm11, %v2199_v8 }
0x1c95   :  { %2500 = vmatpush1.msra.mxu0 %v4546_v45  ;;  %2547 = vmatprep.mubr.f32.mxu0 %v3857_v7 }
0x1c96   :  { %2501 = vmatprep.subr.mxu0 %v4551_v46 }
0x1c97   :  { %2502 = vmatpush1.msra.mxu0 %v4561_v56 }
0x1c98   :  { %2503 = vmatprep.subr.mxu0 %v4568_v57 }
0x1c99   :  { %2504 = vmatpush1.msra.mxu0 %v4576_v24 }
0x1c9a   :  { %2505 = vmatprep.subr.mxu0 %v4583_v40 }
0x1c9b   :  { %2506 = vmatpush1.msra.mxu0 %v4591_v62 }
0x1c9c   :  { %2507 = vmatprep.subr.mxu0 %v4598_v17 }
0x1c9d   :  { %2508 = vmatpush1.msra.mxu0 %v4606_v0 }
0x1c9e   :  { %2509 = vmatprep.subr.mxu0 %v4613_v32 }
0x1c9f   :  { %2510 = vmatpush1.msra.mxu0 %v4621_v2 }
0x1ca0   :  { %2511 = vmatprep.subr.mxu0 %v4627_v60 }
0x1ca1   :  { %2512 = vmatpush1.msra.mxu0 %v4634_v5 }
0x1ca2   :  { %2513 = vmatprep.subr.mxu0 %v4639_v10 }
0x1ca3   :  { %2514 = vmatpush1.msra.mxu0 %v4646_v11 }
0x1ca4   :  { %2779 = vmatprep.subr.mxu0 %v4539_v41 }
0x1d54   :  { %v2269_v18 = vpop.f32.mrf.mxu0 }
0x1d55   :  { %v2276_v55 = vadd.f32 %v2269_v18, %v4723_v37 }
0x1d56   :  { %v2271_v20 = vpop.f32.mrf.mxu0 }
0x1d57   :  { %3718 = vtanh.f32 %v2276_v55  ;;  %v2277_v30 = vadd.f32 %v2271_v20, %v4737_v21  ;;  %v3440_v34 = vmul.f32 -1.442695, %v2276_v55 }
0x1d59   :  { %3720 = vtanh.f32 %v2277_v30  ;;  %v3441_v36 = vmul.f32 -1.442695, %v2277_v30 }
0x1d5a   :  { %3722 = vpow2.f32 %v3440_v34 }
0x1d5b   :  { %3724 = vpow2.f32 %v3441_v36 }
0x1d64   :  { %v3719_v13 = vpop.eup %3718 }
0x1d65   :  { %2287 = vrot.lane.b32.xlu1 %v3719_v13, %s3858_s4 }
0x1d66   :  { %v3721_v22 = vpop.eup %3720 }
0x1d67   :  { %2311 = vrot.lane.b32.xlu0 %v3721_v22, %s3858_s4  ;;  %v3723_v44 = vpop.eup %3722 }
0x1d68   :  { %v3725_v59 = vpop.eup %3724  ;;  %v2281_v16 = vadd.f32 1.0, %v3723_v44 }
0x1d69   :  { %v2305_v38 = vadd.f32 1.0, %v3725_v59 }
0x1d6a   :  { %3726 = vrcp.f32 %v2281_v16 }
0x1d6b   :  { %3728 = vrcp.f32 %v2305_v38 }
0x1d77   :  { %v3727_v37 = vpop.eup %3726 }
0x1d78   :  { %v3729_v39 = vpop.eup %3728  ;;  %v2285_v53 = vmul.f32 %v3727_v37, %v4789_v27 }
0x1d79   :  { %v2309_v47 = vmul.f32 %v3729_v39, %v4793_v50 }
0x1dd7   :  { %v2288_v19 = vpop.permute.xlu1 %2287 }
0x1dd8   :  { %v2290_v21 = vmul.f32 %v3727_v37, %v2288_v19 }
0x1dd9   :  { %v2312_v15 = vpop.permute.xlu0 %2311 }
0x1dda   :  { %2292 = vrot.lane.b32.xlu1 %v2290_v21, %s3858_s4  ;;  %v2314_v25 = vmul.f32 %v3729_v39, %v2312_v15 }
0x1ddc   :  { %2316 = vrot.lane.b32.xlu0 %v2314_v25, %s3858_s4 }
0x1e4c   :  { %v2293_v48 = vpop.permute.xlu1 %2292 }
0x1e4d   :  { %v4830_v23 = vadd.f32 %v2293_v48, %v2285_v53 }
0x1e4e   :  { %v2317_v61 = vpop.permute.xlu0 %2316 }
0x1e4f   :  { %3730 = vtanh.f32 %v4830_v23  ;;  %v4834_v42 = vadd.f32 %v2317_v61, %v2309_v47 }
0x1e51   :  { %3732 = vtanh.f32 %v4834_v42 }
0x1e5c   :  { %v3731_v49 = vpop.eup %3730 }
0x1e5d   :  { %2298 = vrot.lane.b32.xlu1 %v3731_v49, %s3858_s4 }
0x1e5e   :  { %v3733_v6 = vpop.eup %3732 }
0x1e5f   :  { %2322 = vrot.lane.b32.xlu0 %v3733_v6, %s3858_s4 }
0x1ecf   :  { %v2299_v43 = vpop.permute.xlu1 %2298 }
0x1ed0   :  { %v2301_v27 = vmul.f32 %v3727_v37, %v2299_v43 }
0x1ed1   :  { %v2323_v1 = vpop.permute.xlu0 %2322 }
0x1ed2   :  { %2327 = vrot.lane.b32.xlu1 %v2301_v27, %s3859_s21  ;;  %v4840_v31 = vmul.f32 %v3729_v39, %v2323_v1 }
0x1ed4   :  { %2336 = vrot.lane.b32.xlu0 %v4840_v31, %s3860_s22 }
0x1f44   :  { %v2328_v50 = vpop.permute.xlu1 %2327 }
0x1f45   :  { %2330 = vst.msk [vmem:[#allocation5 + $0x10] sm:$0xff] %vm261_vm10, %v2328_v50 }
0x1f46   :  { %v2337_v4 = vpop.permute.xlu0 %2336 }
0x1f47   :  { %v2339_v8 = vsel %vm261_vm10, %v2328_v50, %v2337_v4 }
0x1f48   :  { %3442 = vmatmul.mubr.msk.f32.vlgmr.msra.gmra.mxu1 %vm431_vm11, %v2339_v8 }
0x1f49   :  { %2640 = vmatpush1.msra.mxu1 %v4546_v45  ;;  %2687 = vmatprep.mubr.f32.mxu1 %v3857_v7 }
0x1f4a   :  { %2641 = vmatprep.subr.mxu1 %v4551_v46 }
0x1f4b   :  { %2642 = vmatpush1.msra.mxu1 %v4561_v56 }
0x1f4c   :  { %2643 = vmatprep.subr.mxu1 %v4568_v57 }
0x1f4d   :  { %2644 = vmatpush1.msra.mxu1 %v4576_v24 }
0x1f4e   :  { %2645 = vmatprep.subr.mxu1 %v4583_v40 }
0x1f4f   :  { %2646 = vmatpush1.msra.mxu1 %v4591_v62 }
0x1f50   :  { %2647 = vmatprep.subr.mxu1 %v4598_v17 }
0x1f51   :  { %2648 = vmatpush1.msra.mxu1 %v4606_v0 }
0x1f52   :  { %2649 = vmatprep.subr.mxu1 %v4613_v32 }
0x1f53   :  { %2650 = vmatpush1.msra.mxu1 %v4621_v2 }
0x1f54   :  { %2651 = vmatprep.subr.mxu1 %v4627_v60 }
0x1f55   :  { %2652 = vmatpush1.msra.mxu1 %v4634_v5 }
0x1f56   :  { %2653 = vmatprep.subr.mxu1 %v4639_v10 }
0x1f57   :  { %2654 = vmatpush1.msra.mxu1 %v4646_v11 }
0x1f58   :  { %2919 = vmatprep.subr.mxu1 %v4539_v41 }
0x2008   :  { %v2409_v18 = vpop.f32.mrf.mxu1 }
0x2009   :  { %v2416_v55 = vadd.f32 %v2409_v18, %v4727_v9 }
0x200a   :  { %v2411_v20 = vpop.f32.mrf.mxu1 }
0x200b   :  { %3734 = vtanh.f32 %v2416_v55  ;;  %v2417_v30 = vadd.f32 %v2411_v20, %v4733_v14  ;;  %v3443_v34 = vmul.f32 -1.442695, %v2416_v55 }
0x200d   :  { %3736 = vtanh.f32 %v2417_v30  ;;  %v3444_v36 = vmul.f32 -1.442695, %v2417_v30 }
0x200e   :  { %3738 = vpow2.f32 %v3443_v34 }
0x200f   :  { %3740 = vpow2.f32 %v3444_v36 }
0x2018   :  { %v3735_v13 = vpop.eup %3734 }
0x2019   :  { %2427 = vrot.lane.b32.xlu1 %v3735_v13, %s3858_s4 }
0x201a   :  { %v3737_v22 = vpop.eup %3736 }
0x201b   :  { %2451 = vrot.lane.b32.xlu0 %v3737_v22, %s3858_s4  ;;  %v3739_v44 = vpop.eup %3738 }
0x201c   :  { %v3741_v41 = vpop.eup %3740  ;;  %v2421_v59 = vadd.f32 1.0, %v3739_v44 }
0x201d   :  { %v2445_v16 = vadd.f32 1.0, %v3741_v41 }
0x201e   :  { %3742 = vrcp.f32 %v2421_v59 }
0x201f   :  { %3744 = vrcp.f32 %v2445_v16 }
0x202b   :  { %v3743_v9 = vpop.eup %3742 }
0x202c   :  { %v3745_v37 = vpop.eup %3744  ;;  %v2425_v39 = vmul.f32 %v3743_v9, %v4830_v23 }
0x202d   :  { %v2449_v53 = vmul.f32 %v3745_v37, %v4834_v42 }
0x208b   :  { %v2428_v38 = vpop.permute.xlu1 %2427 }
0x208c   :  { %v2430_v14 = vmul.f32 %v3743_v9, %v2428_v38 }
0x208d   :  { %v2452_v19 = vpop.permute.xlu0 %2451 }
0x208e   :  { %2432 = vrot.lane.b32.xlu1 %v2430_v14, %s3858_s4  ;;  %v2454_v21 = vmul.f32 %v3745_v37, %v2452_v19 }
0x2090   :  { %2456 = vrot.lane.b32.xlu0 %v2454_v21, %s3858_s4 }
0x2100   :  { %v2433_v15 = vpop.permute.xlu1 %2432 }
0x2101   :  { %v4871_v25 = vadd.f32 %v2433_v15, %v2425_v39 }
0x2102   :  { %v2457_v48 = vpop.permute.xlu0 %2456 }
0x2103   :  { %3746 = vtanh.f32 %v4871_v25  ;;  %v4875_v47 = vadd.f32 %v2457_v48, %v2449_v53 }
0x2105   :  { %3748 = vtanh.f32 %v4875_v47 }
0x2110   :  { %v3747_v61 = vpop.eup %3746 }
0x2111   :  { %2438 = vrot.lane.b32.xlu1 %v3747_v61, %s3858_s4 }
0x2112   :  { %v3749_v49 = vpop.eup %3748 }
0x2113   :  { %2462 = vrot.lane.b32.xlu0 %v3749_v49, %s3858_s4 }
0x2183   :  { %v2439_v6 = vpop.permute.xlu1 %2438 }
0x2184   :  { %v2441_v23 = vmul.f32 %v3743_v9, %v2439_v6 }
0x2185   :  { %v2463_v43 = vpop.permute.xlu0 %2462 }
0x2186   :  { %2467 = vrot.lane.b32.xlu1 %v2441_v23, %s3859_s21  ;;  %v4881_v27 = vmul.f32 %v3745_v37, %v2463_v43 }
0x2188   :  { %2476 = vrot.lane.b32.xlu0 %v4881_v27, %s3860_s22 }
0x21f8   :  { %v2468_v42 = vpop.permute.xlu1 %2467 }
0x21f9   :  { %2470 = vst.msk [vmem:[#allocation5 + $0x18] sm:$0xff] %vm261_vm10, %v2468_v42 }
0x21fa   :  { %v2477_v1 = vpop.permute.xlu0 %2476 }
0x21fb   :  { %v2479_v50 = vsel %vm261_vm10, %v2468_v42, %v2477_v1 }
0x21fc   :  { %3445 = vmatmul.mubr.msk.f32.vlgmr.msra.gmra.mxu0 %vm431_vm11, %v2479_v50 }
0x21fd   :  { %2780 = vmatpush1.msra.mxu0 %v4546_v45  ;;  %2827 = vmatprep.mubr.f32.mxu0 %v3857_v7 }
0x21fe   :  { %2781 = vmatprep.subr.mxu0 %v4551_v46 }
0x21ff   :  { %2782 = vmatpush1.msra.mxu0 %v4561_v56 }
0x2200   :  { %2783 = vmatprep.subr.mxu0 %v4568_v57 }
0x2201   :  { %2784 = vmatpush1.msra.mxu0 %v4576_v24 }
0x2202   :  { %2785 = vmatprep.subr.mxu0 %v4583_v40 }
0x2203   :  { %2786 = vmatpush1.msra.mxu0 %v4591_v62 }
0x2204   :  { %2787 = vmatprep.subr.mxu0 %v4598_v17 }
0x2205   :  { %2788 = vmatpush1.msra.mxu0 %v4606_v0 }
0x2206   :  { %2789 = vmatprep.subr.mxu0 %v4613_v32 }
0x2207   :  { %2790 = vmatpush1.msra.mxu0 %v4621_v2 }
0x2208   :  { %2791 = vmatprep.subr.mxu0 %v4627_v60 }
0x2209   :  { %2792 = vmatpush1.msra.mxu0 %v4634_v5 }
0x220a   :  { %2793 = vmatprep.subr.mxu0 %v4639_v10 }
0x220b   :  { %2794 = vmatpush1.msra.mxu0 %v4646_v11 }
0x220c   :  { %3512 = vmatprep.subr.mxu0 %v3857_v7 }
0x22bc   :  { %v2549_v4 = vpop.f32.mrf.mxu0 }
0x22bd   :  { %v2556_v8 = vadd.f32 %v2549_v4, %v4731_v51 }
0x22be   :  { %v2551_v18 = vpop.f32.mrf.mxu0 }
0x22bf   :  { %3750 = vtanh.f32 %v2556_v8  ;;  %v2557_v55 = vadd.f32 %v2551_v18, %v4729_v26  ;;  %v3446_v13 = vmul.f32 -1.442695, %v2556_v8 }
0x22c1   :  { %3752 = vtanh.f32 %v2557_v55  ;;  %v3447_v22 = vmul.f32 -1.442695, %v2557_v55 }
0x22c2   :  { %3754 = vpow2.f32 %v3446_v13 }
0x22c3   :  { %3756 = vpow2.f32 %v3447_v22 }
0x22cc   :  { %v3751_v20 = vpop.eup %3750 }
0x22cd   :  { %2567 = vrot.lane.b32.xlu1 %v3751_v20, %s3858_s4 }
0x22ce   :  { %v3753_v30 = vpop.eup %3752 }
0x22cf   :  { %2591 = vrot.lane.b32.xlu0 %v3753_v30, %s3858_s4  ;;  %v3755_v34 = vpop.eup %3754 }
0x22d0   :  { %v3757_v36 = vpop.eup %3756  ;;  %v2561_v44 = vadd.f32 1.0, %v3755_v34 }
0x22d1   :  { %v2585_v41 = vadd.f32 1.0, %v3757_v36 }
0x22d2   :  { %3758 = vrcp.f32 %v2561_v44 }
0x22d3   :  { %3760 = vrcp.f32 %v2585_v41 }
0x22df   :  { %v3759_v51 = vpop.eup %3758 }
0x22e0   :  { %v3761_v16 = vpop.eup %3760  ;;  %v2565_v14 = vmul.f32 %v3759_v51, %v4871_v25 }
0x22e1   :  { %v2589_v21 = vmul.f32 %v3761_v16, %v4875_v47 }
0x233f   :  { %v2568_v59 = vpop.permute.xlu1 %2567 }
0x2340   :  { %v2570_v26 = vmul.f32 %v3759_v51, %v2568_v59 }
0x2341   :  { %v2592_v9 = vpop.permute.xlu0 %2591 }
0x2342   :  { %2572 = vrot.lane.b32.xlu1 %v2570_v26, %s3858_s4  ;;  %v2594_v38 = vmul.f32 %v3761_v16, %v2592_v9 }
0x2344   :  { %2596 = vrot.lane.b32.xlu0 %v2594_v38, %s3858_s4 }
0x23b4   :  { %v2573_v37 = vpop.permute.xlu1 %2572 }
0x23b5   :  { %v4912_v19 = vadd.f32 %v2573_v37, %v2565_v14 }
0x23b6   :  { %v2597_v39 = vpop.permute.xlu0 %2596 }
0x23b7   :  { %3762 = vtanh.f32 %v4912_v19  ;;  %v4916_v15 = vadd.f32 %v2597_v39, %v2589_v21 }
0x23b9   :  { %3764 = vtanh.f32 %v4916_v15 }
0x23c4   :  { %v3763_v53 = vpop.eup %3762 }
0x23c5   :  { %2578 = vrot.lane.b32.xlu1 %v3763_v53, %s3858_s4 }
0x23c6   :  { %v3765_v48 = vpop.eup %3764 }
0x23c7   :  { %2602 = vrot.lane.b32.xlu0 %v3765_v48, %s3858_s4 }
0x2437   :  { %v2579_v61 = vpop.permute.xlu1 %2578 }
0x2438   :  { %v2581_v25 = vmul.f32 %v3759_v51, %v2579_v61 }
0x2439   :  { %v2603_v49 = vpop.permute.xlu0 %2602 }
0x243a   :  { %2607 = vrot.lane.b32.xlu1 %v2581_v25, %s3859_s21  ;;  %v4922_v6 = vmul.f32 %v3761_v16, %v2603_v49 }
0x243c   :  { %2616 = vrot.lane.b32.xlu0 %v4922_v6, %s3860_s22 }
0x24ac   :  { %v2608_v47 = vpop.permute.xlu1 %2607 }
0x24ad   :  { %2610 = vst.msk [vmem:[#allocation5 + $0x20] sm:$0xff] %vm261_vm10, %v2608_v47 }
0x24ae   :  { %v2617_v23 = vpop.permute.xlu0 %2616 }
0x24af   :  { %v2619_v43 = vsel %vm261_vm10, %v2608_v47, %v2617_v23 }
0x24b0   :  { %3448 = vmatmul.mubr.msk.f32.vlgmr.msra.gmra.mxu1 %vm431_vm11, %v2619_v43 }
0x24b1   :  { %2920 = vmatpush1.msra.mxu1 %v4546_v45  ;;  %2967 = vmatprep.mubr.f32.mxu1 %v3857_v7 }
0x24b2   :  { %2921 = vmatprep.subr.mxu1 %v4551_v46 }
0x24b3   :  { %2922 = vmatpush1.msra.mxu1 %v4561_v56 }
0x24b4   :  { %2923 = vmatprep.subr.mxu1 %v4568_v57 }
0x24b5   :  { %2924 = vmatpush1.msra.mxu1 %v4576_v24 }
0x24b6   :  { %2925 = vmatprep.subr.mxu1 %v4583_v40 }
0x24b7   :  { %2926 = vmatpush1.msra.mxu1 %v4591_v62 }
0x24b8   :  { %2927 = vmatprep.subr.mxu1 %v4598_v17 }
0x24b9   :  { %2928 = vmatpush1.msra.mxu1 %v4606_v0 }
0x24ba   :  { %2929 = vmatprep.subr.mxu1 %v4613_v32 }
0x24bb   :  { %2930 = vmatpush1.msra.mxu1 %v4621_v2 }
0x24bc   :  { %2931 = vmatprep.subr.mxu1 %v4627_v60 }
0x24bd   :  { %2932 = vmatpush1.msra.mxu1 %v4634_v5 }
0x24be   :  { %2933 = vmatprep.subr.mxu1 %v4639_v10 }
0x24bf   :  { %2934 = vmatpush1.msra.mxu1 %v4646_v11 }
0x2570   :  { %v2689_v45 = vpop.f32.mrf.mxu1 }
0x2571   :  { %v2696_v46 = vadd.f32 %v2689_v45, %v4735_v35 }
0x2572   :  { %v2691_v56 = vpop.f32.mrf.mxu1 }
0x2573   :  { %3766 = vtanh.f32 %v2696_v46  ;;  %v2697_v57 = vadd.f32 %v2691_v56, %v4725_v3  ;;  %v3449_v62 = vmul.f32 -1.442695, %v2696_v46 }
0x2575   :  { %3768 = vtanh.f32 %v2697_v57  ;;  %v3450_v17 = vmul.f32 -1.442695, %v2697_v57 }
0x2576   :  { %3770 = vpow2.f32 %v3449_v62 }
0x2577   :  { %3772 = vpow2.f32 %v3450_v17 }
0x2580   :  { %v3767_v24 = vpop.eup %3766 }
0x2581   :  { %2707 = vrot.lane.b32.xlu1 %v3767_v24, %s3858_s4 }
0x2582   :  { %v3769_v40 = vpop.eup %3768 }
0x2583   :  { %2731 = vrot.lane.b32.xlu0 %v3769_v40, %s3858_s4  ;;  %v3771_v0 = vpop.eup %3770 }
0x2584   :  { %v3773_v32 = vpop.eup %3772  ;;  %v2701_v2 = vadd.f32 1.0, %v3771_v0 }
0x2585   :  { %v2725_v60 = vadd.f32 1.0, %v3773_v32 }
0x2586   :  { %3774 = vrcp.f32 %v2701_v2 }
0x2587   :  { %3776 = vrcp.f32 %v2725_v60 }
0x2593   :  { %v3775_v5 = vpop.eup %3774 }
0x2594   :  { %v3777_v3 = vpop.eup %3776  ;;  %v2705_v1 = vmul.f32 %v3775_v5, %v4912_v19 }
0x2595   :  { %v2729_v8 = vmul.f32 %v3777_v3, %v4916_v15 }
0x25f3   :  { %v2708_v10 = vpop.permute.xlu1 %2707 }
0x25f4   :  { %v2710_v11 = vmul.f32 %v3775_v5, %v2708_v10 }
0x25f5   :  { %v2732_v35 = vpop.permute.xlu0 %2731 }
0x25f6   :  { %2712 = vrot.lane.b32.xlu1 %v2710_v11, %s3858_s4  ;;  %v2734_v42 = vmul.f32 %v3777_v3, %v2732_v35 }
0x25f8   :  { %2736 = vrot.lane.b32.xlu0 %v2734_v42, %s3858_s4 }
0x2668   :  { %v2713_v50 = vpop.permute.xlu1 %2712 }
0x2669   :  { %v2715_v4 = vadd.f32 %v2713_v50, %v2705_v1 }
0x266a   :  { %v2737_v18 = vpop.permute.xlu0 %2736 }
0x266b   :  { %3778 = vtanh.f32 %v2715_v4  ;;  %v2739_v55 = vadd.f32 %v2737_v18, %v2729_v8 }
0x266d   :  { %3780 = vtanh.f32 %v2739_v55 }
0x2678   :  { %v3779_v20 = vpop.eup %3778 }
0x2679   :  { %2718 = vrot.lane.b32.xlu1 %v3779_v20, %s3858_s4 }
0x267a   :  { %v3781_v30 = vpop.eup %3780 }
0x267b   :  { %2742 = vrot.lane.b32.xlu0 %v3781_v30, %s3858_s4 }
0x26eb   :  { %v2719_v13 = vpop.permute.xlu1 %2718 }
0x26ec   :  { %v2721_v22 = vmul.f32 %v3775_v5, %v2719_v13 }
0x26ed   :  { %v2743_v34 = vpop.permute.xlu0 %2742 }
0x26ee   :  { %2747 = vrot.lane.b32.xlu1 %v2721_v22, %s3859_s21  ;;  %v4956_v36 = vmul.f32 %v3777_v3, %v2743_v34 }
0x26f0   :  { %2756 = vrot.lane.b32.xlu0 %v4956_v36, %s3860_s22 }
0x2760   :  { %v2748_v44 = vpop.permute.xlu1 %2747 }
0x2761   :  { %2750 = vst.msk [vmem:[#allocation5 + $0x28] sm:$0xff] %vm261_vm10, %v2748_v44 }
0x2762   :  { %v2757_v41 = vpop.permute.xlu0 %2756 }
0x2763   :  { %v2759_v51 = vsel %vm261_vm10, %v2748_v44, %v2757_v41 }
0x2764   :  { %3451 = vmatmul.mubr.msk.f32.vlgmr.msra.gmra.mxu0 %vm431_vm11, %v2759_v51 }
0x2765   :  { %3520 = vmatprep.mubr.msk.f32.mxu0 %vm3861_vm12, %v3857_v7 }
0x2824   :  { %v2829_v59 = vpop.f32.mrf.mxu0 }
0x2825   :  { %v2836_v26 = vadd.f32 %v2829_v59, %v4739_v33 }
0x2826   :  { %v2831_v16 = vpop.f32.mrf.mxu0 }
0x2827   :  { %3782 = vtanh.f32 %v2836_v26  ;;  %v2837_v9 = vadd.f32 %v2831_v16, %v4721_v54  ;;  %v3452_v37 = vmul.f32 -1.442695, %v2836_v26 }
0x2829   :  { %3784 = vtanh.f32 %v2837_v9  ;;  %v3453_v19 = vmul.f32 -1.442695, %v2837_v9 }
0x282a   :  { %3786 = vpow2.f32 %v3452_v37 }
0x282b   :  { %3788 = vpow2.f32 %v3453_v19 }
0x2834   :  { %v3783_v38 = vpop.eup %3782 }
0x2835   :  { %2847 = vrot.lane.b32.xlu1 %v3783_v38, %s3858_s4 }
0x2836   :  { %v3785_v14 = vpop.eup %3784 }
0x2837   :  { %2871 = vrot.lane.b32.xlu0 %v3785_v14, %s3858_s4  ;;  %v3787_v21 = vpop.eup %3786 }
0x2838   :  { %v3789_v39 = vpop.eup %3788  ;;  %v2841_v15 = vadd.f32 1.0, %v3787_v21 }
0x2839   :  { %v2865_v53 = vadd.f32 1.0, %v3789_v39 }
0x283a   :  { %3790 = vrcp.f32 %v2841_v15  ;;  %v3081_v15 = vld [vmem:[%s5110_s8 + $0x18] sm:$0xff] }
0x283b   :  { %3792 = vrcp.f32 %v2865_v53  ;;  %3513 = vmatpush3.msra.mxu0 %v3081_v15  ;;  %v3078_v53 = vld [vmem:[%s5110_s8] sm:$0xff] }
0x283c   :  { %3514 = vmatprep.subr.mxu0 %v3857_v7 }
0x2847   :  { %v3791_v33 = vpop.eup %3790 }
0x2848   :  { %v3793_v61 = vpop.eup %3792  ;;  %v2845_v47 = vmul.f32 %v3791_v33, %v2715_v4 }
0x2849   :  { %v2869_v45 = vmul.f32 %v3793_v61, %v2739_v55 }
0x28a7   :  { %v2848_v48 = vpop.permute.xlu1 %2847 }
0x28a8   :  { %v2850_v54 = vmul.f32 %v3791_v33, %v2848_v48 }
0x28a9   :  { %v2872_v25 = vpop.permute.xlu0 %2871 }
0x28aa   :  { %2852 = vrot.lane.b32.xlu1 %v2850_v54, %s3858_s4  ;;  %v2874_v49 = vmul.f32 %v3793_v61, %v2872_v25 }
0x28ac   :  { %2876 = vrot.lane.b32.xlu0 %v2874_v49, %s3858_s4 }
0x291c   :  { %v2853_v23 = vpop.permute.xlu1 %2852 }
0x291d   :  { %v2855_v43 = vadd.f32 %v2853_v23, %v2845_v47 }
0x291e   :  { %v2877_v46 = vpop.permute.xlu0 %2876 }
0x291f   :  { %3794 = vtanh.f32 %v2855_v43  ;;  %v2879_v56 = vadd.f32 %v2877_v46, %v2869_v45 }
0x2921   :  { %3796 = vtanh.f32 %v2879_v56 }
0x292c   :  { %v3795_v57 = vpop.eup %3794 }
0x292d   :  { %2858 = vrot.lane.b32.xlu1 %v3795_v57, %s3858_s4  ;;  %v3047_v57 = vld [vmem:[#allocation5 + $0x8] sm:$0xff] }
0x292e   :  { %v3797_v24 = vpop.eup %3796 }
0x292f   :  { %2882 = vrot.lane.b32.xlu0 %v3797_v24, %s3858_s4 }
0x299f   :  { %v2859_v40 = vpop.permute.xlu1 %2858 }
0x29a0   :  { %v2861_v62 = vmul.f32 %v3791_v33, %v2859_v40  ;;  %v3046_v40 = vld [vmem:[#allocation5] sm:$0xff] }
0x29a1   :  { %v2883_v17 = vpop.permute.xlu0 %2882 }
0x29a2   :  { %2887 = vrot.lane.b32.xlu1 %v2861_v62, %s3859_s21  ;;  %v2885_v0 = vmul.f32 %v3793_v61, %v2883_v17 }
0x29a4   :  { %2896 = vrot.lane.b32.xlu0 %v2885_v0, %s3860_s22 }
0x2a14   :  { %v2888_v32 = vpop.permute.xlu1 %2887 }
0x2a15   :  { %2890 = vst.msk [vmem:[#allocation5 + $0x30] sm:$0xff] %vm261_vm10, %v2888_v32 }
0x2a16   :  { %v2897_v2 = vpop.permute.xlu0 %2896 }
0x2a17   :  { %v2899_v60 = vsel %vm261_vm10, %v2888_v32, %v2897_v2  ;;  %v3048_v32 = vld [vmem:[#allocation5 + $0x10] sm:$0xff] }
0x2a18   :  { %3454 = vmatmul.mubr.msk.f32.vlgmr.msra.gmra.mxu1 %vm431_vm11, %v2899_v60  ;;  %v3050_v60 = vld [vmem:[#allocation5 + $0x20] sm:$0xff] }
0x2ad8   :  { %v2969_v5 = vpop.f32.mrf.mxu1 }
0x2ad9   :  { %v2976_v10 = vadd.f32 %v2969_v5, %v4743_v63 }
0x2ada   :  { %v2971_v11 = vpop.f32.mrf.mxu1 }
0x2adb   :  { %3798 = vtanh.f32 %v2976_v10  ;;  %v2977_v3 = vadd.f32 %v2971_v11, %v4717_v29  ;;  %v3455_v1 = vmul.f32 -1.442695, %v2976_v10 }
0x2add   :  { %3800 = vtanh.f32 %v2977_v3  ;;  %v3456_v50 = vmul.f32 -1.442695, %v2977_v3  ;;  %v3052_v3 = vld [vmem:[#allocation5 + $0x30] sm:$0xff] }
0x2ade   :  { %3802 = vpow2.f32 %v3455_v1 }
0x2adf   :  { %3804 = vpow2.f32 %v3456_v50 }
0x2ae8   :  { %v3799_v35 = vpop.eup %3798 }
0x2ae9   :  { %2987 = vrot.lane.b32.xlu1 %v3799_v35, %s3858_s4  ;;  %v3049_v35 = vld [vmem:[#allocation5 + $0x18] sm:$0xff] }
0x2aea   :  { %v3801_v42 = vpop.eup %3800 }
0x2aeb   :  { %3011 = vrot.lane.b32.xlu0 %v3801_v42, %s3858_s4  ;;  %v3803_v4 = vpop.eup %3802 }
0x2aec   :  { %v3805_v8 = vpop.eup %3804  ;;  %v2981_v18 = vadd.f32 1.0, %v3803_v4  ;;  %v3051_v4 = vld [vmem:[#allocation5 + $0x28] sm:$0xff] }
0x2aed   :  { %v3005_v55 = vadd.f32 1.0, %v3805_v8 }
0x2aee   :  { %3806 = vrcp.f32 %v2981_v18  ;;  %v3457_v18 = vld [vmem:[%s5111_s9] ss:$0 sm:$0xff] }
0x2aef   :  { %3808 = vrcp.f32 %v3005_v55 }
0x2afb   :  { %v3807_v63 = vpop.eup %3806 }
0x2afc   :  { %v3809_v30 = vpop.eup %3808  ;;  %v2985_v34 = vmul.f32 %v3807_v63, %v2855_v43 }
0x2afd   :  { %v3009_v51 = vmul.f32 %v3809_v30, %v2879_v56 }
0x2b5b   :  { %v2988_v20 = vpop.permute.xlu1 %2987 }
0x2b5c   :  { %v2990_v29 = vmul.f32 %v3807_v63, %v2988_v20 }
0x2b5d   :  { %v3012_v13 = vpop.permute.xlu0 %3011 }
0x2b5e   :  { %2992 = vrot.lane.b32.xlu1 %v2990_v29, %s3858_s4  ;;  %v3014_v22 = vmul.f32 %v3809_v30, %v3012_v13 }
0x2b60   :  { %3016 = vrot.lane.b32.xlu0 %v3014_v22, %s3858_s4 }
0x2bd0   :  { %v2993_v44 = vpop.permute.xlu1 %2992 }
0x2bd1   :  { %v2995_v41 = vadd.f32 %v2993_v44, %v2985_v34 }
0x2bd2   :  { %v3017_v59 = vpop.permute.xlu0 %3016 }
0x2bd3   :  { %3810 = vtanh.f32 %v2995_v41  ;;  %v3019_v26 = vadd.f32 %v3017_v59, %v3009_v51 }
0x2bd5   :  { %3812 = vtanh.f32 %v3019_v26 }
0x2be0   :  { %v3811_v16 = vpop.eup %3810 }
0x2be1   :  { %2998 = vrot.lane.b32.xlu1 %v3811_v16, %s3858_s4 }
0x2be2   :  { %v3813_v9 = vpop.eup %3812 }
0x2be3   :  { %3022 = vrot.lane.b32.xlu0 %v3813_v9, %s3858_s4 }
0x2be5   :  { %1548 = vrot.lane.b32.xlu1 %v4555_v52, %s3860_s22  ;;  %v3080_v52 = vld [vmem:[%s5110_s8 + $0x10] sm:$0xff] }
0x2be6   :  { %3515 = vmatpush3.msra.mxu0 %v3080_v52 }
0x2be7   :  { %3516 = vmatprep.subr.mxu0 %v3857_v7 }
0x2c53   :  { %v2999_v38 = vpop.permute.xlu1 %2998 }
0x2c54   :  { %v3001_v14 = vmul.f32 %v3807_v63, %v2999_v38 }
0x2c55   :  { %v3023_v37 = vpop.permute.xlu0 %3022 }
0x2c56   :  { %3027 = vrot.lane.b32.xlu0 %v3001_v14, %s3859_s21  ;;  %v3025_v19 = vmul.f32 %v3809_v30, %v3023_v37 }
0x2c57   :  { %v1549_v21 = vpop.permute.xlu1 %1548 }
0x2c58   :  { %v1551_v39 = vsel %vm261_vm10, %v4664_v28, %v1549_v21  ;;  %3036 = vrot.lane.b32.xlu1 %v3025_v19, %s3860_s22  ;;  %v3079_v28 = vld [vmem:[%s5110_s8 + $0x8] sm:$0xff] }
0x2c59   :  { %3517 = vmatpush3.msra.mxu0 %v3079_v28 }
0x2c5a   :  { %1553 = vrot.lane.b32.xlu0 %v1551_v39, %s3860_s22  ;;  %3518 = vmatprep.subr.mxu0 %v3857_v7 }
0x2c5b   :  { %3519 = vmatpush3.msra.mxu0 %v3078_v53 }
0x2c5c   :  { %3523 = vmatprep.subr.mxu0 %v3857_v7 }
0x2c5e   :  { %2892 = vrot.lane.b32.xlu0 %v2885_v0, %s3859_s21 }
0x2c62   :  { %2752 = vrot.lane.b32.xlu0 %v4956_v36, %s3859_s21 }
0x2c66   :  { %2472 = vrot.lane.b32.xlu0 %v4881_v27, %s3859_s21 }
0x2c6a   :  { %2192 = vrot.lane.b32.xlu0 %v4799_v12, %s3859_s21 }
0x2cc8   :  { %v3028_v27 = vpop.permute.xlu0 %3027 }
0x2cc9   :  { %3030 = vst.msk [vmem:[#allocation5 + $0x38] sm:$0xff] %vm261_vm10, %v3028_v27 }
0x2cca   :  { %v3037_v12 = vpop.permute.xlu1 %3036 }
0x2ccb   :  { %v3039_v36 = vsel %vm261_vm10, %v3028_v27, %v3037_v12 }
0x2ccc   :  { %v1554_v33 = vpop.permute.xlu0 %1553  ;;  %3041 = vrot.lane.b32.xlu1 %v3039_v36, %s3860_s22 }
0x2ccd   :  { %v1556_v47 = vadd.f32 %v1554_v33, %v1551_v39 }
0x2cd0   :  { %v2893_v48 = vpop.permute.xlu0 %2892  ;;  %3032 = vrot.lane.b32.xlu1 %v3025_v19, %s3859_s21  ;;  %v3053_v20 = vld [vmem:[#allocation5 + $0x38] sm:$0xff] }
0x2cd1   :  { %2895 = vst.msk [vmem:[#allocation6 + $0x8] sm:$0xff] %vm261_vm10, %v2893_v48 }
0x2cd4   :  { %v2753_v54 = vpop.permute.xlu0 %2752  ;;  %2612 = vrot.lane.b32.xlu1 %v4922_v6, %s3859_s21 }
0x2cd5   :  { %2755 = vst.msk [vmem:[#allocation6 + $0x10] sm:$0xff] %vm261_vm10, %v2753_v54 }
0x2cd8   :  { %v2473_v61 = vpop.permute.xlu0 %2472  ;;  %2332 = vrot.lane.b32.xlu1 %v4840_v31, %s3859_s21  ;;  %v3055_v46 = vld [vmem:[#allocation6 + $0x8] sm:$0xff] }
0x2cd9   :  { %2475 = vst.msk [vmem:[#allocation6 + $0x20] sm:$0xff] %vm261_vm10, %v2473_v61  ;;  %v3063_v62 = vadd.f32 %v3055_v46, %v3047_v57 }
0x2cdb   :  { %3814 = vtanh.f32 %v3063_v62 }
0x2cdc   :  { %v2193_v25 = vpop.permute.xlu0 %2192  ;;  %2052 = vrot.lane.b32.xlu1 %v4758_v58, %s3859_s21  ;;  %v3056_v24 = vld [vmem:[#allocation6 + $0x10] sm:$0xff] }
0x2cdd   :  { %2195 = vst.msk [vmem:[#allocation6 + $0x30] sm:$0xff] %vm261_vm10, %v2193_v25  ;;  %v3064_v2 = vadd.f32 %v3056_v24, %v3048_v32 }
0x2ce0   :  { %v3058_v17 = vld [vmem:[#allocation6 + $0x20] sm:$0xff] }
0x2ce1   :  { %v3066_v5 = vadd.f32 %v3058_v17, %v3050_v60 }
0x2ce4   :  { %v3060_v10 = vld [vmem:[#allocation6 + $0x30] sm:$0xff] }
0x2ce5   :  { %v3068_v42 = vadd.f32 %v3060_v10, %v3052_v3 }
0x2ce8   :  { %v5040_v22 = vpop.eup %3814 }
0x2d3e   :  { %v3042_v49 = vpop.permute.xlu1 %3041 }
0x2d3f   :  { %v3044_v23 = vadd.f32 %v3042_v49, %v3039_v36 }
0x2d41   :  { %v3045_v43 = vadd.f32 %v3044_v23, %v1556_v47 }
0x2d42   :  { %v3033_v45 = vpop.permute.xlu1 %3032 }
0x2d43   :  { %3035 = vst.msk [vmem:[#allocation6] sm:$0xff] %vm261_vm10, %v3033_v45  ;;  %3521 = vmatmul.mubr.msk.f32.vlgmr.msra.gmra.mxu0 %vm261_vm10, %v3045_v43 }
0x2d44   :  { %3531 = vmatprep.mubr.msk.f32.mxu0 %vm3861_vm12, %v3857_v7 }
0x2d46   :  { %v2613_v31 = vpop.permute.xlu1 %2612 }
0x2d47   :  { %2615 = vst.msk [vmem:[#allocation6 + $0x18] sm:$0xff] %vm261_vm10, %v2613_v31 }
0x2d4a   :  { %v2333_v6 = vpop.permute.xlu1 %2332  ;;  %v3054_v56 = vld [vmem:[#allocation6] sm:$0xff] }
0x2d4b   :  { %2335 = vst.msk [vmem:[#allocation6 + $0x28] sm:$0xff] %vm261_vm10, %v2333_v6  ;;  %v3062_v0 = vadd.f32 %v3054_v56, %v3046_v40 }
0x2d4d   :  { %3816 = vtanh.f32 %v3062_v0 }
0x2d4e   :  { %v2053_v58 = vpop.permute.xlu1 %2052  ;;  %v3057_v11 = vld [vmem:[#allocation6 + $0x18] sm:$0xff]  ;;  %3818 = vtanh.f32 %v3064_v2 }
0x2d4f   :  { %2055 = vst.msk [vmem:[#allocation6 + $0x38] sm:$0xff] %vm261_vm10, %v2053_v58  ;;  %3820 = vtanh.f32 %v3066_v5  ;;  %v3065_v1 = vadd.f32 %v3057_v11, %v3049_v35  ;;  %v3862_v5 = vmov 1   ;;  %v3863_v35 = vmov 2  }
0x2d50   :  { %3822 = vtanh.f32 %v3068_v42  ;;  %3550 = vset.pattern.permute.xlu0 %v3862_v5  ;;  %v3864_v42 = vmov 7  }
0x2d51   :  { %3824 = vtanh.f32 %v3065_v1  ;;  %v3865_v1 = vmov 3  }
0x2d52   :  { %v3059_v50 = vld [vmem:[#allocation6 + $0x28] sm:$0xff] }
0x2d53   :  { %v3067_v8 = vadd.f32 %v3059_v50, %v3051_v4  ;;  %v3866_v50 = vmov 4   ;;  %v3867_v4 = vmov 5  }
0x2d55   :  { %3826 = vtanh.f32 %v3067_v8  ;;  %v3273_v8 = vld [vmem:[%s5112_s10 + $0x18] sm:$0xff] }
0x2d56   :  { %v3061_v55 = vld [vmem:[#allocation6 + $0x38] sm:$0xff]  ;;  %3524 = vmatpush3.msra.mxu0 %v3273_v8 }
0x2d57   :  { %v3069_v30 = vadd.f32 %v3061_v55, %v3053_v20  ;;  %v3868_v55 = vmov 6   ;;  %3525 = vmatprep.subr.mxu0 %v3857_v7  ;;  %v3270_v20 = vld [vmem:[%s5112_s10] sm:$0xff] }
0x2d59   :  { %3828 = vtanh.f32 %v3069_v30 }
0x2d5a   :  { %v5042_v44 = vpop.eup %3816 }
0x2d5b   :  { %v5044_v41 = vpop.eup %3818 }
0x2d5c   :  { %v5048_v26 = vpop.eup %3820 }
0x2d5d   :  { %v5054_v37 = vpop.eup %3822 }
0x2d5e   :  { %v5056_v19 = vpop.eup %3824 }
0x2d62   :  { %v5062_v28 = vpop.eup %3826 }
0x2d66   :  { %v5067_v36 = vpop.eup %3828 }
0x2e03   :  { %v3158_v63 = vpop.f32.mrf.mxu0 }
0x2e04   :  { %v3159_v29 = vadd.f32 %v3457_v18, %v3158_v63  ;;  %v3272_v18 = vld [vmem:[%s5112_s10 + $0x10] sm:$0xff]  ;;  %v3271_v63 = vld [vmem:[%s5112_s10 + $0x8] sm:$0xff] }
0x2e05   :  { %v3522_v13 = vpop.f32.mrf.mxu0  ;;  %3526 = vmatpush3.msra.mxu0 %v3272_v18 }
0x2e06   :  { %v3162_v34 = vmax.f32 %v3159_v29, 0.0  ;;  %3527 = vmatprep.subr.mxu0 %v3857_v7 }
0x2e07   :  { %3528 = vmatpush3.msra.mxu0 %v3271_v63 }
0x2e08   :  { %v3163_v51 = vmul.f32 %v5042_v44, %v3162_v34  ;;  %v3167_v59 = vmul.f32 %v5040_v22, %v3162_v34  ;;  %v3171_v38 = vmul.f32 %v5044_v41, %v3162_v34  ;;  %v3179_v14 = vmul.f32 %v5048_v26, %v3162_v34  ;;  %3529 = vmatprep.subr.mxu0 %v3857_v7 }
0x2e09   :  { %v3175_v15 = vmul.f32 %v5056_v19, %v3162_v34  ;;  %v3187_v52 = vmul.f32 %v5054_v37, %v3162_v34  ;;  %v3183_v12 = vmul.f32 %v5062_v28, %v3162_v34  ;;  %v3191_v48 = vmul.f32 %v5067_v36, %v3162_v34  ;;  %3530 = vmatpush3.msra.mxu0 %v3270_v20 }
0x2e0a   :  { %v3164_v16 = vsel %vm261_vm10, %v3163_v51, 0.0  ;;  %v3168_v9 = vsel %vm261_vm10, %v3167_v59, 0.0  ;;  %v3172_v21 = vsel %vm261_vm10, %v3171_v38, 0.0  ;;  %v3180_v39 = vsel %vm261_vm10, %v3179_v14, 0.0 }
0x2e0b   :  { %3165 = vadd.xlane.f32.xlu0 %v3164_v16  ;;  %3169 = vadd.xlane.f32.xlu1 %v3168_v9  ;;  %v3176_v53 = vsel %vm261_vm10, %v3175_v15, 0.0  ;;  %v3188_v27 = vsel %vm261_vm10, %v3187_v52, 0.0  ;;  %v3184_v33 = vsel %vm261_vm10, %v3183_v12, 0.0  ;;  %v3192_v54 = vsel %vm261_vm10, %v3191_v48, 0.0 }
0x2e0f   :  { %3173 = vadd.xlane.f32.xlu0 %v3172_v21  ;;  %3181 = vadd.xlane.f32.xlu1 %v3180_v39 }
0x2e13   :  { %3177 = vadd.xlane.f32.xlu0 %v3176_v53  ;;  %3189 = vadd.xlane.f32.xlu1 %v3188_v27 }
0x2e17   :  { %3185 = vadd.xlane.f32.xlu0 %v3184_v33 }
0x2e1b   :  { %3193 = vadd.xlane.f32.xlu0 %v3192_v54 }
0x2e94   :  { %v3166_v61 = vpop.xlane.xlu0 %3165  ;;  %v3170_v25 = vpop.xlane.xlu1 %3169 }
0x2e95   :  { %v3196_v47 = vsel %vm3195_vm13, %v3166_v61, %v3170_v25 }
0x2e98   :  { %v3174_v49 = vpop.xlane.xlu0 %3173  ;;  %v3182_v45 = vpop.xlane.xlu1 %3181 }
0x2e99   :  { %v3198_v23 = vsel %vm3197_vm14, %v3196_v47, %v3174_v49 }
0x2e9c   :  { %v3178_v43 = vpop.xlane.xlu0 %3177  ;;  %v3190_v56 = vpop.xlane.xlu1 %3189 }
0x2e9d   :  { %v3200_v31 = vsel %vm3199_vm15, %v3198_v23, %v3178_v43 }
0x2e9e   :  { %v3202_v6 = vsel %vm3201_vm0, %v3200_v31, %v3182_v45 }
0x2ea0   :  { %v3186_v58 = vpop.xlane.xlu0 %3185 }
0x2ea1   :  { %v3204_v46 = vsel %vm3203_vm1, %v3202_v6, %v3186_v58 }
0x2ea2   :  { %v3206_v24 = vsel %vm3205_vm2, %v3204_v46, %v3190_v56 }
0x2ea4   :  { %v3194_v57 = vpop.xlane.xlu0 %3193 }
0x2ea5   :  { %v3208_v40 = vsel %vm3207_vm3, %v3206_v24, %v3194_v57 }
0x2ea6   :  { %v3210_v62 = vsel %vm3209_vm4, %v3208_v40, -inf }
0x2ea7   :  { %3211 = vmax.xlane.f32.xlu1 %v3210_v62 }
0x2f30   :  { %v3212_v17 = vpop.xlane.xlu1 %3211 }
0x2f31   :  { %v3213_v0 = vsub.f32 %v3208_v40, %v3212_v17 }
0x2f33   :  { %v3214_v32 = vmul.f32 1.442695, %v3213_v0 }
0x2f35   :  { %3830 = vpow2.f32 %v3214_v32 }
0x2f42   :  { %v3831_v2 = vpop.eup %3830 }
0x2f43   :  { %v3216_v60 = vsel %vm3209_vm4, %v3831_v2, 0.0 }
0x2f44   :  { %3217 = vadd.xlane.f32.xlu0 %v3216_v60 }
0x2fcd   :  { %v3218_v10 = vpop.xlane.xlu0 %3217 }
0x2fce   :  { %3832 = vrcp.f32 %v3218_v10 }
0x2fdb   :  { %v3833_v11 = vpop.eup %3832 }
0x2fdc   :  { %v3220_v3 = vmul.f32 %v3833_v11, %v3831_v2 }
0x2fde   :  { %3229 = vperm.xlu0 %3550, %v3220_v3   ;;  %3223 = vperm.xlu1 %3549, %v3220_v3  }
0x2fe2   :  { %3551 = vset.pattern.permute.xlu1 %v3863_v35  ;;  %3557 = vset.pattern.permute.xlu0 %v3864_v42 }
0x2fe3   :  { %3235 = vperm.xlu1 %3551, %v3220_v3  }
0x2fe7   :  { %3552 = vset.pattern.permute.xlu1 %v3865_v1 }
0x2fe8   :  { %3241 = vperm.xlu1 %3552, %v3220_v3  }
0x2fec   :  { %3553 = vset.pattern.permute.xlu1 %v3866_v50 }
0x2fed   :  { %3247 = vperm.xlu1 %3553, %v3220_v3  }
0x2ff1   :  { %3554 = vset.pattern.permute.xlu1 %v3867_v4 }
0x2ff2   :  { %3253 = vperm.xlu1 %3554, %v3220_v3  }
0x2ff6   :  { %3555 = vset.pattern.permute.xlu1 %v3868_v55 }
0x2ff7   :  { %3259 = vperm.xlu1 %3555, %v3220_v3  }
0x2ffb   :  { %3556 = vset.pattern.permute.xlu1 %v3864_v42 }
0x2ffc   :  { %3265 = vperm.xlu1 %3556, %v3220_v3  }
0x3059   :  { %v3224_v29 = vpop.permute.xlu1 %3223  ;;  %v3230_v34 = vpop.permute.xlu0 %3229 }
0x305a   :  { %v3232_v59 = vmul.f32 %v5040_v22, %v3230_v34  ;;  %v3226_v16 = vmul.f32 %v5042_v44, %v3224_v29 }
0x305c   :  { %v3233_v14 = vadd.f32 %v3232_v59, %v3226_v16 }
0x305e   :  { %v3236_v30 = vpop.permute.xlu1 %3235 }
0x305f   :  { %v3238_v9 = vmul.f32 %v5044_v41, %v3236_v30 }
0x3061   :  { %v3239_v39 = vadd.f32 %v3238_v9, %v3233_v14 }
0x3063   :  { %v3242_v13 = vpop.permute.xlu1 %3241 }
0x3064   :  { %v3244_v21 = vmul.f32 %v5056_v19, %v3242_v13  ;;  %v3459_v19 = vld [vmem:[%s5113_s11] ss:$0 sm:$0xff] }
0x3066   :  { %v3245_v15 = vadd.f32 %v3244_v21, %v3239_v39 }
0x3068   :  { %v3248_v51 = vpop.permute.xlu1 %3247 }
0x3069   :  { %v3250_v7 = vmul.f32 %v5048_v26, %v3248_v51 }
0x306b   :  { %v3251_v27 = vadd.f32 %v3250_v7, %v3245_v15 }
0x306d   :  { %v3254_v38 = vpop.permute.xlu1 %3253 }
0x306e   :  { %v3256_v52 = vmul.f32 %v5062_v28, %v3254_v38 }
0x3070   :  { %v3257_v33 = vadd.f32 %v3256_v52, %v3251_v27 }
0x3072   :  { %v3260_v53 = vpop.permute.xlu1 %3259 }
0x3073   :  { %v3262_v12 = vmul.f32 %v5054_v37, %v3260_v53 }
0x3075   :  { %v3263_v48 = vadd.f32 %v3262_v12, %v3257_v33 }
0x3077   :  { %v3266_v22 = vpop.permute.xlu1 %3265 }
0x3078   :  { %v3268_v44 = vmul.f32 %v5067_v36, %v3266_v22 }
0x307a   :  { %v3269_v41 = vadd.f32 %v3268_v44, %v3263_v48 }
0x307c   :  { %3532 = vmatmul.mubr.msk.f32.vlgmr.msra.gmra.mxu0 %vm261_vm10, %v3269_v41 }
0x313c   :  { %v3350_v26 = vpop.f32.mrf.mxu0 }
0x313d   :  { %v3351_v28 = vadd.f32 %v3459_v19, %v3350_v26 }
0x313e   :  { %v3533_v54 = vpop.f32.mrf.mxu0 }
0x313f   :  { %3355 = vst.msk [vmem:[#allocation7] sm:$0x3] %vm3354_vm5, %v3351_v28 }
0x3140   :  { %3845 = shalt.err (!%p3842_p4)
}
0x3141   :  { %3365 = dma.vmem_to_hbm [thread:$0]  %s3363_s5, 32, %s5114_s12, [#allocation8]  }
0x3142   :  { %3854 = dma.done.wait [#allocation8], 32  }
0x3143   :  { %3855 = vsyncadd [#allocation8], 4294967264 }
0x3144   :  { %3369 = vsyncpa [#allocation8], 1 }

</bundles_post_ra>
